<compile_context>
chip_gen: v5e
topology: v5e:2x2
jax: 0.10.0
libtpu: 0.0.40
codegen_flags: <defaults>
</compile_context>

<pallas_src>
import math

import jax
import jax.numpy as jnp
from jax import lax
from jax.experimental import pallas as pl
from jax.experimental.pallas import tpu as pltpu

LN_EPS = 1e-5
SUBLANE = 8


# ----------------------------------------------------------------------------
# Fused kernel: 3 x (BiLSTM + LayerNorm) + Linear/ReLU/Linear/Sigmoid head
# ----------------------------------------------------------------------------
def _fused_forward_kernel(x_ref,
                          win1_ref, bin1_ref, whh1_ref, g1_ref, be1_ref,
                          win2_ref, bin2_ref, whh2_ref, g2_ref, be2_ref,
                          win3_ref, bin3_ref, whh3_ref, g3_ref, be3_ref,
                          cw1_ref, cb1_ref, cw2_ref, cb2_ref,
                          out_ref,
                          proj_ref, gin_ref, hist_ref, act_ref):
    TB = proj_ref.shape[0]            # T * Bp (Bp = batch padded to 8 sublanes)
    Bp = out_ref.shape[0]
    T = TB // Bp

    def bilstm_ln(x_val, win_ref, bin_ref, whh_ref, gamma_ref, beta_ref):
        """One BiLSTM layer + LayerNorm; returns the (T*Bp, 2H) activations."""
        H2 = whh_ref.shape[0]          # hidden_total = 2 * per-direction H
        H = H2 // 2
        Gw = 4 * H2                    # packed gate width (= 8 * H)
        whh = whh_ref[...]             # (2H, 8H) block-diagonal, loop-invariant

        # (1) hoisted input projection with folded bias: one MXU matmul/layer.
        proj_ref[:, 0:Gw] = (
            jnp.dot(x_val, win_ref[...], preferred_element_type=jnp.float32)
            + bin_ref[...])

        # (2) direction-combined gate-input slab, built once per layer (off the
        #     serial path).  Column blocks are [i_f,i_b,f_f,f_b,o_f,o_b,g_f,g_b];
        #     gin[s] = [fwd cols of proj[time s] | bwd cols of proj[time T-1-s]].
        col = lax.broadcasted_iota(jnp.int32, (Bp, Gw), 1)
        is_fwd_col = (col % H2) < H
        for t in range(T):             # static, fully vectorized selects
            fr = t * Bp
            br = (T - 1 - t) * Bp
            gin_ref[fr:fr + Bp, 0:Gw] = jnp.where(
                is_fwd_col,
                proj_ref[fr:fr + Bp, 0:Gw],
                proj_ref[br:br + Bp, 0:Gw])

        h0 = jnp.zeros((Bp, H2), jnp.float32)      # [h_fwd | h_bwd]
        c0 = jnp.zeros((Bp, H2), jnp.float32)      # [c_fwd | c_bwd]

        # (3) serial recurrence: one aligned (Bp, 8H) load, one small MXU
        #     matmul, one contiguous sigmoid + one tanh, one full-width store.
        def step(s, carry):
            h, c = carry
            rs = pl.multiple_of(s * Bp, Bp)        # 8-sublane aligned offset
            gates = (jnp.dot(h, whh, preferred_element_type=jnp.float32)
                     + gin_ref[pl.ds(rs, Bp), 0:Gw])            # (Bp, 8H)
            sig = jax.nn.sigmoid(gates[:, 0:3 * H2])            # i, f, o
            i = sig[:, 0:H2]
            f = sig[:, H2:2 * H2]
            o = sig[:, 2 * H2:3 * H2]
            g = jnp.tanh(gates[:, 3 * H2:4 * H2])               # g last
            c_new = f * c + i * g
            h_new = o * jnp.tanh(c_new)
            hist_ref[pl.ds(rs, Bp), 0:H2] = h_new   # single lane-dense store
            return (h_new, c_new)

        lax.fori_loop(0, T, step, (h0, c0), unroll=True)

        # (4) re-time-order the backward half (off the serial path):
        #     act[t] = [hist[t, :H] | hist[T-1-t, H:]]
        lane = lax.broadcasted_iota(jnp.int32, (Bp, H2), 1)
        take_left = lane < H
        for t in range(T):             # static, vectorized selects
            fr = t * Bp
            br = (T - 1 - t) * Bp
            act_ref[fr:fr + Bp, 0:H2] = jnp.where(
                take_left,
                hist_ref[fr:fr + Bp, 0:H2],
                hist_ref[br:br + Bp, 0:H2])

        # (5) LayerNorm over 2H, single-pass stats (biased variance, eps=1e-5).
        seq = act_ref[:, 0:H2]
        inv_n = 1.0 / H2
        s1 = jnp.sum(seq, axis=-1, keepdims=True)
        s2 = jnp.sum(seq * seq, axis=-1, keepdims=True)
        mean = s1 * inv_n
        var = s2 * inv_n - mean * mean
        normed = (seq - mean) * lax.rsqrt(var + LN_EPS)
        return normed * gamma_ref[...] + beta_ref[...]

    # lstm1+norm1 (+drop1=id), lstm2+norm2 (+drop2=id), lstm3+norm3.
    a1 = bilstm_ln(x_ref[...], win1_ref, bin1_ref, whh1_ref, g1_ref, be1_ref)
    a2 = bilstm_ln(a1, win2_ref, bin2_ref, whh2_ref, g2_ref, be2_ref)
    a3 = bilstm_ln(a2, win3_ref, bin3_ref, whh3_ref, g3_ref, be3_ref)

    # classifier epilogue on features = out[:, -1, :] (last time-step rows).
    feats = a3[(T - 1) * Bp:T * Bp, :]                          # (Bp, 2H)
    h1 = jnp.maximum(
        jnp.dot(feats, cw1_ref[...], preferred_element_type=jnp.float32)
        + cb1_ref[...], 0.0)
    logit = (jnp.dot(h1, cw2_ref[...], preferred_element_type=jnp.float32)
             + cb2_ref[...])
    out_ref[...] = jax.nn.sigmoid(logit)

    # TODO(synk): on v7x the two LSTM directions could run on the two
    # TensorCores via pl.core_map + core_barrier; kept single-TC for portability.


# ----------------------------------------------------------------------------
# Wrapper: one pallas_call for the whole forward
# ----------------------------------------------------------------------------
def feature_selection_lstm_forward(x, packed_params):
    """x: (B, T, input_size) batch-first (PyTorch convention) -> (B, 1)."""
    B, T, D = x.shape
    Bp = max(SUBLANE, ((B + SUBLANE - 1) // SUBLANE) * SUBLANE)

    # glue: time-major, batch zero-padded to Bp sublanes, flattened to
    # (T*Bp, D) so row t*Bp + b == (time t, batch b).
    x_t = jnp.transpose(x, (1, 0, 2)).astype(jnp.float32)       # (T, B, D)
    x_t = jnp.pad(x_t, ((0, 0), (0, Bp - B), (0, 0)))           # (T, Bp, D)
    x2d = x_t.reshape(T * Bp, D)

    flat = ([x2d]
            + list(packed_params["layer1"])
            + list(packed_params["layer2"])
            + list(packed_params["layer3"])
            + list(packed_params["clf"]))

    h2_max = max(packed_params[k][3].shape[1]       # gamma is (1, 2H)
                 for k in ("layer1", "layer2", "layer3"))
    gw_max = 4 * h2_max

    in_specs = [pl.BlockSpec(a.shape, lambda i: (0, 0)) for a in flat]
    out_full = pl.pallas_call(
        _fused_forward_kernel,
        out_shape=jax.ShapeDtypeStruct((Bp, 1), jnp.float32),
        grid=(1,),
        in_specs=in_specs,
        out_specs=pl.BlockSpec((Bp, 1), lambda i: (0, 0)),
        scratch_shapes=[
            pltpu.VMEM((T * Bp, gw_max), jnp.float32),   # proj: x @ W_in + b
            pltpu.VMEM((T * Bp, gw_max), jnp.float32),   # gin: combined gate inputs
            pltpu.VMEM((T * Bp, h2_max), jnp.float32),   # hist: per-step h (step order)
            pltpu.VMEM((T * Bp, h2_max), jnp.float32),   # act: time-ordered h
        ],
        compiler_params=pltpu.CompilerParams(
            dimension_semantics=("arbitrary",),
            vmem_limit_bytes=32 * 1024 * 1024),
    )(*flat)
    return out_full[:B]


# ----------------------------------------------------------------------------
# Weight packing (plain-JAX, done once): PyTorch-style -> fused-kernel layout
# ----------------------------------------------------------------------------
def _pack_gate_cols(wf, wb, H):
    # Per-direction PyTorch gate column order is [i, f, g, o]; repack to
    # [i, f, o, g] (sigmoid gates contiguous, tanh block last) and interleave
    # directions per gate block: [i_f,i_b, f_f,f_b, o_f,o_b, g_f,g_b].
    parts = []
    for j in (0, 1, 3, 2):
        parts.append(wf[:, j * H:(j + 1) * H])
        parts.append(wb[:, j * H:(j + 1) * H])
    return jnp.concatenate(parts, axis=-1)


def pack_bilstm_params(p):
    H = p["whh_f"].shape[0]
    w_in = _pack_gate_cols(p["wih_f"], p["wih_b"], H)           # (D, 8H)
    b_in = _pack_gate_cols(p["b_f"], p["b_b"], H)               # (1, 8H)
    z = jnp.zeros_like(p["whh_f"])
    # block-diagonal (2H, 8H): h_fwd rows only feed fwd gate columns,
    # h_bwd rows only feed bwd gate columns (off-diagonal blocks exact 0).
    w_hh = jnp.concatenate(
        [_pack_gate_cols(p["whh_f"], z, H),
         _pack_gate_cols(z, p["whh_b"], H)], axis=0)
    return [w_in, b_in, w_hh, p["gamma"], p["beta"]]


def pack_params(params):
    return dict(
        layer1=pack_bilstm_params(params["layer1"]),
        layer2=pack_bilstm_params(params["layer2"]),
        layer3=pack_bilstm_params(params["layer3"]),
        clf=[params["clf"]["w1"], params["clf"]["b1"],
             params["clf"]["w2"], params["clf"]["b2"]],
    )


# ----------------------------------------------------------------------------
# Deterministic parameter initialization (PyTorch-style uniform(-k, k))
# ----------------------------------------------------------------------------
def init_bilstm_params(key, d_in, hidden_total):
    H = hidden_total // 2
    k = 1.0 / math.sqrt(H)
    ks = jax.random.split(key, 6)

    def u(kk, shape):
        return jax.random.uniform(kk, shape, jnp.float32, -k, k)

    return dict(
        wih_f=u(ks[0], (d_in, 4 * H)),      # W_ih^T, gate order i,f,g,o
        whh_f=u(ks[1], (H, 4 * H)),         # W_hh^T
        b_f=u(ks[2], (1, 4 * H)),           # b_ih + b_hh folded
        wih_b=u(ks[3], (d_in, 4 * H)),
        whh_b=u(ks[4], (H, 4 * H)),
        b_b=u(ks[5], (1, 4 * H)),
        gamma=jnp.ones((1, hidden_total), jnp.float32),
        beta=jnp.zeros((1, hidden_total), jnp.float32),
    )


def init_classifier_params(key, d_in, d_hidden):
    k1 = 1.0 / math.sqrt(d_in)
    k2 = 1.0 / math.sqrt(d_hidden)
    ks = jax.random.split(key, 4)
    return dict(
        w1=jax.random.uniform(ks[0], (d_in, d_hidden), jnp.float32, -k1, k1),
        b1=jax.random.uniform(ks[1], (1, d_hidden), jnp.float32, -k1, k1),
        w2=jax.random.uniform(ks[2], (d_hidden, 1), jnp.float32, -k2, k2),
        b2=jax.random.uniform(ks[3], (1, 1), jnp.float32, -k2, k2),
    )


if __name__ == "__main__":
    # config: LSTM_HIDDEN_1 = LSTM_HIDDEN_2 = LSTM_OUTPUT_DIM = 32, input_size = 16
    B, T, D_IN = 2, 8, 16
    LSTM_HIDDEN_1 = LSTM_HIDDEN_2 = LSTM_OUTPUT_DIM = 32

    key = jax.random.PRNGKey(0)
    kx, k1, k2, k3, k4 = jax.random.split(key, 5)

    x = jax.random.normal(kx, (B, T, D_IN), jnp.float32)

    params = dict(
        layer1=init_bilstm_params(k1, D_IN, LSTM_HIDDEN_1),
        layer2=init_bilstm_params(k2, LSTM_HIDDEN_1, LSTM_HIDDEN_2),
        layer3=init_bilstm_params(k3, LSTM_HIDDEN_2, LSTM_OUTPUT_DIM),
        clf=init_classifier_params(k4, LSTM_OUTPUT_DIM, 32),
    )
    packed = pack_params(params)

    y = feature_selection_lstm_forward(x, packed)
    y = jax.block_until_ready(y)
    assert y.shape == (B, 1), y.shape
    assert bool(jnp.all(jnp.isfinite(y)))
    assert bool(jnp.all((y >= 0.0) & (y <= 1.0)))
    print("KERNEL_OK")
</pallas_src>

<mosaic_0001>
module attributes {stable_mosaic.version = 11 : i64} {
  func.func @_fused_forward_kernel(%arg0: i32, %arg1: memref<64x16xf32, #tpu.memory_space<vmem>>, %arg2: memref<16x128xf32, #tpu.memory_space<vmem>>, %arg3: memref<1x128xf32, #tpu.memory_space<vmem>>, %arg4: memref<32x128xf32, #tpu.memory_space<vmem>>, %arg5: memref<1x32xf32, #tpu.memory_space<vmem>>, %arg6: memref<1x32xf32, #tpu.memory_space<vmem>>, %arg7: memref<32x128xf32, #tpu.memory_space<vmem>>, %arg8: memref<1x128xf32, #tpu.memory_space<vmem>>, %arg9: memref<32x128xf32, #tpu.memory_space<vmem>>, %arg10: memref<1x32xf32, #tpu.memory_space<vmem>>, %arg11: memref<1x32xf32, #tpu.memory_space<vmem>>, %arg12: memref<32x128xf32, #tpu.memory_space<vmem>>, %arg13: memref<1x128xf32, #tpu.memory_space<vmem>>, %arg14: memref<32x128xf32, #tpu.memory_space<vmem>>, %arg15: memref<1x32xf32, #tpu.memory_space<vmem>>, %arg16: memref<1x32xf32, #tpu.memory_space<vmem>>, %arg17: memref<32x32xf32, #tpu.memory_space<vmem>>, %arg18: memref<1x32xf32, #tpu.memory_space<vmem>>, %arg19: memref<32x1xf32, #tpu.memory_space<vmem>>, %arg20: memref<1x1xf32, #tpu.memory_space<vmem>>, %arg21: memref<8x1xf32, #tpu.memory_space<vmem>>, %arg22: memref<64x128xf32, #tpu.memory_space<vmem>>, %arg23: memref<64x128xf32, #tpu.memory_space<vmem>>, %arg24: memref<64x32xf32, #tpu.memory_space<vmem>>, %arg25: memref<64x32xf32, #tpu.memory_space<vmem>>) attributes {dimension_semantics = [#tpu.dimension_semantics<arbitrary>], iteration_bounds = array<i64: 1>, scalar_prefetch = 0 : i64, scratch_operands = 4 : i64, tpu.core_type = #tpu.core_type<tc>, window_params = [{pipeline_mode = #tpu.pipeline_mode<synchronous>, transform_indices = @transform_0, window_bounds = array<i64: 64, 16>}, {pipeline_mode = #tpu.pipeline_mode<synchronous>, transform_indices = @transform_1, window_bounds = array<i64: 16, 128>}, {pipeline_mode = #tpu.pipeline_mode<synchronous>, transform_indices = @transform_2, window_bounds = array<i64: 1, 128>}, {pipeline_mode = #tpu.pipeline_mode<synchronous>, transform_indices = @transform_3, window_bounds = array<i64: 32, 128>}, {pipeline_mode = #tpu.pipeline_mode<synchronous>, transform_indices = @transform_4, window_bounds = array<i64: 1, 32>}, {pipeline_mode = #tpu.pipeline_mode<synchronous>, transform_indices = @transform_5, window_bounds = array<i64: 1, 32>}, {pipeline_mode = #tpu.pipeline_mode<synchronous>, transform_indices = @transform_6, window_bounds = array<i64: 32, 128>}, {pipeline_mode = #tpu.pipeline_mode<synchronous>, transform_indices = @transform_7, window_bounds = array<i64: 1, 128>}, {pipeline_mode = #tpu.pipeline_mode<synchronous>, transform_indices = @transform_8, window_bounds = array<i64: 32, 128>}, {pipeline_mode = #tpu.pipeline_mode<synchronous>, transform_indices = @transform_9, window_bounds = array<i64: 1, 32>}, {pipeline_mode = #tpu.pipeline_mode<synchronous>, transform_indices = @transform_10, window_bounds = array<i64: 1, 32>}, {pipeline_mode = #tpu.pipeline_mode<synchronous>, transform_indices = @transform_11, window_bounds = array<i64: 32, 128>}, {pipeline_mode = #tpu.pipeline_mode<synchronous>, transform_indices = @transform_12, window_bounds = array<i64: 1, 128>}, {pipeline_mode = #tpu.pipeline_mode<synchronous>, transform_indices = @transform_13, window_bounds = array<i64: 32, 128>}, {pipeline_mode = #tpu.pipeline_mode<synchronous>, transform_indices = @transform_14, window_bounds = array<i64: 1, 32>}, {pipeline_mode = #tpu.pipeline_mode<synchronous>, transform_indices = @transform_15, window_bounds = array<i64: 1, 32>}, {pipeline_mode = #tpu.pipeline_mode<synchronous>, transform_indices = @transform_16, window_bounds = array<i64: 32, 32>}, {pipeline_mode = #tpu.pipeline_mode<synchronous>, transform_indices = @transform_17, window_bounds = array<i64: 1, 32>}, {pipeline_mode = #tpu.pipeline_mode<synchronous>, transform_indices = @transform_18, window_bounds = array<i64: 32, 1>}, {pipeline_mode = #tpu.pipeline_mode<synchronous>, transform_indices = @transform_19, window_bounds = array<i64: 1, 1>}, {pipeline_mode = #tpu.pipeline_mode<synchronous>, transform_indices = @transform_20, window_bounds = array<i64: 8, 1>}]} {
    %c0 = arith.constant 0 : index
    %c0_0 = arith.constant 0 : index
    %0 = vector.load %arg1[%c0, %c0_0] : memref<64x16xf32, #tpu.memory_space<vmem>>, vector<64x16xf32>
    %c0_1 = arith.constant 0 : index
    %c0_2 = arith.constant 0 : index
    %1 = vector.load %arg4[%c0_1, %c0_2] : memref<32x128xf32, #tpu.memory_space<vmem>>, vector<32x128xf32>
    %c0_3 = arith.constant 0 : index
    %c0_4 = arith.constant 0 : index
    %2 = vector.load %arg2[%c0_3, %c0_4] : memref<16x128xf32, #tpu.memory_space<vmem>>, vector<16x128xf32>
    %cst = arith.constant dense<0.000000e+00> : vector<64x128xf32>
    %3 = tpu.matmul %0, %2, %cst {dimension_numbers = #tpu.dot_dimension_numbers<[1], [0], [0], [1], [0, 0, 1, 1], [], []>} : vector<64x16xf32>, vector<16x128xf32>, vector<64x128xf32> -> vector<64x128xf32>
    %c0_5 = arith.constant 0 : index
    %c0_6 = arith.constant 0 : index
    %4 = vector.load %arg3[%c0_5, %c0_6] : memref<1x128xf32, #tpu.memory_space<vmem>>, vector<1x128xf32>
    %5 = vector.broadcast %4 : vector<1x128xf32> to vector<64x128xf32>
    %6 = arith.addf %3, %5 : vector<64x128xf32>
    %c0_7 = arith.constant 0 : index
    %c0_8 = arith.constant 0 : index
    %7 = vector.load %arg22[%c0_7, %c0_8] : memref<64x128xf32, #tpu.memory_space<vmem>>, vector<64x128xf32>
    tpu.vector_store %arg22[%c0_7, %c0_8], %6 {strides = array<i32>} : memref<64x128xf32, #tpu.memory_space<vmem>>, vector<64x128xf32>,
    %8 = tpu.iota {dimensions = array<i32: 1>} : vector<8x128xi32>
    %c32_i32 = arith.constant 32 : i32
    %c0_i32 = arith.constant 0 : i32
    %9 = arith.cmpi eq, %c32_i32, %c0_i32 : i32
    %c1_i32 = arith.constant 1 : i32
    %10 = arith.select %9, %c1_i32, %c32_i32 : i32
    %11 = vector.broadcast %10 : i32 to vector<8x128xi32>
    %12 = arith.remsi %8, %11 : vector<8x128xi32>
    %c0_i32_9 = arith.constant 0 : i32
    %13 = vector.broadcast %c0_i32_9 : i32 to vector<8x128xi32>
    %14 = arith.cmpi ne, %12, %13 : vector<8x128xi32>
    %c0_i32_10 = arith.constant 0 : i32
    %15 = vector.broadcast %c0_i32_10 : i32 to vector<8x128xi32>
    %16 = arith.cmpi slt, %12, %15 : vector<8x128xi32>
    %c0_i32_11 = arith.constant 0 : i32
    %17 = arith.cmpi slt, %10, %c0_i32_11 : i32
    %18 = vector.broadcast %17 : i1 to vector<8x128xi1>
    %19 = vector.broadcast %18 : vector<8x128xi1> to vector<8x128xi1>
    %20 = arith.xori %16, %19 : vector<8x128xi1>
    %21 = arith.andi %20, %14 : vector<8x128xi1>
    %22 = vector.broadcast %10 : i32 to vector<8x128xi32>
    %23 = arith.addi %12, %22 : vector<8x128xi32>
    %24 = arith.select %21, %23, %12 : vector<8x128xi1>, vector<8x128xi32>
    %c16_i32 = arith.constant 16 : i32
    %25 = vector.broadcast %c16_i32 : i32 to vector<8x128xi32>
    %26 = arith.cmpi slt, %24, %25 : vector<8x128xi32>
    %c0_12 = arith.constant 0 : index
    %c0_13 = arith.constant 0 : index
    %27 = vector.load %arg22[%c0_12, %c0_13] : memref<64x128xf32, #tpu.memory_space<vmem>>, vector<8x128xf32>
    %c56 = arith.constant 56 : index
    %c0_14 = arith.constant 0 : index
    %28 = vector.load %arg22[%c56, %c0_14] : memref<64x128xf32, #tpu.memory_space<vmem>>, vector<8x128xf32>
    %29 = arith.select %26, %27, %28 : vector<8x128xi1>, vector<8x128xf32>
    %c0_15 = arith.constant 0 : index
    %c0_16 = arith.constant 0 : index
    %30 = vector.load %arg23[%c0_15, %c0_16] : memref<64x128xf32, #tpu.memory_space<vmem>>, vector<8x128xf32>
    tpu.vector_store %arg23[%c0_15, %c0_16], %29 {strides = array<i32>} : memref<64x128xf32, #tpu.memory_space<vmem>>, vector<8x128xf32>,
    %c8 = arith.constant 8 : index
    %c0_17 = arith.constant 0 : index
    %31 = vector.load %arg22[%c8, %c0_17] : memref<64x128xf32, #tpu.memory_space<vmem>>, vector<8x128xf32>
    %c48 = arith.constant 48 : index
    %c0_18 = arith.constant 0 : index
    %32 = vector.load %arg22[%c48, %c0_18] : memref<64x128xf32, #tpu.memory_space<vmem>>, vector<8x128xf32>
    %33 = arith.select %26, %31, %32 : vector<8x128xi1>, vector<8x128xf32>
    %c8_19 = arith.constant 8 : index
    %c0_20 = arith.constant 0 : index
    %34 = vector.load %arg23[%c8_19, %c0_20] : memref<64x128xf32, #tpu.memory_space<vmem>>, vector<8x128xf32>
    tpu.vector_store %arg23[%c8_19, %c0_20], %33 {strides = array<i32>} : memref<64x128xf32, #tpu.memory_space<vmem>>, vector<8x128xf32>,
    %c16 = arith.constant 16 : index
    %c0_21 = arith.constant 0 : index
    %35 = vector.load %arg22[%c16, %c0_21] : memref<64x128xf32, #tpu.memory_space<vmem>>, vector<8x128xf32>
    %c40 = arith.constant 40 : index
    %c0_22 = arith.constant 0 : index
    %36 = vector.load %arg22[%c40, %c0_22] : memref<64x128xf32, #tpu.memory_space<vmem>>, vector<8x128xf32>
    %37 = arith.select %26, %35, %36 : vector<8x128xi1>, vector<8x128xf32>
    %c16_23 = arith.constant 16 : index
    %c0_24 = arith.constant 0 : index
    %38 = vector.load %arg23[%c16_23, %c0_24] : memref<64x128xf32, #tpu.memory_space<vmem>>, vector<8x128xf32>
    tpu.vector_store %arg23[%c16_23, %c0_24], %37 {strides = array<i32>} : memref<64x128xf32, #tpu.memory_space<vmem>>, vector<8x128xf32>,
    %c24 = arith.constant 24 : index
    %c0_25 = arith.constant 0 : index
    %39 = vector.load %arg22[%c24, %c0_25] : memref<64x128xf32, #tpu.memory_space<vmem>>, vector<8x128xf32>
    %c32 = arith.constant 32 : index
    %c0_26 = arith.constant 0 : index
    %40 = vector.load %arg22[%c32, %c0_26] : memref<64x128xf32, #tpu.memory_space<vmem>>, vector<8x128xf32>
    %41 = arith.select %26, %39, %40 : vector<8x128xi1>, vector<8x128xf32>
    %c24_27 = arith.constant 24 : index
    %c0_28 = arith.constant 0 : index
    %42 = vector.load %arg23[%c24_27, %c0_28] : memref<64x128xf32, #tpu.memory_space<vmem>>, vector<8x128xf32>
    tpu.vector_store %arg23[%c24_27, %c0_28], %41 {strides = array<i32>} : memref<64x128xf32, #tpu.memory_space<vmem>>, vector<8x128xf32>,
    %c32_29 = arith.constant 32 : index
    %c0_30 = arith.constant 0 : index
    %43 = vector.load %arg22[%c32_29, %c0_30] : memref<64x128xf32, #tpu.memory_space<vmem>>, vector<8x128xf32>
    %c24_31 = arith.constant 24 : index
    %c0_32 = arith.constant 0 : index
    %44 = vector.load %arg22[%c24_31, %c0_32] : memref<64x128xf32, #tpu.memory_space<vmem>>, vector<8x128xf32>
    %45 = arith.select %26, %43, %44 : vector<8x128xi1>, vector<8x128xf32>
    %c32_33 = arith.constant 32 : index
    %c0_34 = arith.constant 0 : index
    %46 = vector.load %arg23[%c32_33, %c0_34] : memref<64x128xf32, #tpu.memory_space<vmem>>, vector<8x128xf32>
    tpu.vector_store %arg23[%c32_33, %c0_34], %45 {strides = array<i32>} : memref<64x128xf32, #tpu.memory_space<vmem>>, vector<8x128xf32>,
    %c40_35 = arith.constant 40 : index
    %c0_36 = arith.constant 0 : index
    %47 = vector.load %arg22[%c40_35, %c0_36] : memref<64x128xf32, #tpu.memory_space<vmem>>, vector<8x128xf32>
    %c16_37 = arith.constant 16 : index
    %c0_38 = arith.constant 0 : index
    %48 = vector.load %arg22[%c16_37, %c0_38] : memref<64x128xf32, #tpu.memory_space<vmem>>, vector<8x128xf32>
    %49 = arith.select %26, %47, %48 : vector<8x128xi1>, vector<8x128xf32>
    %c40_39 = arith.constant 40 : index
    %c0_40 = arith.constant 0 : index
    %50 = vector.load %arg23[%c40_39, %c0_40] : memref<64x128xf32, #tpu.memory_space<vmem>>, vector<8x128xf32>
    tpu.vector_store %arg23[%c40_39, %c0_40], %49 {strides = array<i32>} : memref<64x128xf32, #tpu.memory_space<vmem>>, vector<8x128xf32>,
    %c48_41 = arith.constant 48 : index
    %c0_42 = arith.constant 0 : index
    %51 = vector.load %arg22[%c48_41, %c0_42] : memref<64x128xf32, #tpu.memory_space<vmem>>, vector<8x128xf32>
    %c8_43 = arith.constant 8 : index
    %c0_44 = arith.constant 0 : index
    %52 = vector.load %arg22[%c8_43, %c0_44] : memref<64x128xf32, #tpu.memory_space<vmem>>, vector<8x128xf32>
    %53 = arith.select %26, %51, %52 : vector<8x128xi1>, vector<8x128xf32>
    %c48_45 = arith.constant 48 : index
    %c0_46 = arith.constant 0 : index
    %54 = vector.load %arg23[%c48_45, %c0_46] : memref<64x128xf32, #tpu.memory_space<vmem>>, vector<8x128xf32>
    tpu.vector_store %arg23[%c48_45, %c0_46], %53 {strides = array<i32>} : memref<64x128xf32, #tpu.memory_space<vmem>>, vector<8x128xf32>,
    %c56_47 = arith.constant 56 : index
    %c0_48 = arith.constant 0 : index
    %55 = vector.load %arg22[%c56_47, %c0_48] : memref<64x128xf32, #tpu.memory_space<vmem>>, vector<8x128xf32>
    %c0_49 = arith.constant 0 : index
    %c0_50 = arith.constant 0 : index
    %56 = vector.load %arg22[%c0_49, %c0_50] : memref<64x128xf32, #tpu.memory_space<vmem>>, vector<8x128xf32>
    %57 = arith.select %26, %55, %56 : vector<8x128xi1>, vector<8x128xf32>
    %c56_51 = arith.constant 56 : index
    %c0_52 = arith.constant 0 : index
    %58 = vector.load %arg23[%c56_51, %c0_52] : memref<64x128xf32, #tpu.memory_space<vmem>>, vector<8x128xf32>
    tpu.vector_store %arg23[%c56_51, %c0_52], %57 {strides = array<i32>} : memref<64x128xf32, #tpu.memory_space<vmem>>, vector<8x128xf32>,
    %cst_53 = arith.constant 0.000000e+00 : f32
    %59 = vector.broadcast %cst_53 : f32 to vector<8x32xf32>
    %cst_54 = arith.constant 0.000000e+00 : f32
    %60 = vector.broadcast %cst_54 : f32 to vector<8x32xf32>
    %c0_i32_55 = arith.constant 0 : i32
    %c8_i32 = arith.constant 8 : i32
    %61 = arith.muli %c0_i32_55, %c8_i32 : i32
    %62 = tpu.assume_multiple %61, 8 : i32
    %cst_56 = arith.constant dense<0.000000e+00> : vector<8x128xf32>
    %63 = tpu.matmul %59, %1, %cst_56 {dimension_numbers = #tpu.dot_dimension_numbers<[1], [0], [0], [1], [0, 0, 1, 1], [], []>} : vector<8x32xf32>, vector<32x128xf32>, vector<8x128xf32> -> vector<8x128xf32>
    %64 = arith.index_cast %62 : i32 to index
    %c0_57 = arith.constant 0 : index
    %65 = vector.load %arg23[%64, %c0_57] : memref<64x128xf32, #tpu.memory_space<vmem>>, vector<8x128xf32>
    %66 = arith.addf %63, %65 : vector<8x128xf32>
    %67 = vector.extract_strided_slice %66 {offsets = [0, 0], sizes = [8, 96], strides = [1, 1]} : vector<8x128xf32> to vector<8x96xf32>
    %68 = arith.negf %67 : vector<8x96xf32>
    %69 = math.exp %68 : vector<8x96xf32>
    %cst_58 = arith.constant 1.000000e+00 : f32
    %70 = vector.broadcast %cst_58 : f32 to vector<8x96xf32>
    %71 = arith.addf %70, %69 : vector<8x96xf32>
    %72 = arith.divf %70, %71 : vector<8x96xf32>
    %73 = vector.extract_strided_slice %72 {offsets = [0, 0], sizes = [8, 32], strides = [1, 1]} : vector<8x96xf32> to vector<8x32xf32>
    %74 = vector.extract_strided_slice %72 {offsets = [0, 32], sizes = [8, 32], strides = [1, 1]} : vector<8x96xf32> to vector<8x32xf32>
    %75 = vector.extract_strided_slice %72 {offsets = [0, 64], sizes = [8, 32], strides = [1, 1]} : vector<8x96xf32> to vector<8x32xf32>
    %76 = vector.extract_strided_slice %66 {offsets = [0, 96], sizes = [8, 32], strides = [1, 1]} : vector<8x128xf32> to vector<8x32xf32>
    %77 = math.tanh %76 : vector<8x32xf32>
    %78 = arith.mulf %74, %60 : vector<8x32xf32>
    %79 = arith.mulf %73, %77 : vector<8x32xf32>
    %80 = arith.addf %78, %79 : vector<8x32xf32>
    %81 = math.tanh %80 : vector<8x32xf32>
    %82 = arith.mulf %75, %81 : vector<8x32xf32>
    %83 = arith.index_cast %62 : i32 to index
    %c0_59 = arith.constant 0 : index
    %84 = vector.load %arg24[%83, %c0_59] : memref<64x32xf32, #tpu.memory_space<vmem>>, vector<8x32xf32>
    tpu.vector_store %arg24[%83, %c0_59], %82 {strides = array<i32>} : memref<64x32xf32, #tpu.memory_space<vmem>>, vector<8x32xf32>,
    %c1_i32_60 = arith.constant 1 : i32
    %c8_i32_61 = arith.constant 8 : i32
    %85 = arith.muli %c1_i32_60, %c8_i32_61 : i32
    %86 = tpu.assume_multiple %85, 8 : i32
    %cst_62 = arith.constant dense<0.000000e+00> : vector<8x128xf32>
    %87 = tpu.matmul %82, %1, %cst_62 {dimension_numbers = #tpu.dot_dimension_numbers<[1], [0], [0], [1], [0, 0, 1, 1], [], []>} : vector<8x32xf32>, vector<32x128xf32>, vector<8x128xf32> -> vector<8x128xf32>
    %88 = arith.index_cast %86 : i32 to index
    %c0_63 = arith.constant 0 : index
    %89 = vector.load %arg23[%88, %c0_63] : memref<64x128xf32, #tpu.memory_space<vmem>>, vector<8x128xf32>
    %90 = arith.addf %87, %89 : vector<8x128xf32>
    %91 = vector.extract_strided_slice %90 {offsets = [0, 0], sizes = [8, 96], strides = [1, 1]} : vector<8x128xf32> to vector<8x96xf32>
    %92 = arith.negf %91 : vector<8x96xf32>
    %93 = math.exp %92 : vector<8x96xf32>
    %cst_64 = arith.constant 1.000000e+00 : f32
    %94 = vector.broadcast %cst_64 : f32 to vector<8x96xf32>
    %95 = arith.addf %94, %93 : vector<8x96xf32>
    %96 = arith.divf %94, %95 : vector<8x96xf32>
    %97 = vector.extract_strided_slice %96 {offsets = [0, 0], sizes = [8, 32], strides = [1, 1]} : vector<8x96xf32> to vector<8x32xf32>
    %98 = vector.extract_strided_slice %96 {offsets = [0, 32], sizes = [8, 32], strides = [1, 1]} : vector<8x96xf32> to vector<8x32xf32>
    %99 = vector.extract_strided_slice %96 {offsets = [0, 64], sizes = [8, 32], strides = [1, 1]} : vector<8x96xf32> to vector<8x32xf32>
    %100 = vector.extract_strided_slice %90 {offsets = [0, 96], sizes = [8, 32], strides = [1, 1]} : vector<8x128xf32> to vector<8x32xf32>
    %101 = math.tanh %100 : vector<8x32xf32>
    %102 = arith.mulf %98, %80 : vector<8x32xf32>
    %103 = arith.mulf %97, %101 : vector<8x32xf32>
    %104 = arith.addf %102, %103 : vector<8x32xf32>
    %105 = math.tanh %104 : vector<8x32xf32>
    %106 = arith.mulf %99, %105 : vector<8x32xf32>
    %107 = arith.index_cast %86 : i32 to index
    %c0_65 = arith.constant 0 : index
    %108 = vector.load %arg24[%107, %c0_65] : memref<64x32xf32, #tpu.memory_space<vmem>>, vector<8x32xf32>
    tpu.vector_store %arg24[%107, %c0_65], %106 {strides = array<i32>} : memref<64x32xf32, #tpu.memory_space<vmem>>, vector<8x32xf32>,
    %c2_i32 = arith.constant 2 : i32
    %c8_i32_66 = arith.constant 8 : i32
    %109 = arith.muli %c2_i32, %c8_i32_66 : i32
    %110 = tpu.assume_multiple %109, 8 : i32
    %cst_67 = arith.constant dense<0.000000e+00> : vector<8x128xf32>
    %111 = tpu.matmul %106, %1, %cst_67 {dimension_numbers = #tpu.dot_dimension_numbers<[1], [0], [0], [1], [0, 0, 1, 1], [], []>} : vector<8x32xf32>, vector<32x128xf32>, vector<8x128xf32> -> vector<8x128xf32>
    %112 = arith.index_cast %110 : i32 to index
    %c0_68 = arith.constant 0 : index
    %113 = vector.load %arg23[%112, %c0_68] : memref<64x128xf32, #tpu.memory_space<vmem>>, vector<8x128xf32>
    %114 = arith.addf %111, %113 : vector<8x128xf32>
    %115 = vector.extract_strided_slice %114 {offsets = [0, 0], sizes = [8, 96], strides = [1, 1]} : vector<8x128xf32> to vector<8x96xf32>
    %116 = arith.negf %115 : vector<8x96xf32>
    %117 = math.exp %116 : vector<8x96xf32>
    %cst_69 = arith.constant 1.000000e+00 : f32
    %118 = vector.broadcast %cst_69 : f32 to vector<8x96xf32>
    %119 = arith.addf %118, %117 : vector<8x96xf32>
    %120 = arith.divf %118, %119 : vector<8x96xf32>
    %121 = vector.extract_strided_slice %120 {offsets = [0, 0], sizes = [8, 32], strides = [1, 1]} : vector<8x96xf32> to vector<8x32xf32>
    %122 = vector.extract_strided_slice %120 {offsets = [0, 32], sizes = [8, 32], strides = [1, 1]} : vector<8x96xf32> to vector<8x32xf32>
    %123 = vector.extract_strided_slice %120 {offsets = [0, 64], sizes = [8, 32], strides = [1, 1]} : vector<8x96xf32> to vector<8x32xf32>
    %124 = vector.extract_strided_slice %114 {offsets = [0, 96], sizes = [8, 32], strides = [1, 1]} : vector<8x128xf32> to vector<8x32xf32>
    %125 = math.tanh %124 : vector<8x32xf32>
    %126 = arith.mulf %122, %104 : vector<8x32xf32>
    %127 = arith.mulf %121, %125 : vector<8x32xf32>
    %128 = arith.addf %126, %127 : vector<8x32xf32>
    %129 = math.tanh %128 : vector<8x32xf32>
    %130 = arith.mulf %123, %129 : vector<8x32xf32>
    %131 = arith.index_cast %110 : i32 to index
    %c0_70 = arith.constant 0 : index
    %132 = vector.load %arg24[%131, %c0_70] : memref<64x32xf32, #tpu.memory_space<vmem>>, vector<8x32xf32>
    tpu.vector_store %arg24[%131, %c0_70], %130 {strides = array<i32>} : memref<64x32xf32, #tpu.memory_space<vmem>>, vector<8x32xf32>,
    %c3_i32 = arith.constant 3 : i32
    %c8_i32_71 = arith.constant 8 : i32
    %133 = arith.muli %c3_i32, %c8_i32_71 : i32
    %134 = tpu.assume_multiple %133, 8 : i32
    %cst_72 = arith.constant dense<0.000000e+00> : vector<8x128xf32>
    %135 = tpu.matmul %130, %1, %cst_72 {dimension_numbers = #tpu.dot_dimension_numbers<[1], [0], [0], [1], [0, 0, 1, 1], [], []>} : vector<8x32xf32>, vector<32x128xf32>, vector<8x128xf32> -> vector<8x128xf32>
    %136 = arith.index_cast %134 : i32 to index
    %c0_73 = arith.constant 0 : index
    %137 = vector.load %arg23[%136, %c0_73] : memref<64x128xf32, #tpu.memory_space<vmem>>, vector<8x128xf32>
    %138 = arith.addf %135, %137 : vector<8x128xf32>
    %139 = vector.extract_strided_slice %138 {offsets = [0, 0], sizes = [8, 96], strides = [1, 1]} : vector<8x128xf32> to vector<8x96xf32>
    %140 = arith.negf %139 : vector<8x96xf32>
    %141 = math.exp %140 : vector<8x96xf32>
    %cst_74 = arith.constant 1.000000e+00 : f32
    %142 = vector.broadcast %cst_74 : f32 to vector<8x96xf32>
    %143 = arith.addf %142, %141 : vector<8x96xf32>
    %144 = arith.divf %142, %143 : vector<8x96xf32>
    %145 = vector.extract_strided_slice %144 {offsets = [0, 0], sizes = [8, 32], strides = [1, 1]} : vector<8x96xf32> to vector<8x32xf32>
    %146 = vector.extract_strided_slice %144 {offsets = [0, 32], sizes = [8, 32], strides = [1, 1]} : vector<8x96xf32> to vector<8x32xf32>
    %147 = vector.extract_strided_slice %144 {offsets = [0, 64], sizes = [8, 32], strides = [1, 1]} : vector<8x96xf32> to vector<8x32xf32>
    %148 = vector.extract_strided_slice %138 {offsets = [0, 96], sizes = [8, 32], strides = [1, 1]} : vector<8x128xf32> to vector<8x32xf32>
    %149 = math.tanh %148 : vector<8x32xf32>
    %150 = arith.mulf %146, %128 : vector<8x32xf32>
    %151 = arith.mulf %145, %149 : vector<8x32xf32>
    %152 = arith.addf %150, %151 : vector<8x32xf32>
    %153 = math.tanh %152 : vector<8x32xf32>
    %154 = arith.mulf %147, %153 : vector<8x32xf32>
    %155 = arith.index_cast %134 : i32 to index
    %c0_75 = arith.constant 0 : index
    %156 = vector.load %arg24[%155, %c0_75] : memref<64x32xf32, #tpu.memory_space<vmem>>, vector<8x32xf32>
    tpu.vector_store %arg24[%155, %c0_75], %154 {strides = array<i32>} : memref<64x32xf32, #tpu.memory_space<vmem>>, vector<8x32xf32>,
    %c4_i32 = arith.constant 4 : i32
    %c8_i32_76 = arith.constant 8 : i32
    %157 = arith.muli %c4_i32, %c8_i32_76 : i32
    %158 = tpu.assume_multiple %157, 8 : i32
    %cst_77 = arith.constant dense<0.000000e+00> : vector<8x128xf32>
    %159 = tpu.matmul %154, %1, %cst_77 {dimension_numbers = #tpu.dot_dimension_numbers<[1], [0], [0], [1], [0, 0, 1, 1], [], []>} : vector<8x32xf32>, vector<32x128xf32>, vector<8x128xf32> -> vector<8x128xf32>
    %160 = arith.index_cast %158 : i32 to index
    %c0_78 = arith.constant 0 : index
    %161 = vector.load %arg23[%160, %c0_78] : memref<64x128xf32, #tpu.memory_space<vmem>>, vector<8x128xf32>
    %162 = arith.addf %159, %161 : vector<8x128xf32>
    %163 = vector.extract_strided_slice %162 {offsets = [0, 0], sizes = [8, 96], strides = [1, 1]} : vector<8x128xf32> to vector<8x96xf32>
    %164 = arith.negf %163 : vector<8x96xf32>
    %165 = math.exp %164 : vector<8x96xf32>
    %cst_79 = arith.constant 1.000000e+00 : f32
    %166 = vector.broadcast %cst_79 : f32 to vector<8x96xf32>
    %167 = arith.addf %166, %165 : vector<8x96xf32>
    %168 = arith.divf %166, %167 : vector<8x96xf32>
    %169 = vector.extract_strided_slice %168 {offsets = [0, 0], sizes = [8, 32], strides = [1, 1]} : vector<8x96xf32> to vector<8x32xf32>
    %170 = vector.extract_strided_slice %168 {offsets = [0, 32], sizes = [8, 32], strides = [1, 1]} : vector<8x96xf32> to vector<8x32xf32>
    %171 = vector.extract_strided_slice %168 {offsets = [0, 64], sizes = [8, 32], strides = [1, 1]} : vector<8x96xf32> to vector<8x32xf32>
    %172 = vector.extract_strided_slice %162 {offsets = [0, 96], sizes = [8, 32], strides = [1, 1]} : vector<8x128xf32> to vector<8x32xf32>
    %173 = math.tanh %172 : vector<8x32xf32>
    %174 = arith.mulf %170, %152 : vector<8x32xf32>
    %175 = arith.mulf %169, %173 : vector<8x32xf32>
    %176 = arith.addf %174, %175 : vector<8x32xf32>
    %177 = math.tanh %176 : vector<8x32xf32>
    %178 = arith.mulf %171, %177 : vector<8x32xf32>
    %179 = arith.index_cast %158 : i32 to index
    %c0_80 = arith.constant 0 : index
    %180 = vector.load %arg24[%179, %c0_80] : memref<64x32xf32, #tpu.memory_space<vmem>>, vector<8x32xf32>
    tpu.vector_store %arg24[%179, %c0_80], %178 {strides = array<i32>} : memref<64x32xf32, #tpu.memory_space<vmem>>, vector<8x32xf32>,
    %c5_i32 = arith.constant 5 : i32
    %c8_i32_81 = arith.constant 8 : i32
    %181 = arith.muli %c5_i32, %c8_i32_81 : i32
    %182 = tpu.assume_multiple %181, 8 : i32
    %cst_82 = arith.constant dense<0.000000e+00> : vector<8x128xf32>
    %183 = tpu.matmul %178, %1, %cst_82 {dimension_numbers = #tpu.dot_dimension_numbers<[1], [0], [0], [1], [0, 0, 1, 1], [], []>} : vector<8x32xf32>, vector<32x128xf32>, vector<8x128xf32> -> vector<8x128xf32>
    %184 = arith.index_cast %182 : i32 to index
    %c0_83 = arith.constant 0 : index
    %185 = vector.load %arg23[%184, %c0_83] : memref<64x128xf32, #tpu.memory_space<vmem>>, vector<8x128xf32>
    %186 = arith.addf %183, %185 : vector<8x128xf32>
    %187 = vector.extract_strided_slice %186 {offsets = [0, 0], sizes = [8, 96], strides = [1, 1]} : vector<8x128xf32> to vector<8x96xf32>
    %188 = arith.negf %187 : vector<8x96xf32>
    %189 = math.exp %188 : vector<8x96xf32>
    %cst_84 = arith.constant 1.000000e+00 : f32
    %190 = vector.broadcast %cst_84 : f32 to vector<8x96xf32>
    %191 = arith.addf %190, %189 : vector<8x96xf32>
    %192 = arith.divf %190, %191 : vector<8x96xf32>
    %193 = vector.extract_strided_slice %192 {offsets = [0, 0], sizes = [8, 32], strides = [1, 1]} : vector<8x96xf32> to vector<8x32xf32>
    %194 = vector.extract_strided_slice %192 {offsets = [0, 32], sizes = [8, 32], strides = [1, 1]} : vector<8x96xf32> to vector<8x32xf32>
    %195 = vector.extract_strided_slice %192 {offsets = [0, 64], sizes = [8, 32], strides = [1, 1]} : vector<8x96xf32> to vector<8x32xf32>
    %196 = vector.extract_strided_slice %186 {offsets = [0, 96], sizes = [8, 32], strides = [1, 1]} : vector<8x128xf32> to vector<8x32xf32>
    %197 = math.tanh %196 : vector<8x32xf32>
    %198 = arith.mulf %194, %176 : vector<8x32xf32>
    %199 = arith.mulf %193, %197 : vector<8x32xf32>
    %200 = arith.addf %198, %199 : vector<8x32xf32>
    %201 = math.tanh %200 : vector<8x32xf32>
    %202 = arith.mulf %195, %201 : vector<8x32xf32>
    %203 = arith.index_cast %182 : i32 to index
    %c0_85 = arith.constant 0 : index
    %204 = vector.load %arg24[%203, %c0_85] : memref<64x32xf32, #tpu.memory_space<vmem>>, vector<8x32xf32>
    tpu.vector_store %arg24[%203, %c0_85], %202 {strides = array<i32>} : memref<64x32xf32, #tpu.memory_space<vmem>>, vector<8x32xf32>,
    %c6_i32 = arith.constant 6 : i32
    %c8_i32_86 = arith.constant 8 : i32
    %205 = arith.muli %c6_i32, %c8_i32_86 : i32
    %206 = tpu.assume_multiple %205, 8 : i32
    %cst_87 = arith.constant dense<0.000000e+00> : vector<8x128xf32>
    %207 = tpu.matmul %202, %1, %cst_87 {dimension_numbers = #tpu.dot_dimension_numbers<[1], [0], [0], [1], [0, 0, 1, 1], [], []>} : vector<8x32xf32>, vector<32x128xf32>, vector<8x128xf32> -> vector<8x128xf32>
    %208 = arith.index_cast %206 : i32 to index
    %c0_88 = arith.constant 0 : index
    %209 = vector.load %arg23[%208, %c0_88] : memref<64x128xf32, #tpu.memory_space<vmem>>, vector<8x128xf32>
    %210 = arith.addf %207, %209 : vector<8x128xf32>
    %211 = vector.extract_strided_slice %210 {offsets = [0, 0], sizes = [8, 96], strides = [1, 1]} : vector<8x128xf32> to vector<8x96xf32>
    %212 = arith.negf %211 : vector<8x96xf32>
    %213 = math.exp %212 : vector<8x96xf32>
    %cst_89 = arith.constant 1.000000e+00 : f32
    %214 = vector.broadcast %cst_89 : f32 to vector<8x96xf32>
    %215 = arith.addf %214, %213 : vector<8x96xf32>
    %216 = arith.divf %214, %215 : vector<8x96xf32>
    %217 = vector.extract_strided_slice %216 {offsets = [0, 0], sizes = [8, 32], strides = [1, 1]} : vector<8x96xf32> to vector<8x32xf32>
    %218 = vector.extract_strided_slice %216 {offsets = [0, 32], sizes = [8, 32], strides = [1, 1]} : vector<8x96xf32> to vector<8x32xf32>
    %219 = vector.extract_strided_slice %216 {offsets = [0, 64], sizes = [8, 32], strides = [1, 1]} : vector<8x96xf32> to vector<8x32xf32>
    %220 = vector.extract_strided_slice %210 {offsets = [0, 96], sizes = [8, 32], strides = [1, 1]} : vector<8x128xf32> to vector<8x32xf32>
    %221 = math.tanh %220 : vector<8x32xf32>
    %222 = arith.mulf %218, %200 : vector<8x32xf32>
    %223 = arith.mulf %217, %221 : vector<8x32xf32>
    %224 = arith.addf %222, %223 : vector<8x32xf32>
    %225 = math.tanh %224 : vector<8x32xf32>
    %226 = arith.mulf %219, %225 : vector<8x32xf32>
    %227 = arith.index_cast %206 : i32 to index
    %c0_90 = arith.constant 0 : index
    %228 = vector.load %arg24[%227, %c0_90] : memref<64x32xf32, #tpu.memory_space<vmem>>, vector<8x32xf32>
    tpu.vector_store %arg24[%227, %c0_90], %226 {strides = array<i32>} : memref<64x32xf32, #tpu.memory_space<vmem>>, vector<8x32xf32>,
    %c7_i32 = arith.constant 7 : i32
    %c8_i32_91 = arith.constant 8 : i32
    %229 = arith.muli %c7_i32, %c8_i32_91 : i32
    %230 = tpu.assume_multiple %229, 8 : i32
    %cst_92 = arith.constant dense<0.000000e+00> : vector<8x128xf32>
    %231 = tpu.matmul %226, %1, %cst_92 {dimension_numbers = #tpu.dot_dimension_numbers<[1], [0], [0], [1], [0, 0, 1, 1], [], []>} : vector<8x32xf32>, vector<32x128xf32>, vector<8x128xf32> -> vector<8x128xf32>
    %232 = arith.index_cast %230 : i32 to index
    %c0_93 = arith.constant 0 : index
    %233 = vector.load %arg23[%232, %c0_93] : memref<64x128xf32, #tpu.memory_space<vmem>>, vector<8x128xf32>
    %234 = arith.addf %231, %233 : vector<8x128xf32>
    %235 = vector.extract_strided_slice %234 {offsets = [0, 0], sizes = [8, 96], strides = [1, 1]} : vector<8x128xf32> to vector<8x96xf32>
    %236 = arith.negf %235 : vector<8x96xf32>
    %237 = math.exp %236 : vector<8x96xf32>
    %cst_94 = arith.constant 1.000000e+00 : f32
    %238 = vector.broadcast %cst_94 : f32 to vector<8x96xf32>
    %239 = arith.addf %238, %237 : vector<8x96xf32>
    %240 = arith.divf %238, %239 : vector<8x96xf32>
    %241 = vector.extract_strided_slice %240 {offsets = [0, 0], sizes = [8, 32], strides = [1, 1]} : vector<8x96xf32> to vector<8x32xf32>
    %242 = vector.extract_strided_slice %240 {offsets = [0, 32], sizes = [8, 32], strides = [1, 1]} : vector<8x96xf32> to vector<8x32xf32>
    %243 = vector.extract_strided_slice %240 {offsets = [0, 64], sizes = [8, 32], strides = [1, 1]} : vector<8x96xf32> to vector<8x32xf32>
    %244 = vector.extract_strided_slice %234 {offsets = [0, 96], sizes = [8, 32], strides = [1, 1]} : vector<8x128xf32> to vector<8x32xf32>
    %245 = math.tanh %244 : vector<8x32xf32>
    %246 = arith.mulf %242, %224 : vector<8x32xf32>
    %247 = arith.mulf %241, %245 : vector<8x32xf32>
    %248 = arith.addf %246, %247 : vector<8x32xf32>
    %249 = math.tanh %248 : vector<8x32xf32>
    %250 = arith.mulf %243, %249 : vector<8x32xf32>
    %251 = arith.index_cast %230 : i32 to index
    %c0_95 = arith.constant 0 : index
    %252 = vector.load %arg24[%251, %c0_95] : memref<64x32xf32, #tpu.memory_space<vmem>>, vector<8x32xf32>
    tpu.vector_store %arg24[%251, %c0_95], %250 {strides = array<i32>} : memref<64x32xf32, #tpu.memory_space<vmem>>, vector<8x32xf32>,
    %c8_i32_96 = arith.constant 8 : i32
    %253 = tpu.iota {dimensions = array<i32: 1>} : vector<8x32xi32>
    %c16_i32_97 = arith.constant 16 : i32
    %254 = vector.broadcast %c16_i32_97 : i32 to vector<8x32xi32>
    %255 = arith.cmpi slt, %253, %254 : vector<8x32xi32>
    %c0_98 = arith.constant 0 : index
    %c0_99 = arith.constant 0 : index
    %256 = vector.load %arg24[%c0_98, %c0_99] : memref<64x32xf32, #tpu.memory_space<vmem>>, vector<8x32xf32>
    %c56_100 = arith.constant 56 : index
    %c0_101 = arith.constant 0 : index
    %257 = vector.load %arg24[%c56_100, %c0_101] : memref<64x32xf32, #tpu.memory_space<vmem>>, vector<8x32xf32>
    %258 = arith.select %255, %256, %257 : vector<8x32xi1>, vector<8x32xf32>
    %c0_102 = arith.constant 0 : index
    %c0_103 = arith.constant 0 : index
    %259 = vector.load %arg25[%c0_102, %c0_103] : memref<64x32xf32, #tpu.memory_space<vmem>>, vector<8x32xf32>
    tpu.vector_store %arg25[%c0_102, %c0_103], %258 {strides = array<i32>} : memref<64x32xf32, #tpu.memory_space<vmem>>, vector<8x32xf32>,
    %c8_104 = arith.constant 8 : index
    %c0_105 = arith.constant 0 : index
    %260 = vector.load %arg24[%c8_104, %c0_105] : memref<64x32xf32, #tpu.memory_space<vmem>>, vector<8x32xf32>
    %c48_106 = arith.constant 48 : index
    %c0_107 = arith.constant 0 : index
    %261 = vector.load %arg24[%c48_106, %c0_107] : memref<64x32xf32, #tpu.memory_space<vmem>>, vector<8x32xf32>
    %262 = arith.select %255, %260, %261 : vector<8x32xi1>, vector<8x32xf32>
    %c8_108 = arith.constant 8 : index
    %c0_109 = arith.constant 0 : index
    %263 = vector.load %arg25[%c8_108, %c0_109] : memref<64x32xf32, #tpu.memory_space<vmem>>, vector<8x32xf32>
    tpu.vector_store %arg25[%c8_108, %c0_109], %262 {strides = array<i32>} : memref<64x32xf32, #tpu.memory_space<vmem>>, vector<8x32xf32>,
    %c16_110 = arith.constant 16 : index
    %c0_111 = arith.constant 0 : index
    %264 = vector.load %arg24[%c16_110, %c0_111] : memref<64x32xf32, #tpu.memory_space<vmem>>, vector<8x32xf32>
    %c40_112 = arith.constant 40 : index
    %c0_113 = arith.constant 0 : index
    %265 = vector.load %arg24[%c40_112, %c0_113] : memref<64x32xf32, #tpu.memory_space<vmem>>, vector<8x32xf32>
    %266 = arith.select %255, %264, %265 : vector<8x32xi1>, vector<8x32xf32>
    %c16_114 = arith.constant 16 : index
    %c0_115 = arith.constant 0 : index
    %267 = vector.load %arg25[%c16_114, %c0_115] : memref<64x32xf32, #tpu.memory_space<vmem>>, vector<8x32xf32>
    tpu.vector_store %arg25[%c16_114, %c0_115], %266 {strides = array<i32>} : memref<64x32xf32, #tpu.memory_space<vmem>>, vector<8x32xf32>,
    %c24_116 = arith.constant 24 : index
    %c0_117 = arith.constant 0 : index
    %268 = vector.load %arg24[%c24_116, %c0_117] : memref<64x32xf32, #tpu.memory_space<vmem>>, vector<8x32xf32>
    %c32_118 = arith.constant 32 : index
    %c0_119 = arith.constant 0 : index
    %269 = vector.load %arg24[%c32_118, %c0_119] : memref<64x32xf32, #tpu.memory_space<vmem>>, vector<8x32xf32>
    %270 = arith.select %255, %268, %269 : vector<8x32xi1>, vector<8x32xf32>
    %c24_120 = arith.constant 24 : index
    %c0_121 = arith.constant 0 : index
    %271 = vector.load %arg25[%c24_120, %c0_121] : memref<64x32xf32, #tpu.memory_space<vmem>>, vector<8x32xf32>
    tpu.vector_store %arg25[%c24_120, %c0_121], %270 {strides = array<i32>} : memref<64x32xf32, #tpu.memory_space<vmem>>, vector<8x32xf32>,
    %c32_122 = arith.constant 32 : index
    %c0_123 = arith.constant 0 : index
    %272 = vector.load %arg24[%c32_122, %c0_123] : memref<64x32xf32, #tpu.memory_space<vmem>>, vector<8x32xf32>
    %c24_124 = arith.constant 24 : index
    %c0_125 = arith.constant 0 : index
    %273 = vector.load %arg24[%c24_124, %c0_125] : memref<64x32xf32, #tpu.memory_space<vmem>>, vector<8x32xf32>
    %274 = arith.select %255, %272, %273 : vector<8x32xi1>, vector<8x32xf32>
    %c32_126 = arith.constant 32 : index
    %c0_127 = arith.constant 0 : index
    %275 = vector.load %arg25[%c32_126, %c0_127] : memref<64x32xf32, #tpu.memory_space<vmem>>, vector<8x32xf32>
    tpu.vector_store %arg25[%c32_126, %c0_127], %274 {strides = array<i32>} : memref<64x32xf32, #tpu.memory_space<vmem>>, vector<8x32xf32>,
    %c40_128 = arith.constant 40 : index
    %c0_129 = arith.constant 0 : index
    %276 = vector.load %arg24[%c40_128, %c0_129] : memref<64x32xf32, #tpu.memory_space<vmem>>, vector<8x32xf32>
    %c16_130 = arith.constant 16 : index
    %c0_131 = arith.constant 0 : index
    %277 = vector.load %arg24[%c16_130, %c0_131] : memref<64x32xf32, #tpu.memory_space<vmem>>, vector<8x32xf32>
    %278 = arith.select %255, %276, %277 : vector<8x32xi1>, vector<8x32xf32>
    %c40_132 = arith.constant 40 : index
    %c0_133 = arith.constant 0 : index
    %279 = vector.load %arg25[%c40_132, %c0_133] : memref<64x32xf32, #tpu.memory_space<vmem>>, vector<8x32xf32>
    tpu.vector_store %arg25[%c40_132, %c0_133], %278 {strides = array<i32>} : memref<64x32xf32, #tpu.memory_space<vmem>>, vector<8x32xf32>,
    %c48_134 = arith.constant 48 : index
    %c0_135 = arith.constant 0 : index
    %280 = vector.load %arg24[%c48_134, %c0_135] : memref<64x32xf32, #tpu.memory_space<vmem>>, vector<8x32xf32>
    %c8_136 = arith.constant 8 : index
    %c0_137 = arith.constant 0 : index
    %281 = vector.load %arg24[%c8_136, %c0_137] : memref<64x32xf32, #tpu.memory_space<vmem>>, vector<8x32xf32>
    %282 = arith.select %255, %280, %281 : vector<8x32xi1>, vector<8x32xf32>
    %c48_138 = arith.constant 48 : index
    %c0_139 = arith.constant 0 : index
    %283 = vector.load %arg25[%c48_138, %c0_139] : memref<64x32xf32, #tpu.memory_space<vmem>>, vector<8x32xf32>
    tpu.vector_store %arg25[%c48_138, %c0_139], %282 {strides = array<i32>} : memref<64x32xf32, #tpu.memory_space<vmem>>, vector<8x32xf32>,
    %c56_140 = arith.constant 56 : index
    %c0_141 = arith.constant 0 : index
    %284 = vector.load %arg24[%c56_140, %c0_141] : memref<64x32xf32, #tpu.memory_space<vmem>>, vector<8x32xf32>
    %c0_142 = arith.constant 0 : index
    %c0_143 = arith.constant 0 : index
    %285 = vector.load %arg24[%c0_142, %c0_143] : memref<64x32xf32, #tpu.memory_space<vmem>>, vector<8x32xf32>
    %286 = arith.select %255, %284, %285 : vector<8x32xi1>, vector<8x32xf32>
    %c56_144 = arith.constant 56 : index
    %c0_145 = arith.constant 0 : index
    %287 = vector.load %arg25[%c56_144, %c0_145] : memref<64x32xf32, #tpu.memory_space<vmem>>, vector<8x32xf32>
    tpu.vector_store %arg25[%c56_144, %c0_145], %286 {strides = array<i32>} : memref<64x32xf32, #tpu.memory_space<vmem>>, vector<8x32xf32>,
    %c0_146 = arith.constant 0 : index
    %c0_147 = arith.constant 0 : index
    %288 = vector.load %arg25[%c0_146, %c0_147] : memref<64x32xf32, #tpu.memory_space<vmem>>, vector<64x32xf32>
    %cst_148 = arith.constant dense<0.000000e+00> : vector<64xf32>
    %289 = vector.multi_reduction <add>, %288, %cst_148 [1] : vector<64x32xf32> to vector<64xf32>
    %290 = vector.shape_cast %289 : vector<64xf32> to vector<64x1xf32>
    %291 = arith.mulf %288, %288 : vector<64x32xf32>
    %cst_149 = arith.constant dense<0.000000e+00> : vector<64xf32>
    %292 = vector.multi_reduction <add>, %291, %cst_149 [1] : vector<64x32xf32> to vector<64xf32>
    %293 = vector.shape_cast %292 : vector<64xf32> to vector<64x1xf32>
    %cst_150 = arith.constant 3.125000e-02 : f32
    %294 = vector.broadcast %cst_150 : f32 to vector<64x1xf32>
    %295 = arith.mulf %290, %294 : vector<64x1xf32>
    %cst_151 = arith.constant 3.125000e-02 : f32
    %296 = vector.broadcast %cst_151 : f32 to vector<64x1xf32>
    %297 = arith.mulf %293, %296 : vector<64x1xf32>
    %298 = arith.mulf %295, %295 : vector<64x1xf32>
    %299 = arith.subf %297, %298 : vector<64x1xf32>
    %300 = vector.broadcast %295 : vector<64x1xf32> to vector<64x32xf32>
    %301 = arith.subf %288, %300 : vector<64x32xf32>
    %cst_152 = arith.constant 9.99999974E-6 : f32
    %302 = vector.broadcast %cst_152 : f32 to vector<64x1xf32>
    %303 = arith.addf %299, %302 : vector<64x1xf32>
    %304 = math.rsqrt %303 : vector<64x1xf32>
    %305 = vector.broadcast %304 : vector<64x1xf32> to vector<64x32xf32>
    %306 = arith.mulf %301, %305 : vector<64x32xf32>
    %c0_153 = arith.constant 0 : index
    %c0_154 = arith.constant 0 : index
    %307 = vector.load %arg5[%c0_153, %c0_154] : memref<1x32xf32, #tpu.memory_space<vmem>>, vector<1x32xf32>
    %308 = vector.broadcast %307 : vector<1x32xf32> to vector<64x32xf32>
    %309 = arith.mulf %306, %308 : vector<64x32xf32>
    %c0_155 = arith.constant 0 : index
    %c0_156 = arith.constant 0 : index
    %310 = vector.load %arg6[%c0_155, %c0_156] : memref<1x32xf32, #tpu.memory_space<vmem>>, vector<1x32xf32>
    %311 = vector.broadcast %310 : vector<1x32xf32> to vector<64x32xf32>
    %312 = arith.addf %309, %311 : vector<64x32xf32>
    %c0_157 = arith.constant 0 : index
    %c0_158 = arith.constant 0 : index
    %313 = vector.load %arg9[%c0_157, %c0_158] : memref<32x128xf32, #tpu.memory_space<vmem>>, vector<32x128xf32>
    %c0_159 = arith.constant 0 : index
    %c0_160 = arith.constant 0 : index
    %314 = vector.load %arg7[%c0_159, %c0_160] : memref<32x128xf32, #tpu.memory_space<vmem>>, vector<32x128xf32>
    %cst_161 = arith.constant dense<0.000000e+00> : vector<64x128xf32>
    %315 = tpu.matmul %312, %314, %cst_161 {dimension_numbers = #tpu.dot_dimension_numbers<[1], [0], [0], [1], [0, 0, 1, 1], [], []>} : vector<64x32xf32>, vector<32x128xf32>, vector<64x128xf32> -> vector<64x128xf32>
    %c0_162 = arith.constant 0 : index
    %c0_163 = arith.constant 0 : index
    %316 = vector.load %arg8[%c0_162, %c0_163] : memref<1x128xf32, #tpu.memory_space<vmem>>, vector<1x128xf32>
    %317 = vector.broadcast %316 : vector<1x128xf32> to vector<64x128xf32>
    %318 = arith.addf %315, %317 : vector<64x128xf32>
    %c0_164 = arith.constant 0 : index
    %c0_165 = arith.constant 0 : index
    %319 = vector.load %arg22[%c0_164, %c0_165] : memref<64x128xf32, #tpu.memory_space<vmem>>, vector<64x128xf32>
    tpu.vector_store %arg22[%c0_164, %c0_165], %318 {strides = array<i32>} : memref<64x128xf32, #tpu.memory_space<vmem>>, vector<64x128xf32>,
    %320 = tpu.iota {dimensions = array<i32: 1>} : vector<8x128xi32>
    %c32_i32_166 = arith.constant 32 : i32
    %c0_i32_167 = arith.constant 0 : i32
    %321 = arith.cmpi eq, %c32_i32_166, %c0_i32_167 : i32
    %c1_i32_168 = arith.constant 1 : i32
    %322 = arith.select %321, %c1_i32_168, %c32_i32_166 : i32
    %323 = vector.broadcast %322 : i32 to vector<8x128xi32>
    %324 = arith.remsi %320, %323 : vector<8x128xi32>
    %c0_i32_169 = arith.constant 0 : i32
    %325 = vector.broadcast %c0_i32_169 : i32 to vector<8x128xi32>
    %326 = arith.cmpi ne, %324, %325 : vector<8x128xi32>
    %c0_i32_170 = arith.constant 0 : i32
    %327 = vector.broadcast %c0_i32_170 : i32 to vector<8x128xi32>
    %328 = arith.cmpi slt, %324, %327 : vector<8x128xi32>
    %c0_i32_171 = arith.constant 0 : i32
    %329 = arith.cmpi slt, %322, %c0_i32_171 : i32
    %330 = vector.broadcast %329 : i1 to vector<8x128xi1>
    %331 = vector.broadcast %330 : vector<8x128xi1> to vector<8x128xi1>
    %332 = arith.xori %328, %331 : vector<8x128xi1>
    %333 = arith.andi %332, %326 : vector<8x128xi1>
    %334 = vector.broadcast %322 : i32 to vector<8x128xi32>
    %335 = arith.addi %324, %334 : vector<8x128xi32>
    %336 = arith.select %333, %335, %324 : vector<8x128xi1>, vector<8x128xi32>
    %c16_i32_172 = arith.constant 16 : i32
    %337 = vector.broadcast %c16_i32_172 : i32 to vector<8x128xi32>
    %338 = arith.cmpi slt, %336, %337 : vector<8x128xi32>
    %c0_173 = arith.constant 0 : index
    %c0_174 = arith.constant 0 : index
    %339 = vector.load %arg22[%c0_173, %c0_174] : memref<64x128xf32, #tpu.memory_space<vmem>>, vector<8x128xf32>
    %c56_175 = arith.constant 56 : index
    %c0_176 = arith.constant 0 : index
    %340 = vector.load %arg22[%c56_175, %c0_176] : memref<64x128xf32, #tpu.memory_space<vmem>>, vector<8x128xf32>
    %341 = arith.select %338, %339, %340 : vector<8x128xi1>, vector<8x128xf32>
    %c0_177 = arith.constant 0 : index
    %c0_178 = arith.constant 0 : index
    %342 = vector.load %arg23[%c0_177, %c0_178] : memref<64x128xf32, #tpu.memory_space<vmem>>, vector<8x128xf32>
    tpu.vector_store %arg23[%c0_177, %c0_178], %341 {strides = array<i32>} : memref<64x128xf32, #tpu.memory_space<vmem>>, vector<8x128xf32>,
    %c8_179 = arith.constant 8 : index
    %c0_180 = arith.constant 0 : index
    %343 = vector.load %arg22[%c8_179, %c0_180] : memref<64x128xf32, #tpu.memory_space<vmem>>, vector<8x128xf32>
    %c48_181 = arith.constant 48 : index
    %c0_182 = arith.constant 0 : index
    %344 = vector.load %arg22[%c48_181, %c0_182] : memref<64x128xf32, #tpu.memory_space<vmem>>, vector<8x128xf32>
    %345 = arith.select %338, %343, %344 : vector<8x128xi1>, vector<8x128xf32>
    %c8_183 = arith.constant 8 : index
    %c0_184 = arith.constant 0 : index
    %346 = vector.load %arg23[%c8_183, %c0_184] : memref<64x128xf32, #tpu.memory_space<vmem>>, vector<8x128xf32>
    tpu.vector_store %arg23[%c8_183, %c0_184], %345 {strides = array<i32>} : memref<64x128xf32, #tpu.memory_space<vmem>>, vector<8x128xf32>,
    %c16_185 = arith.constant 16 : index
    %c0_186 = arith.constant 0 : index
    %347 = vector.load %arg22[%c16_185, %c0_186] : memref<64x128xf32, #tpu.memory_space<vmem>>, vector<8x128xf32>
    %c40_187 = arith.constant 40 : index
    %c0_188 = arith.constant 0 : index
    %348 = vector.load %arg22[%c40_187, %c0_188] : memref<64x128xf32, #tpu.memory_space<vmem>>, vector<8x128xf32>
    %349 = arith.select %338, %347, %348 : vector<8x128xi1>, vector<8x128xf32>
    %c16_189 = arith.constant 16 : index
    %c0_190 = arith.constant 0 : index
    %350 = vector.load %arg23[%c16_189, %c0_190] : memref<64x128xf32, #tpu.memory_space<vmem>>, vector<8x128xf32>
    tpu.vector_store %arg23[%c16_189, %c0_190], %349 {strides = array<i32>} : memref<64x128xf32, #tpu.memory_space<vmem>>, vector<8x128xf32>,
    %c24_191 = arith.constant 24 : index
    %c0_192 = arith.constant 0 : index
    %351 = vector.load %arg22[%c24_191, %c0_192] : memref<64x128xf32, #tpu.memory_space<vmem>>, vector<8x128xf32>
    %c32_193 = arith.constant 32 : index
    %c0_194 = arith.constant 0 : index
    %352 = vector.load %arg22[%c32_193, %c0_194] : memref<64x128xf32, #tpu.memory_space<vmem>>, vector<8x128xf32>
    %353 = arith.select %338, %351, %352 : vector<8x128xi1>, vector<8x128xf32>
    %c24_195 = arith.constant 24 : index
    %c0_196 = arith.constant 0 : index
    %354 = vector.load %arg23[%c24_195, %c0_196] : memref<64x128xf32, #tpu.memory_space<vmem>>, vector<8x128xf32>
    tpu.vector_store %arg23[%c24_195, %c0_196], %353 {strides = array<i32>} : memref<64x128xf32, #tpu.memory_space<vmem>>, vector<8x128xf32>,
    %c32_197 = arith.constant 32 : index
    %c0_198 = arith.constant 0 : index
    %355 = vector.load %arg22[%c32_197, %c0_198] : memref<64x128xf32, #tpu.memory_space<vmem>>, vector<8x128xf32>
    %c24_199 = arith.constant 24 : index
    %c0_200 = arith.constant 0 : index
    %356 = vector.load %arg22[%c24_199, %c0_200] : memref<64x128xf32, #tpu.memory_space<vmem>>, vector<8x128xf32>
    %357 = arith.select %338, %355, %356 : vector<8x128xi1>, vector<8x128xf32>
    %c32_201 = arith.constant 32 : index
    %c0_202 = arith.constant 0 : index
    %358 = vector.load %arg23[%c32_201, %c0_202] : memref<64x128xf32, #tpu.memory_space<vmem>>, vector<8x128xf32>
    tpu.vector_store %arg23[%c32_201, %c0_202], %357 {strides = array<i32>} : memref<64x128xf32, #tpu.memory_space<vmem>>, vector<8x128xf32>,
    %c40_203 = arith.constant 40 : index
    %c0_204 = arith.constant 0 : index
    %359 = vector.load %arg22[%c40_203, %c0_204] : memref<64x128xf32, #tpu.memory_space<vmem>>, vector<8x128xf32>
    %c16_205 = arith.constant 16 : index
    %c0_206 = arith.constant 0 : index
    %360 = vector.load %arg22[%c16_205, %c0_206] : memref<64x128xf32, #tpu.memory_space<vmem>>, vector<8x128xf32>
    %361 = arith.select %338, %359, %360 : vector<8x128xi1>, vector<8x128xf32>
    %c40_207 = arith.constant 40 : index
    %c0_208 = arith.constant 0 : index
    %362 = vector.load %arg23[%c40_207, %c0_208] : memref<64x128xf32, #tpu.memory_space<vmem>>, vector<8x128xf32>
    tpu.vector_store %arg23[%c40_207, %c0_208], %361 {strides = array<i32>} : memref<64x128xf32, #tpu.memory_space<vmem>>, vector<8x128xf32>,
    %c48_209 = arith.constant 48 : index
    %c0_210 = arith.constant 0 : index
    %363 = vector.load %arg22[%c48_209, %c0_210] : memref<64x128xf32, #tpu.memory_space<vmem>>, vector<8x128xf32>
    %c8_211 = arith.constant 8 : index
    %c0_212 = arith.constant 0 : index
    %364 = vector.load %arg22[%c8_211, %c0_212] : memref<64x128xf32, #tpu.memory_space<vmem>>, vector<8x128xf32>
    %365 = arith.select %338, %363, %364 : vector<8x128xi1>, vector<8x128xf32>
    %c48_213 = arith.constant 48 : index
    %c0_214 = arith.constant 0 : index
    %366 = vector.load %arg23[%c48_213, %c0_214] : memref<64x128xf32, #tpu.memory_space<vmem>>, vector<8x128xf32>
    tpu.vector_store %arg23[%c48_213, %c0_214], %365 {strides = array<i32>} : memref<64x128xf32, #tpu.memory_space<vmem>>, vector<8x128xf32>,
    %c56_215 = arith.constant 56 : index
    %c0_216 = arith.constant 0 : index
    %367 = vector.load %arg22[%c56_215, %c0_216] : memref<64x128xf32, #tpu.memory_space<vmem>>, vector<8x128xf32>
    %c0_217 = arith.constant 0 : index
    %c0_218 = arith.constant 0 : index
    %368 = vector.load %arg22[%c0_217, %c0_218] : memref<64x128xf32, #tpu.memory_space<vmem>>, vector<8x128xf32>
    %369 = arith.select %338, %367, %368 : vector<8x128xi1>, vector<8x128xf32>
    %c56_219 = arith.constant 56 : index
    %c0_220 = arith.constant 0 : index
    %370 = vector.load %arg23[%c56_219, %c0_220] : memref<64x128xf32, #tpu.memory_space<vmem>>, vector<8x128xf32>
    tpu.vector_store %arg23[%c56_219, %c0_220], %369 {strides = array<i32>} : memref<64x128xf32, #tpu.memory_space<vmem>>, vector<8x128xf32>,
    %cst_221 = arith.constant 0.000000e+00 : f32
    %371 = vector.broadcast %cst_221 : f32 to vector<8x32xf32>
    %cst_222 = arith.constant 0.000000e+00 : f32
    %372 = vector.broadcast %cst_222 : f32 to vector<8x32xf32>
    %c0_i32_223 = arith.constant 0 : i32
    %c8_i32_224 = arith.constant 8 : i32
    %373 = arith.muli %c0_i32_223, %c8_i32_224 : i32
    %374 = tpu.assume_multiple %373, 8 : i32
    %cst_225 = arith.constant dense<0.000000e+00> : vector<8x128xf32>
    %375 = tpu.matmul %371, %313, %cst_225 {dimension_numbers = #tpu.dot_dimension_numbers<[1], [0], [0], [1], [0, 0, 1, 1], [], []>} : vector<8x32xf32>, vector<32x128xf32>, vector<8x128xf32> -> vector<8x128xf32>
    %376 = arith.index_cast %374 : i32 to index
    %c0_226 = arith.constant 0 : index
    %377 = vector.load %arg23[%376, %c0_226] : memref<64x128xf32, #tpu.memory_space<vmem>>, vector<8x128xf32>
    %378 = arith.addf %375, %377 : vector<8x128xf32>
    %379 = vector.extract_strided_slice %378 {offsets = [0, 0], sizes = [8, 96], strides = [1, 1]} : vector<8x128xf32> to vector<8x96xf32>
    %380 = arith.negf %379 : vector<8x96xf32>
    %381 = math.exp %380 : vector<8x96xf32>
    %cst_227 = arith.constant 1.000000e+00 : f32
    %382 = vector.broadcast %cst_227 : f32 to vector<8x96xf32>
    %383 = arith.addf %382, %381 : vector<8x96xf32>
    %384 = arith.divf %382, %383 : vector<8x96xf32>
    %385 = vector.extract_strided_slice %384 {offsets = [0, 0], sizes = [8, 32], strides = [1, 1]} : vector<8x96xf32> to vector<8x32xf32>
    %386 = vector.extract_strided_slice %384 {offsets = [0, 32], sizes = [8, 32], strides = [1, 1]} : vector<8x96xf32> to vector<8x32xf32>
    %387 = vector.extract_strided_slice %384 {offsets = [0, 64], sizes = [8, 32], strides = [1, 1]} : vector<8x96xf32> to vector<8x32xf32>
    %388 = vector.extract_strided_slice %378 {offsets = [0, 96], sizes = [8, 32], strides = [1, 1]} : vector<8x128xf32> to vector<8x32xf32>
    %389 = math.tanh %388 : vector<8x32xf32>
    %390 = arith.mulf %386, %372 : vector<8x32xf32>
    %391 = arith.mulf %385, %389 : vector<8x32xf32>
    %392 = arith.addf %390, %391 : vector<8x32xf32>
    %393 = math.tanh %392 : vector<8x32xf32>
    %394 = arith.mulf %387, %393 : vector<8x32xf32>
    %395 = arith.index_cast %374 : i32 to index
    %c0_228 = arith.constant 0 : index
    %396 = vector.load %arg24[%395, %c0_228] : memref<64x32xf32, #tpu.memory_space<vmem>>, vector<8x32xf32>
    tpu.vector_store %arg24[%395, %c0_228], %394 {strides = array<i32>} : memref<64x32xf32, #tpu.memory_space<vmem>>, vector<8x32xf32>,
    %c1_i32_229 = arith.constant 1 : i32
    %c8_i32_230 = arith.constant 8 : i32
    %397 = arith.muli %c1_i32_229, %c8_i32_230 : i32
    %398 = tpu.assume_multiple %397, 8 : i32
    %cst_231 = arith.constant dense<0.000000e+00> : vector<8x128xf32>
    %399 = tpu.matmul %394, %313, %cst_231 {dimension_numbers = #tpu.dot_dimension_numbers<[1], [0], [0], [1], [0, 0, 1, 1], [], []>} : vector<8x32xf32>, vector<32x128xf32>, vector<8x128xf32> -> vector<8x128xf32>
    %400 = arith.index_cast %398 : i32 to index
    %c0_232 = arith.constant 0 : index
    %401 = vector.load %arg23[%400, %c0_232] : memref<64x128xf32, #tpu.memory_space<vmem>>, vector<8x128xf32>
    %402 = arith.addf %399, %401 : vector<8x128xf32>
    %403 = vector.extract_strided_slice %402 {offsets = [0, 0], sizes = [8, 96], strides = [1, 1]} : vector<8x128xf32> to vector<8x96xf32>
    %404 = arith.negf %403 : vector<8x96xf32>
    %405 = math.exp %404 : vector<8x96xf32>
    %cst_233 = arith.constant 1.000000e+00 : f32
    %406 = vector.broadcast %cst_233 : f32 to vector<8x96xf32>
    %407 = arith.addf %406, %405 : vector<8x96xf32>
    %408 = arith.divf %406, %407 : vector<8x96xf32>
    %409 = vector.extract_strided_slice %408 {offsets = [0, 0], sizes = [8, 32], strides = [1, 1]} : vector<8x96xf32> to vector<8x32xf32>
    %410 = vector.extract_strided_slice %408 {offsets = [0, 32], sizes = [8, 32], strides = [1, 1]} : vector<8x96xf32> to vector<8x32xf32>
    %411 = vector.extract_strided_slice %408 {offsets = [0, 64], sizes = [8, 32], strides = [1, 1]} : vector<8x96xf32> to vector<8x32xf32>
    %412 = vector.extract_strided_slice %402 {offsets = [0, 96], sizes = [8, 32], strides = [1, 1]} : vector<8x128xf32> to vector<8x32xf32>
    %413 = math.tanh %412 : vector<8x32xf32>
    %414 = arith.mulf %410, %392 : vector<8x32xf32>
    %415 = arith.mulf %409, %413 : vector<8x32xf32>
    %416 = arith.addf %414, %415 : vector<8x32xf32>
    %417 = math.tanh %416 : vector<8x32xf32>
    %418 = arith.mulf %411, %417 : vector<8x32xf32>
    %419 = arith.index_cast %398 : i32 to index
    %c0_234 = arith.constant 0 : index
    %420 = vector.load %arg24[%419, %c0_234] : memref<64x32xf32, #tpu.memory_space<vmem>>, vector<8x32xf32>
    tpu.vector_store %arg24[%419, %c0_234], %418 {strides = array<i32>} : memref<64x32xf32, #tpu.memory_space<vmem>>, vector<8x32xf32>,
    %c2_i32_235 = arith.constant 2 : i32
    %c8_i32_236 = arith.constant 8 : i32
    %421 = arith.muli %c2_i32_235, %c8_i32_236 : i32
    %422 = tpu.assume_multiple %421, 8 : i32
    %cst_237 = arith.constant dense<0.000000e+00> : vector<8x128xf32>
    %423 = tpu.matmul %418, %313, %cst_237 {dimension_numbers = #tpu.dot_dimension_numbers<[1], [0], [0], [1], [0, 0, 1, 1], [], []>} : vector<8x32xf32>, vector<32x128xf32>, vector<8x128xf32> -> vector<8x128xf32>
    %424 = arith.index_cast %422 : i32 to index
    %c0_238 = arith.constant 0 : index
    %425 = vector.load %arg23[%424, %c0_238] : memref<64x128xf32, #tpu.memory_space<vmem>>, vector<8x128xf32>
    %426 = arith.addf %423, %425 : vector<8x128xf32>
    %427 = vector.extract_strided_slice %426 {offsets = [0, 0], sizes = [8, 96], strides = [1, 1]} : vector<8x128xf32> to vector<8x96xf32>
    %428 = arith.negf %427 : vector<8x96xf32>
    %429 = math.exp %428 : vector<8x96xf32>
    %cst_239 = arith.constant 1.000000e+00 : f32
    %430 = vector.broadcast %cst_239 : f32 to vector<8x96xf32>
    %431 = arith.addf %430, %429 : vector<8x96xf32>
    %432 = arith.divf %430, %431 : vector<8x96xf32>
    %433 = vector.extract_strided_slice %432 {offsets = [0, 0], sizes = [8, 32], strides = [1, 1]} : vector<8x96xf32> to vector<8x32xf32>
    %434 = vector.extract_strided_slice %432 {offsets = [0, 32], sizes = [8, 32], strides = [1, 1]} : vector<8x96xf32> to vector<8x32xf32>
    %435 = vector.extract_strided_slice %432 {offsets = [0, 64], sizes = [8, 32], strides = [1, 1]} : vector<8x96xf32> to vector<8x32xf32>
    %436 = vector.extract_strided_slice %426 {offsets = [0, 96], sizes = [8, 32], strides = [1, 1]} : vector<8x128xf32> to vector<8x32xf32>
    %437 = math.tanh %436 : vector<8x32xf32>
    %438 = arith.mulf %434, %416 : vector<8x32xf32>
    %439 = arith.mulf %433, %437 : vector<8x32xf32>
    %440 = arith.addf %438, %439 : vector<8x32xf32>
    %441 = math.tanh %440 : vector<8x32xf32>
    %442 = arith.mulf %435, %441 : vector<8x32xf32>
    %443 = arith.index_cast %422 : i32 to index
    %c0_240 = arith.constant 0 : index
    %444 = vector.load %arg24[%443, %c0_240] : memref<64x32xf32, #tpu.memory_space<vmem>>, vector<8x32xf32>
    tpu.vector_store %arg24[%443, %c0_240], %442 {strides = array<i32>} : memref<64x32xf32, #tpu.memory_space<vmem>>, vector<8x32xf32>,
    %c3_i32_241 = arith.constant 3 : i32
    %c8_i32_242 = arith.constant 8 : i32
    %445 = arith.muli %c3_i32_241, %c8_i32_242 : i32
    %446 = tpu.assume_multiple %445, 8 : i32
    %cst_243 = arith.constant dense<0.000000e+00> : vector<8x128xf32>
    %447 = tpu.matmul %442, %313, %cst_243 {dimension_numbers = #tpu.dot_dimension_numbers<[1], [0], [0], [1], [0, 0, 1, 1], [], []>} : vector<8x32xf32>, vector<32x128xf32>, vector<8x128xf32> -> vector<8x128xf32>
    %448 = arith.index_cast %446 : i32 to index
    %c0_244 = arith.constant 0 : index
    %449 = vector.load %arg23[%448, %c0_244] : memref<64x128xf32, #tpu.memory_space<vmem>>, vector<8x128xf32>
    %450 = arith.addf %447, %449 : vector<8x128xf32>
    %451 = vector.extract_strided_slice %450 {offsets = [0, 0], sizes = [8, 96], strides = [1, 1]} : vector<8x128xf32> to vector<8x96xf32>
    %452 = arith.negf %451 : vector<8x96xf32>
    %453 = math.exp %452 : vector<8x96xf32>
    %cst_245 = arith.constant 1.000000e+00 : f32
    %454 = vector.broadcast %cst_245 : f32 to vector<8x96xf32>
    %455 = arith.addf %454, %453 : vector<8x96xf32>
    %456 = arith.divf %454, %455 : vector<8x96xf32>
    %457 = vector.extract_strided_slice %456 {offsets = [0, 0], sizes = [8, 32], strides = [1, 1]} : vector<8x96xf32> to vector<8x32xf32>
    %458 = vector.extract_strided_slice %456 {offsets = [0, 32], sizes = [8, 32], strides = [1, 1]} : vector<8x96xf32> to vector<8x32xf32>
    %459 = vector.extract_strided_slice %456 {offsets = [0, 64], sizes = [8, 32], strides = [1, 1]} : vector<8x96xf32> to vector<8x32xf32>
    %460 = vector.extract_strided_slice %450 {offsets = [0, 96], sizes = [8, 32], strides = [1, 1]} : vector<8x128xf32> to vector<8x32xf32>
    %461 = math.tanh %460 : vector<8x32xf32>
    %462 = arith.mulf %458, %440 : vector<8x32xf32>
    %463 = arith.mulf %457, %461 : vector<8x32xf32>
    %464 = arith.addf %462, %463 : vector<8x32xf32>
    %465 = math.tanh %464 : vector<8x32xf32>
    %466 = arith.mulf %459, %465 : vector<8x32xf32>
    %467 = arith.index_cast %446 : i32 to index
    %c0_246 = arith.constant 0 : index
    %468 = vector.load %arg24[%467, %c0_246] : memref<64x32xf32, #tpu.memory_space<vmem>>, vector<8x32xf32>
    tpu.vector_store %arg24[%467, %c0_246], %466 {strides = array<i32>} : memref<64x32xf32, #tpu.memory_space<vmem>>, vector<8x32xf32>,
    %c4_i32_247 = arith.constant 4 : i32
    %c8_i32_248 = arith.constant 8 : i32
    %469 = arith.muli %c4_i32_247, %c8_i32_248 : i32
    %470 = tpu.assume_multiple %469, 8 : i32
    %cst_249 = arith.constant dense<0.000000e+00> : vector<8x128xf32>
    %471 = tpu.matmul %466, %313, %cst_249 {dimension_numbers = #tpu.dot_dimension_numbers<[1], [0], [0], [1], [0, 0, 1, 1], [], []>} : vector<8x32xf32>, vector<32x128xf32>, vector<8x128xf32> -> vector<8x128xf32>
    %472 = arith.index_cast %470 : i32 to index
    %c0_250 = arith.constant 0 : index
    %473 = vector.load %arg23[%472, %c0_250] : memref<64x128xf32, #tpu.memory_space<vmem>>, vector<8x128xf32>
    %474 = arith.addf %471, %473 : vector<8x128xf32>
    %475 = vector.extract_strided_slice %474 {offsets = [0, 0], sizes = [8, 96], strides = [1, 1]} : vector<8x128xf32> to vector<8x96xf32>
    %476 = arith.negf %475 : vector<8x96xf32>
    %477 = math.exp %476 : vector<8x96xf32>
    %cst_251 = arith.constant 1.000000e+00 : f32
    %478 = vector.broadcast %cst_251 : f32 to vector<8x96xf32>
    %479 = arith.addf %478, %477 : vector<8x96xf32>
    %480 = arith.divf %478, %479 : vector<8x96xf32>
    %481 = vector.extract_strided_slice %480 {offsets = [0, 0], sizes = [8, 32], strides = [1, 1]} : vector<8x96xf32> to vector<8x32xf32>
    %482 = vector.extract_strided_slice %480 {offsets = [0, 32], sizes = [8, 32], strides = [1, 1]} : vector<8x96xf32> to vector<8x32xf32>
    %483 = vector.extract_strided_slice %480 {offsets = [0, 64], sizes = [8, 32], strides = [1, 1]} : vector<8x96xf32> to vector<8x32xf32>
    %484 = vector.extract_strided_slice %474 {offsets = [0, 96], sizes = [8, 32], strides = [1, 1]} : vector<8x128xf32> to vector<8x32xf32>
    %485 = math.tanh %484 : vector<8x32xf32>
    %486 = arith.mulf %482, %464 : vector<8x32xf32>
    %487 = arith.mulf %481, %485 : vector<8x32xf32>
    %488 = arith.addf %486, %487 : vector<8x32xf32>
    %489 = math.tanh %488 : vector<8x32xf32>
    %490 = arith.mulf %483, %489 : vector<8x32xf32>
    %491 = arith.index_cast %470 : i32 to index
    %c0_252 = arith.constant 0 : index
    %492 = vector.load %arg24[%491, %c0_252] : memref<64x32xf32, #tpu.memory_space<vmem>>, vector<8x32xf32>
    tpu.vector_store %arg24[%491, %c0_252], %490 {strides = array<i32>} : memref<64x32xf32, #tpu.memory_space<vmem>>, vector<8x32xf32>,
    %c5_i32_253 = arith.constant 5 : i32
    %c8_i32_254 = arith.constant 8 : i32
    %493 = arith.muli %c5_i32_253, %c8_i32_254 : i32
    %494 = tpu.assume_multiple %493, 8 : i32
    %cst_255 = arith.constant dense<0.000000e+00> : vector<8x128xf32>
    %495 = tpu.matmul %490, %313, %cst_255 {dimension_numbers = #tpu.dot_dimension_numbers<[1], [0], [0], [1], [0, 0, 1, 1], [], []>} : vector<8x32xf32>, vector<32x128xf32>, vector<8x128xf32> -> vector<8x128xf32>
    %496 = arith.index_cast %494 : i32 to index
    %c0_256 = arith.constant 0 : index
    %497 = vector.load %arg23[%496, %c0_256] : memref<64x128xf32, #tpu.memory_space<vmem>>, vector<8x128xf32>
    %498 = arith.addf %495, %497 : vector<8x128xf32>
    %499 = vector.extract_strided_slice %498 {offsets = [0, 0], sizes = [8, 96], strides = [1, 1]} : vector<8x128xf32> to vector<8x96xf32>
    %500 = arith.negf %499 : vector<8x96xf32>
    %501 = math.exp %500 : vector<8x96xf32>
    %cst_257 = arith.constant 1.000000e+00 : f32
    %502 = vector.broadcast %cst_257 : f32 to vector<8x96xf32>
    %503 = arith.addf %502, %501 : vector<8x96xf32>
    %504 = arith.divf %502, %503 : vector<8x96xf32>
    %505 = vector.extract_strided_slice %504 {offsets = [0, 0], sizes = [8, 32], strides = [1, 1]} : vector<8x96xf32> to vector<8x32xf32>
    %506 = vector.extract_strided_slice %504 {offsets = [0, 32], sizes = [8, 32], strides = [1, 1]} : vector<8x96xf32> to vector<8x32xf32>
    %507 = vector.extract_strided_slice %504 {offsets = [0, 64], sizes = [8, 32], strides = [1, 1]} : vector<8x96xf32> to vector<8x32xf32>
    %508 = vector.extract_strided_slice %498 {offsets = [0, 96], sizes = [8, 32], strides = [1, 1]} : vector<8x128xf32> to vector<8x32xf32>
    %509 = math.tanh %508 : vector<8x32xf32>
    %510 = arith.mulf %506, %488 : vector<8x32xf32>
    %511 = arith.mulf %505, %509 : vector<8x32xf32>
    %512 = arith.addf %510, %511 : vector<8x32xf32>
    %513 = math.tanh %512 : vector<8x32xf32>
    %514 = arith.mulf %507, %513 : vector<8x32xf32>
    %515 = arith.index_cast %494 : i32 to index
    %c0_258 = arith.constant 0 : index
    %516 = vector.load %arg24[%515, %c0_258] : memref<64x32xf32, #tpu.memory_space<vmem>>, vector<8x32xf32>
    tpu.vector_store %arg24[%515, %c0_258], %514 {strides = array<i32>} : memref<64x32xf32, #tpu.memory_space<vmem>>, vector<8x32xf32>,
    %c6_i32_259 = arith.constant 6 : i32
    %c8_i32_260 = arith.constant 8 : i32
    %517 = arith.muli %c6_i32_259, %c8_i32_260 : i32
    %518 = tpu.assume_multiple %517, 8 : i32
    %cst_261 = arith.constant dense<0.000000e+00> : vector<8x128xf32>
    %519 = tpu.matmul %514, %313, %cst_261 {dimension_numbers = #tpu.dot_dimension_numbers<[1], [0], [0], [1], [0, 0, 1, 1], [], []>} : vector<8x32xf32>, vector<32x128xf32>, vector<8x128xf32> -> vector<8x128xf32>
    %520 = arith.index_cast %518 : i32 to index
    %c0_262 = arith.constant 0 : index
    %521 = vector.load %arg23[%520, %c0_262] : memref<64x128xf32, #tpu.memory_space<vmem>>, vector<8x128xf32>
    %522 = arith.addf %519, %521 : vector<8x128xf32>
    %523 = vector.extract_strided_slice %522 {offsets = [0, 0], sizes = [8, 96], strides = [1, 1]} : vector<8x128xf32> to vector<8x96xf32>
    %524 = arith.negf %523 : vector<8x96xf32>
    %525 = math.exp %524 : vector<8x96xf32>
    %cst_263 = arith.constant 1.000000e+00 : f32
    %526 = vector.broadcast %cst_263 : f32 to vector<8x96xf32>
    %527 = arith.addf %526, %525 : vector<8x96xf32>
    %528 = arith.divf %526, %527 : vector<8x96xf32>
    %529 = vector.extract_strided_slice %528 {offsets = [0, 0], sizes = [8, 32], strides = [1, 1]} : vector<8x96xf32> to vector<8x32xf32>
    %530 = vector.extract_strided_slice %528 {offsets = [0, 32], sizes = [8, 32], strides = [1, 1]} : vector<8x96xf32> to vector<8x32xf32>
    %531 = vector.extract_strided_slice %528 {offsets = [0, 64], sizes = [8, 32], strides = [1, 1]} : vector<8x96xf32> to vector<8x32xf32>
    %532 = vector.extract_strided_slice %522 {offsets = [0, 96], sizes = [8, 32], strides = [1, 1]} : vector<8x128xf32> to vector<8x32xf32>
    %533 = math.tanh %532 : vector<8x32xf32>
    %534 = arith.mulf %530, %512 : vector<8x32xf32>
    %535 = arith.mulf %529, %533 : vector<8x32xf32>
    %536 = arith.addf %534, %535 : vector<8x32xf32>
    %537 = math.tanh %536 : vector<8x32xf32>
    %538 = arith.mulf %531, %537 : vector<8x32xf32>
    %539 = arith.index_cast %518 : i32 to index
    %c0_264 = arith.constant 0 : index
    %540 = vector.load %arg24[%539, %c0_264] : memref<64x32xf32, #tpu.memory_space<vmem>>, vector<8x32xf32>
    tpu.vector_store %arg24[%539, %c0_264], %538 {strides = array<i32>} : memref<64x32xf32, #tpu.memory_space<vmem>>, vector<8x32xf32>,
    %c7_i32_265 = arith.constant 7 : i32
    %c8_i32_266 = arith.constant 8 : i32
    %541 = arith.muli %c7_i32_265, %c8_i32_266 : i32
    %542 = tpu.assume_multiple %541, 8 : i32
    %cst_267 = arith.constant dense<0.000000e+00> : vector<8x128xf32>
    %543 = tpu.matmul %538, %313, %cst_267 {dimension_numbers = #tpu.dot_dimension_numbers<[1], [0], [0], [1], [0, 0, 1, 1], [], []>} : vector<8x32xf32>, vector<32x128xf32>, vector<8x128xf32> -> vector<8x128xf32>
    %544 = arith.index_cast %542 : i32 to index
    %c0_268 = arith.constant 0 : index
    %545 = vector.load %arg23[%544, %c0_268] : memref<64x128xf32, #tpu.memory_space<vmem>>, vector<8x128xf32>
    %546 = arith.addf %543, %545 : vector<8x128xf32>
    %547 = vector.extract_strided_slice %546 {offsets = [0, 0], sizes = [8, 96], strides = [1, 1]} : vector<8x128xf32> to vector<8x96xf32>
    %548 = arith.negf %547 : vector<8x96xf32>
    %549 = math.exp %548 : vector<8x96xf32>
    %cst_269 = arith.constant 1.000000e+00 : f32
    %550 = vector.broadcast %cst_269 : f32 to vector<8x96xf32>
    %551 = arith.addf %550, %549 : vector<8x96xf32>
    %552 = arith.divf %550, %551 : vector<8x96xf32>
    %553 = vector.extract_strided_slice %552 {offsets = [0, 0], sizes = [8, 32], strides = [1, 1]} : vector<8x96xf32> to vector<8x32xf32>
    %554 = vector.extract_strided_slice %552 {offsets = [0, 32], sizes = [8, 32], strides = [1, 1]} : vector<8x96xf32> to vector<8x32xf32>
    %555 = vector.extract_strided_slice %552 {offsets = [0, 64], sizes = [8, 32], strides = [1, 1]} : vector<8x96xf32> to vector<8x32xf32>
    %556 = vector.extract_strided_slice %546 {offsets = [0, 96], sizes = [8, 32], strides = [1, 1]} : vector<8x128xf32> to vector<8x32xf32>
    %557 = math.tanh %556 : vector<8x32xf32>
    %558 = arith.mulf %554, %536 : vector<8x32xf32>
    %559 = arith.mulf %553, %557 : vector<8x32xf32>
    %560 = arith.addf %558, %559 : vector<8x32xf32>
    %561 = math.tanh %560 : vector<8x32xf32>
    %562 = arith.mulf %555, %561 : vector<8x32xf32>
    %563 = arith.index_cast %542 : i32 to index
    %c0_270 = arith.constant 0 : index
    %564 = vector.load %arg24[%563, %c0_270] : memref<64x32xf32, #tpu.memory_space<vmem>>, vector<8x32xf32>
    tpu.vector_store %arg24[%563, %c0_270], %562 {strides = array<i32>} : memref<64x32xf32, #tpu.memory_space<vmem>>, vector<8x32xf32>,
    %c8_i32_271 = arith.constant 8 : i32
    %565 = tpu.iota {dimensions = array<i32: 1>} : vector<8x32xi32>
    %c16_i32_272 = arith.constant 16 : i32
    %566 = vector.broadcast %c16_i32_272 : i32 to vector<8x32xi32>
    %567 = arith.cmpi slt, %565, %566 : vector<8x32xi32>
    %c0_273 = arith.constant 0 : index
    %c0_274 = arith.constant 0 : index
    %568 = vector.load %arg24[%c0_273, %c0_274] : memref<64x32xf32, #tpu.memory_space<vmem>>, vector<8x32xf32>
    %c56_275 = arith.constant 56 : index
    %c0_276 = arith.constant 0 : index
    %569 = vector.load %arg24[%c56_275, %c0_276] : memref<64x32xf32, #tpu.memory_space<vmem>>, vector<8x32xf32>
    %570 = arith.select %567, %568, %569 : vector<8x32xi1>, vector<8x32xf32>
    %c0_277 = arith.constant 0 : index
    %c0_278 = arith.constant 0 : index
    %571 = vector.load %arg25[%c0_277, %c0_278] : memref<64x32xf32, #tpu.memory_space<vmem>>, vector<8x32xf32>
    tpu.vector_store %arg25[%c0_277, %c0_278], %570 {strides = array<i32>} : memref<64x32xf32, #tpu.memory_space<vmem>>, vector<8x32xf32>,
    %c8_279 = arith.constant 8 : index
    %c0_280 = arith.constant 0 : index
    %572 = vector.load %arg24[%c8_279, %c0_280] : memref<64x32xf32, #tpu.memory_space<vmem>>, vector<8x32xf32>
    %c48_281 = arith.constant 48 : index
    %c0_282 = arith.constant 0 : index
    %573 = vector.load %arg24[%c48_281, %c0_282] : memref<64x32xf32, #tpu.memory_space<vmem>>, vector<8x32xf32>
    %574 = arith.select %567, %572, %573 : vector<8x32xi1>, vector<8x32xf32>
    %c8_283 = arith.constant 8 : index
    %c0_284 = arith.constant 0 : index
    %575 = vector.load %arg25[%c8_283, %c0_284] : memref<64x32xf32, #tpu.memory_space<vmem>>, vector<8x32xf32>
    tpu.vector_store %arg25[%c8_283, %c0_284], %574 {strides = array<i32>} : memref<64x32xf32, #tpu.memory_space<vmem>>, vector<8x32xf32>,
    %c16_285 = arith.constant 16 : index
    %c0_286 = arith.constant 0 : index
    %576 = vector.load %arg24[%c16_285, %c0_286] : memref<64x32xf32, #tpu.memory_space<vmem>>, vector<8x32xf32>
    %c40_287 = arith.constant 40 : index
    %c0_288 = arith.constant 0 : index
    %577 = vector.load %arg24[%c40_287, %c0_288] : memref<64x32xf32, #tpu.memory_space<vmem>>, vector<8x32xf32>
    %578 = arith.select %567, %576, %577 : vector<8x32xi1>, vector<8x32xf32>
    %c16_289 = arith.constant 16 : index
    %c0_290 = arith.constant 0 : index
    %579 = vector.load %arg25[%c16_289, %c0_290] : memref<64x32xf32, #tpu.memory_space<vmem>>, vector<8x32xf32>
    tpu.vector_store %arg25[%c16_289, %c0_290], %578 {strides = array<i32>} : memref<64x32xf32, #tpu.memory_space<vmem>>, vector<8x32xf32>,
    %c24_291 = arith.constant 24 : index
    %c0_292 = arith.constant 0 : index
    %580 = vector.load %arg24[%c24_291, %c0_292] : memref<64x32xf32, #tpu.memory_space<vmem>>, vector<8x32xf32>
    %c32_293 = arith.constant 32 : index
    %c0_294 = arith.constant 0 : index
    %581 = vector.load %arg24[%c32_293, %c0_294] : memref<64x32xf32, #tpu.memory_space<vmem>>, vector<8x32xf32>
    %582 = arith.select %567, %580, %581 : vector<8x32xi1>, vector<8x32xf32>
    %c24_295 = arith.constant 24 : index
    %c0_296 = arith.constant 0 : index
    %583 = vector.load %arg25[%c24_295, %c0_296] : memref<64x32xf32, #tpu.memory_space<vmem>>, vector<8x32xf32>
    tpu.vector_store %arg25[%c24_295, %c0_296], %582 {strides = array<i32>} : memref<64x32xf32, #tpu.memory_space<vmem>>, vector<8x32xf32>,
    %c32_297 = arith.constant 32 : index
    %c0_298 = arith.constant 0 : index
    %584 = vector.load %arg24[%c32_297, %c0_298] : memref<64x32xf32, #tpu.memory_space<vmem>>, vector<8x32xf32>
    %c24_299 = arith.constant 24 : index
    %c0_300 = arith.constant 0 : index
    %585 = vector.load %arg24[%c24_299, %c0_300] : memref<64x32xf32, #tpu.memory_space<vmem>>, vector<8x32xf32>
    %586 = arith.select %567, %584, %585 : vector<8x32xi1>, vector<8x32xf32>
    %c32_301 = arith.constant 32 : index
    %c0_302 = arith.constant 0 : index
    %587 = vector.load %arg25[%c32_301, %c0_302] : memref<64x32xf32, #tpu.memory_space<vmem>>, vector<8x32xf32>
    tpu.vector_store %arg25[%c32_301, %c0_302], %586 {strides = array<i32>} : memref<64x32xf32, #tpu.memory_space<vmem>>, vector<8x32xf32>,
    %c40_303 = arith.constant 40 : index
    %c0_304 = arith.constant 0 : index
    %588 = vector.load %arg24[%c40_303, %c0_304] : memref<64x32xf32, #tpu.memory_space<vmem>>, vector<8x32xf32>
    %c16_305 = arith.constant 16 : index
    %c0_306 = arith.constant 0 : index
    %589 = vector.load %arg24[%c16_305, %c0_306] : memref<64x32xf32, #tpu.memory_space<vmem>>, vector<8x32xf32>
    %590 = arith.select %567, %588, %589 : vector<8x32xi1>, vector<8x32xf32>
    %c40_307 = arith.constant 40 : index
    %c0_308 = arith.constant 0 : index
    %591 = vector.load %arg25[%c40_307, %c0_308] : memref<64x32xf32, #tpu.memory_space<vmem>>, vector<8x32xf32>
    tpu.vector_store %arg25[%c40_307, %c0_308], %590 {strides = array<i32>} : memref<64x32xf32, #tpu.memory_space<vmem>>, vector<8x32xf32>,
    %c48_309 = arith.constant 48 : index
    %c0_310 = arith.constant 0 : index
    %592 = vector.load %arg24[%c48_309, %c0_310] : memref<64x32xf32, #tpu.memory_space<vmem>>, vector<8x32xf32>
    %c8_311 = arith.constant 8 : index
    %c0_312 = arith.constant 0 : index
    %593 = vector.load %arg24[%c8_311, %c0_312] : memref<64x32xf32, #tpu.memory_space<vmem>>, vector<8x32xf32>
    %594 = arith.select %567, %592, %593 : vector<8x32xi1>, vector<8x32xf32>
    %c48_313 = arith.constant 48 : index
    %c0_314 = arith.constant 0 : index
    %595 = vector.load %arg25[%c48_313, %c0_314] : memref<64x32xf32, #tpu.memory_space<vmem>>, vector<8x32xf32>
    tpu.vector_store %arg25[%c48_313, %c0_314], %594 {strides = array<i32>} : memref<64x32xf32, #tpu.memory_space<vmem>>, vector<8x32xf32>,
    %c56_315 = arith.constant 56 : index
    %c0_316 = arith.constant 0 : index
    %596 = vector.load %arg24[%c56_315, %c0_316] : memref<64x32xf32, #tpu.memory_space<vmem>>, vector<8x32xf32>
    %c0_317 = arith.constant 0 : index
    %c0_318 = arith.constant 0 : index
    %597 = vector.load %arg24[%c0_317, %c0_318] : memref<64x32xf32, #tpu.memory_space<vmem>>, vector<8x32xf32>
    %598 = arith.select %567, %596, %597 : vector<8x32xi1>, vector<8x32xf32>
    %c56_319 = arith.constant 56 : index
    %c0_320 = arith.constant 0 : index
    %599 = vector.load %arg25[%c56_319, %c0_320] : memref<64x32xf32, #tpu.memory_space<vmem>>, vector<8x32xf32>
    tpu.vector_store %arg25[%c56_319, %c0_320], %598 {strides = array<i32>} : memref<64x32xf32, #tpu.memory_space<vmem>>, vector<8x32xf32>,
    %c0_321 = arith.constant 0 : index
    %c0_322 = arith.constant 0 : index
    %600 = vector.load %arg25[%c0_321, %c0_322] : memref<64x32xf32, #tpu.memory_space<vmem>>, vector<64x32xf32>
    %cst_323 = arith.constant dense<0.000000e+00> : vector<64xf32>
    %601 = vector.multi_reduction <add>, %600, %cst_323 [1] : vector<64x32xf32> to vector<64xf32>
    %602 = vector.shape_cast %601 : vector<64xf32> to vector<64x1xf32>
    %603 = arith.mulf %600, %600 : vector<64x32xf32>
    %cst_324 = arith.constant dense<0.000000e+00> : vector<64xf32>
    %604 = vector.multi_reduction <add>, %603, %cst_324 [1] : vector<64x32xf32> to vector<64xf32>
    %605 = vector.shape_cast %604 : vector<64xf32> to vector<64x1xf32>
    %cst_325 = arith.constant 3.125000e-02 : f32
    %606 = vector.broadcast %cst_325 : f32 to vector<64x1xf32>
    %607 = arith.mulf %602, %606 : vector<64x1xf32>
    %cst_326 = arith.constant 3.125000e-02 : f32
    %608 = vector.broadcast %cst_326 : f32 to vector<64x1xf32>
    %609 = arith.mulf %605, %608 : vector<64x1xf32>
    %610 = arith.mulf %607, %607 : vector<64x1xf32>
    %611 = arith.subf %609, %610 : vector<64x1xf32>
    %612 = vector.broadcast %607 : vector<64x1xf32> to vector<64x32xf32>
    %613 = arith.subf %600, %612 : vector<64x32xf32>
    %cst_327 = arith.constant 9.99999974E-6 : f32
    %614 = vector.broadcast %cst_327 : f32 to vector<64x1xf32>
    %615 = arith.addf %611, %614 : vector<64x1xf32>
    %616 = math.rsqrt %615 : vector<64x1xf32>
    %617 = vector.broadcast %616 : vector<64x1xf32> to vector<64x32xf32>
    %618 = arith.mulf %613, %617 : vector<64x32xf32>
    %c0_328 = arith.constant 0 : index
    %c0_329 = arith.constant 0 : index
    %619 = vector.load %arg10[%c0_328, %c0_329] : memref<1x32xf32, #tpu.memory_space<vmem>>, vector<1x32xf32>
    %620 = vector.broadcast %619 : vector<1x32xf32> to vector<64x32xf32>
    %621 = arith.mulf %618, %620 : vector<64x32xf32>
    %c0_330 = arith.constant 0 : index
    %c0_331 = arith.constant 0 : index
    %622 = vector.load %arg11[%c0_330, %c0_331] : memref<1x32xf32, #tpu.memory_space<vmem>>, vector<1x32xf32>
    %623 = vector.broadcast %622 : vector<1x32xf32> to vector<64x32xf32>
    %624 = arith.addf %621, %623 : vector<64x32xf32>
    %c0_332 = arith.constant 0 : index
    %c0_333 = arith.constant 0 : index
    %625 = vector.load %arg14[%c0_332, %c0_333] : memref<32x128xf32, #tpu.memory_space<vmem>>, vector<32x128xf32>
    %c0_334 = arith.constant 0 : index
    %c0_335 = arith.constant 0 : index
    %626 = vector.load %arg12[%c0_334, %c0_335] : memref<32x128xf32, #tpu.memory_space<vmem>>, vector<32x128xf32>
    %cst_336 = arith.constant dense<0.000000e+00> : vector<64x128xf32>
    %627 = tpu.matmul %624, %626, %cst_336 {dimension_numbers = #tpu.dot_dimension_numbers<[1], [0], [0], [1], [0, 0, 1, 1], [], []>} : vector<64x32xf32>, vector<32x128xf32>, vector<64x128xf32> -> vector<64x128xf32>
    %c0_337 = arith.constant 0 : index
    %c0_338 = arith.constant 0 : index
    %628 = vector.load %arg13[%c0_337, %c0_338] : memref<1x128xf32, #tpu.memory_space<vmem>>, vector<1x128xf32>
    %629 = vector.broadcast %628 : vector<1x128xf32> to vector<64x128xf32>
    %630 = arith.addf %627, %629 : vector<64x128xf32>
    %c0_339 = arith.constant 0 : index
    %c0_340 = arith.constant 0 : index
    %631 = vector.load %arg22[%c0_339, %c0_340] : memref<64x128xf32, #tpu.memory_space<vmem>>, vector<64x128xf32>
    tpu.vector_store %arg22[%c0_339, %c0_340], %630 {strides = array<i32>} : memref<64x128xf32, #tpu.memory_space<vmem>>, vector<64x128xf32>,
    %632 = tpu.iota {dimensions = array<i32: 1>} : vector<8x128xi32>
    %c32_i32_341 = arith.constant 32 : i32
    %c0_i32_342 = arith.constant 0 : i32
    %633 = arith.cmpi eq, %c32_i32_341, %c0_i32_342 : i32
    %c1_i32_343 = arith.constant 1 : i32
    %634 = arith.select %633, %c1_i32_343, %c32_i32_341 : i32
    %635 = vector.broadcast %634 : i32 to vector<8x128xi32>
    %636 = arith.remsi %632, %635 : vector<8x128xi32>
    %c0_i32_344 = arith.constant 0 : i32
    %637 = vector.broadcast %c0_i32_344 : i32 to vector<8x128xi32>
    %638 = arith.cmpi ne, %636, %637 : vector<8x128xi32>
    %c0_i32_345 = arith.constant 0 : i32
    %639 = vector.broadcast %c0_i32_345 : i32 to vector<8x128xi32>
    %640 = arith.cmpi slt, %636, %639 : vector<8x128xi32>
    %c0_i32_346 = arith.constant 0 : i32
    %641 = arith.cmpi slt, %634, %c0_i32_346 : i32
    %642 = vector.broadcast %641 : i1 to vector<8x128xi1>
    %643 = vector.broadcast %642 : vector<8x128xi1> to vector<8x128xi1>
    %644 = arith.xori %640, %643 : vector<8x128xi1>
    %645 = arith.andi %644, %638 : vector<8x128xi1>
    %646 = vector.broadcast %634 : i32 to vector<8x128xi32>
    %647 = arith.addi %636, %646 : vector<8x128xi32>
    %648 = arith.select %645, %647, %636 : vector<8x128xi1>, vector<8x128xi32>
    %c16_i32_347 = arith.constant 16 : i32
    %649 = vector.broadcast %c16_i32_347 : i32 to vector<8x128xi32>
    %650 = arith.cmpi slt, %648, %649 : vector<8x128xi32>
    %c0_348 = arith.constant 0 : index
    %c0_349 = arith.constant 0 : index
    %651 = vector.load %arg22[%c0_348, %c0_349] : memref<64x128xf32, #tpu.memory_space<vmem>>, vector<8x128xf32>
    %c56_350 = arith.constant 56 : index
    %c0_351 = arith.constant 0 : index
    %652 = vector.load %arg22[%c56_350, %c0_351] : memref<64x128xf32, #tpu.memory_space<vmem>>, vector<8x128xf32>
    %653 = arith.select %650, %651, %652 : vector<8x128xi1>, vector<8x128xf32>
    %c0_352 = arith.constant 0 : index
    %c0_353 = arith.constant 0 : index
    %654 = vector.load %arg23[%c0_352, %c0_353] : memref<64x128xf32, #tpu.memory_space<vmem>>, vector<8x128xf32>
    tpu.vector_store %arg23[%c0_352, %c0_353], %653 {strides = array<i32>} : memref<64x128xf32, #tpu.memory_space<vmem>>, vector<8x128xf32>,
    %c8_354 = arith.constant 8 : index
    %c0_355 = arith.constant 0 : index
    %655 = vector.load %arg22[%c8_354, %c0_355] : memref<64x128xf32, #tpu.memory_space<vmem>>, vector<8x128xf32>
    %c48_356 = arith.constant 48 : index
    %c0_357 = arith.constant 0 : index
    %656 = vector.load %arg22[%c48_356, %c0_357] : memref<64x128xf32, #tpu.memory_space<vmem>>, vector<8x128xf32>
    %657 = arith.select %650, %655, %656 : vector<8x128xi1>, vector<8x128xf32>
    %c8_358 = arith.constant 8 : index
    %c0_359 = arith.constant 0 : index
    %658 = vector.load %arg23[%c8_358, %c0_359] : memref<64x128xf32, #tpu.memory_space<vmem>>, vector<8x128xf32>
    tpu.vector_store %arg23[%c8_358, %c0_359], %657 {strides = array<i32>} : memref<64x128xf32, #tpu.memory_space<vmem>>, vector<8x128xf32>,
    %c16_360 = arith.constant 16 : index
    %c0_361 = arith.constant 0 : index
    %659 = vector.load %arg22[%c16_360, %c0_361] : memref<64x128xf32, #tpu.memory_space<vmem>>, vector<8x128xf32>
    %c40_362 = arith.constant 40 : index
    %c0_363 = arith.constant 0 : index
    %660 = vector.load %arg22[%c40_362, %c0_363] : memref<64x128xf32, #tpu.memory_space<vmem>>, vector<8x128xf32>
    %661 = arith.select %650, %659, %660 : vector<8x128xi1>, vector<8x128xf32>
    %c16_364 = arith.constant 16 : index
    %c0_365 = arith.constant 0 : index
    %662 = vector.load %arg23[%c16_364, %c0_365] : memref<64x128xf32, #tpu.memory_space<vmem>>, vector<8x128xf32>
    tpu.vector_store %arg23[%c16_364, %c0_365], %661 {strides = array<i32>} : memref<64x128xf32, #tpu.memory_space<vmem>>, vector<8x128xf32>,
    %c24_366 = arith.constant 24 : index
    %c0_367 = arith.constant 0 : index
    %663 = vector.load %arg22[%c24_366, %c0_367] : memref<64x128xf32, #tpu.memory_space<vmem>>, vector<8x128xf32>
    %c32_368 = arith.constant 32 : index
    %c0_369 = arith.constant 0 : index
    %664 = vector.load %arg22[%c32_368, %c0_369] : memref<64x128xf32, #tpu.memory_space<vmem>>, vector<8x128xf32>
    %665 = arith.select %650, %663, %664 : vector<8x128xi1>, vector<8x128xf32>
    %c24_370 = arith.constant 24 : index
    %c0_371 = arith.constant 0 : index
    %666 = vector.load %arg23[%c24_370, %c0_371] : memref<64x128xf32, #tpu.memory_space<vmem>>, vector<8x128xf32>
    tpu.vector_store %arg23[%c24_370, %c0_371], %665 {strides = array<i32>} : memref<64x128xf32, #tpu.memory_space<vmem>>, vector<8x128xf32>,
    %c32_372 = arith.constant 32 : index
    %c0_373 = arith.constant 0 : index
    %667 = vector.load %arg22[%c32_372, %c0_373] : memref<64x128xf32, #tpu.memory_space<vmem>>, vector<8x128xf32>
    %c24_374 = arith.constant 24 : index
    %c0_375 = arith.constant 0 : index
    %668 = vector.load %arg22[%c24_374, %c0_375] : memref<64x128xf32, #tpu.memory_space<vmem>>, vector<8x128xf32>
    %669 = arith.select %650, %667, %668 : vector<8x128xi1>, vector<8x128xf32>
    %c32_376 = arith.constant 32 : index
    %c0_377 = arith.constant 0 : index
    %670 = vector.load %arg23[%c32_376, %c0_377] : memref<64x128xf32, #tpu.memory_space<vmem>>, vector<8x128xf32>
    tpu.vector_store %arg23[%c32_376, %c0_377], %669 {strides = array<i32>} : memref<64x128xf32, #tpu.memory_space<vmem>>, vector<8x128xf32>,
    %c40_378 = arith.constant 40 : index
    %c0_379 = arith.constant 0 : index
    %671 = vector.load %arg22[%c40_378, %c0_379] : memref<64x128xf32, #tpu.memory_space<vmem>>, vector<8x128xf32>
    %c16_380 = arith.constant 16 : index
    %c0_381 = arith.constant 0 : index
    %672 = vector.load %arg22[%c16_380, %c0_381] : memref<64x128xf32, #tpu.memory_space<vmem>>, vector<8x128xf32>
    %673 = arith.select %650, %671, %672 : vector<8x128xi1>, vector<8x128xf32>
    %c40_382 = arith.constant 40 : index
    %c0_383 = arith.constant 0 : index
    %674 = vector.load %arg23[%c40_382, %c0_383] : memref<64x128xf32, #tpu.memory_space<vmem>>, vector<8x128xf32>
    tpu.vector_store %arg23[%c40_382, %c0_383], %673 {strides = array<i32>} : memref<64x128xf32, #tpu.memory_space<vmem>>, vector<8x128xf32>,
    %c48_384 = arith.constant 48 : index
    %c0_385 = arith.constant 0 : index
    %675 = vector.load %arg22[%c48_384, %c0_385] : memref<64x128xf32, #tpu.memory_space<vmem>>, vector<8x128xf32>
    %c8_386 = arith.constant 8 : index
    %c0_387 = arith.constant 0 : index
    %676 = vector.load %arg22[%c8_386, %c0_387] : memref<64x128xf32, #tpu.memory_space<vmem>>, vector<8x128xf32>
    %677 = arith.select %650, %675, %676 : vector<8x128xi1>, vector<8x128xf32>
    %c48_388 = arith.constant 48 : index
    %c0_389 = arith.constant 0 : index
    %678 = vector.load %arg23[%c48_388, %c0_389] : memref<64x128xf32, #tpu.memory_space<vmem>>, vector<8x128xf32>
    tpu.vector_store %arg23[%c48_388, %c0_389], %677 {strides = array<i32>} : memref<64x128xf32, #tpu.memory_space<vmem>>, vector<8x128xf32>,
    %c56_390 = arith.constant 56 : index
    %c0_391 = arith.constant 0 : index
    %679 = vector.load %arg22[%c56_390, %c0_391] : memref<64x128xf32, #tpu.memory_space<vmem>>, vector<8x128xf32>
    %c0_392 = arith.constant 0 : index
    %c0_393 = arith.constant 0 : index
    %680 = vector.load %arg22[%c0_392, %c0_393] : memref<64x128xf32, #tpu.memory_space<vmem>>, vector<8x128xf32>
    %681 = arith.select %650, %679, %680 : vector<8x128xi1>, vector<8x128xf32>
    %c56_394 = arith.constant 56 : index
    %c0_395 = arith.constant 0 : index
    %682 = vector.load %arg23[%c56_394, %c0_395] : memref<64x128xf32, #tpu.memory_space<vmem>>, vector<8x128xf32>
    tpu.vector_store %arg23[%c56_394, %c0_395], %681 {strides = array<i32>} : memref<64x128xf32, #tpu.memory_space<vmem>>, vector<8x128xf32>,
    %cst_396 = arith.constant 0.000000e+00 : f32
    %683 = vector.broadcast %cst_396 : f32 to vector<8x32xf32>
    %cst_397 = arith.constant 0.000000e+00 : f32
    %684 = vector.broadcast %cst_397 : f32 to vector<8x32xf32>
    %c0_i32_398 = arith.constant 0 : i32
    %c8_i32_399 = arith.constant 8 : i32
    %685 = arith.muli %c0_i32_398, %c8_i32_399 : i32
    %686 = tpu.assume_multiple %685, 8 : i32
    %cst_400 = arith.constant dense<0.000000e+00> : vector<8x128xf32>
    %687 = tpu.matmul %683, %625, %cst_400 {dimension_numbers = #tpu.dot_dimension_numbers<[1], [0], [0], [1], [0, 0, 1, 1], [], []>} : vector<8x32xf32>, vector<32x128xf32>, vector<8x128xf32> -> vector<8x128xf32>
    %688 = arith.index_cast %686 : i32 to index
    %c0_401 = arith.constant 0 : index
    %689 = vector.load %arg23[%688, %c0_401] : memref<64x128xf32, #tpu.memory_space<vmem>>, vector<8x128xf32>
    %690 = arith.addf %687, %689 : vector<8x128xf32>
    %691 = vector.extract_strided_slice %690 {offsets = [0, 0], sizes = [8, 96], strides = [1, 1]} : vector<8x128xf32> to vector<8x96xf32>
    %692 = arith.negf %691 : vector<8x96xf32>
    %693 = math.exp %692 : vector<8x96xf32>
    %cst_402 = arith.constant 1.000000e+00 : f32
    %694 = vector.broadcast %cst_402 : f32 to vector<8x96xf32>
    %695 = arith.addf %694, %693 : vector<8x96xf32>
    %696 = arith.divf %694, %695 : vector<8x96xf32>
    %697 = vector.extract_strided_slice %696 {offsets = [0, 0], sizes = [8, 32], strides = [1, 1]} : vector<8x96xf32> to vector<8x32xf32>
    %698 = vector.extract_strided_slice %696 {offsets = [0, 32], sizes = [8, 32], strides = [1, 1]} : vector<8x96xf32> to vector<8x32xf32>
    %699 = vector.extract_strided_slice %696 {offsets = [0, 64], sizes = [8, 32], strides = [1, 1]} : vector<8x96xf32> to vector<8x32xf32>
    %700 = vector.extract_strided_slice %690 {offsets = [0, 96], sizes = [8, 32], strides = [1, 1]} : vector<8x128xf32> to vector<8x32xf32>
    %701 = math.tanh %700 : vector<8x32xf32>
    %702 = arith.mulf %698, %684 : vector<8x32xf32>
    %703 = arith.mulf %697, %701 : vector<8x32xf32>
    %704 = arith.addf %702, %703 : vector<8x32xf32>
    %705 = math.tanh %704 : vector<8x32xf32>
    %706 = arith.mulf %699, %705 : vector<8x32xf32>
    %707 = arith.index_cast %686 : i32 to index
    %c0_403 = arith.constant 0 : index
    %708 = vector.load %arg24[%707, %c0_403] : memref<64x32xf32, #tpu.memory_space<vmem>>, vector<8x32xf32>
    tpu.vector_store %arg24[%707, %c0_403], %706 {strides = array<i32>} : memref<64x32xf32, #tpu.memory_space<vmem>>, vector<8x32xf32>,
    %c1_i32_404 = arith.constant 1 : i32
    %c8_i32_405 = arith.constant 8 : i32
    %709 = arith.muli %c1_i32_404, %c8_i32_405 : i32
    %710 = tpu.assume_multiple %709, 8 : i32
    %cst_406 = arith.constant dense<0.000000e+00> : vector<8x128xf32>
    %711 = tpu.matmul %706, %625, %cst_406 {dimension_numbers = #tpu.dot_dimension_numbers<[1], [0], [0], [1], [0, 0, 1, 1], [], []>} : vector<8x32xf32>, vector<32x128xf32>, vector<8x128xf32> -> vector<8x128xf32>
    %712 = arith.index_cast %710 : i32 to index
    %c0_407 = arith.constant 0 : index
    %713 = vector.load %arg23[%712, %c0_407] : memref<64x128xf32, #tpu.memory_space<vmem>>, vector<8x128xf32>
    %714 = arith.addf %711, %713 : vector<8x128xf32>
    %715 = vector.extract_strided_slice %714 {offsets = [0, 0], sizes = [8, 96], strides = [1, 1]} : vector<8x128xf32> to vector<8x96xf32>
    %716 = arith.negf %715 : vector<8x96xf32>
    %717 = math.exp %716 : vector<8x96xf32>
    %cst_408 = arith.constant 1.000000e+00 : f32
    %718 = vector.broadcast %cst_408 : f32 to vector<8x96xf32>
    %719 = arith.addf %718, %717 : vector<8x96xf32>
    %720 = arith.divf %718, %719 : vector<8x96xf32>
    %721 = vector.extract_strided_slice %720 {offsets = [0, 0], sizes = [8, 32], strides = [1, 1]} : vector<8x96xf32> to vector<8x32xf32>
    %722 = vector.extract_strided_slice %720 {offsets = [0, 32], sizes = [8, 32], strides = [1, 1]} : vector<8x96xf32> to vector<8x32xf32>
    %723 = vector.extract_strided_slice %720 {offsets = [0, 64], sizes = [8, 32], strides = [1, 1]} : vector<8x96xf32> to vector<8x32xf32>
    %724 = vector.extract_strided_slice %714 {offsets = [0, 96], sizes = [8, 32], strides = [1, 1]} : vector<8x128xf32> to vector<8x32xf32>
    %725 = math.tanh %724 : vector<8x32xf32>
    %726 = arith.mulf %722, %704 : vector<8x32xf32>
    %727 = arith.mulf %721, %725 : vector<8x32xf32>
    %728 = arith.addf %726, %727 : vector<8x32xf32>
    %729 = math.tanh %728 : vector<8x32xf32>
    %730 = arith.mulf %723, %729 : vector<8x32xf32>
    %731 = arith.index_cast %710 : i32 to index
    %c0_409 = arith.constant 0 : index
    %732 = vector.load %arg24[%731, %c0_409] : memref<64x32xf32, #tpu.memory_space<vmem>>, vector<8x32xf32>
    tpu.vector_store %arg24[%731, %c0_409], %730 {strides = array<i32>} : memref<64x32xf32, #tpu.memory_space<vmem>>, vector<8x32xf32>,
    %c2_i32_410 = arith.constant 2 : i32
    %c8_i32_411 = arith.constant 8 : i32
    %733 = arith.muli %c2_i32_410, %c8_i32_411 : i32
    %734 = tpu.assume_multiple %733, 8 : i32
    %cst_412 = arith.constant dense<0.000000e+00> : vector<8x128xf32>
    %735 = tpu.matmul %730, %625, %cst_412 {dimension_numbers = #tpu.dot_dimension_numbers<[1], [0], [0], [1], [0, 0, 1, 1], [], []>} : vector<8x32xf32>, vector<32x128xf32>, vector<8x128xf32> -> vector<8x128xf32>
    %736 = arith.index_cast %734 : i32 to index
    %c0_413 = arith.constant 0 : index
    %737 = vector.load %arg23[%736, %c0_413] : memref<64x128xf32, #tpu.memory_space<vmem>>, vector<8x128xf32>
    %738 = arith.addf %735, %737 : vector<8x128xf32>
    %739 = vector.extract_strided_slice %738 {offsets = [0, 0], sizes = [8, 96], strides = [1, 1]} : vector<8x128xf32> to vector<8x96xf32>
    %740 = arith.negf %739 : vector<8x96xf32>
    %741 = math.exp %740 : vector<8x96xf32>
    %cst_414 = arith.constant 1.000000e+00 : f32
    %742 = vector.broadcast %cst_414 : f32 to vector<8x96xf32>
    %743 = arith.addf %742, %741 : vector<8x96xf32>
    %744 = arith.divf %742, %743 : vector<8x96xf32>
    %745 = vector.extract_strided_slice %744 {offsets = [0, 0], sizes = [8, 32], strides = [1, 1]} : vector<8x96xf32> to vector<8x32xf32>
    %746 = vector.extract_strided_slice %744 {offsets = [0, 32], sizes = [8, 32], strides = [1, 1]} : vector<8x96xf32> to vector<8x32xf32>
    %747 = vector.extract_strided_slice %744 {offsets = [0, 64], sizes = [8, 32], strides = [1, 1]} : vector<8x96xf32> to vector<8x32xf32>
    %748 = vector.extract_strided_slice %738 {offsets = [0, 96], sizes = [8, 32], strides = [1, 1]} : vector<8x128xf32> to vector<8x32xf32>
    %749 = math.tanh %748 : vector<8x32xf32>
    %750 = arith.mulf %746, %728 : vector<8x32xf32>
    %751 = arith.mulf %745, %749 : vector<8x32xf32>
    %752 = arith.addf %750, %751 : vector<8x32xf32>
    %753 = math.tanh %752 : vector<8x32xf32>
    %754 = arith.mulf %747, %753 : vector<8x32xf32>
    %755 = arith.index_cast %734 : i32 to index
    %c0_415 = arith.constant 0 : index
    %756 = vector.load %arg24[%755, %c0_415] : memref<64x32xf32, #tpu.memory_space<vmem>>, vector<8x32xf32>
    tpu.vector_store %arg24[%755, %c0_415], %754 {strides = array<i32>} : memref<64x32xf32, #tpu.memory_space<vmem>>, vector<8x32xf32>,
    %c3_i32_416 = arith.constant 3 : i32
    %c8_i32_417 = arith.constant 8 : i32
    %757 = arith.muli %c3_i32_416, %c8_i32_417 : i32
    %758 = tpu.assume_multiple %757, 8 : i32
    %cst_418 = arith.constant dense<0.000000e+00> : vector<8x128xf32>
    %759 = tpu.matmul %754, %625, %cst_418 {dimension_numbers = #tpu.dot_dimension_numbers<[1], [0], [0], [1], [0, 0, 1, 1], [], []>} : vector<8x32xf32>, vector<32x128xf32>, vector<8x128xf32> -> vector<8x128xf32>
    %760 = arith.index_cast %758 : i32 to index
    %c0_419 = arith.constant 0 : index
    %761 = vector.load %arg23[%760, %c0_419] : memref<64x128xf32, #tpu.memory_space<vmem>>, vector<8x128xf32>
    %762 = arith.addf %759, %761 : vector<8x128xf32>
    %763 = vector.extract_strided_slice %762 {offsets = [0, 0], sizes = [8, 96], strides = [1, 1]} : vector<8x128xf32> to vector<8x96xf32>
    %764 = arith.negf %763 : vector<8x96xf32>
    %765 = math.exp %764 : vector<8x96xf32>
    %cst_420 = arith.constant 1.000000e+00 : f32
    %766 = vector.broadcast %cst_420 : f32 to vector<8x96xf32>
    %767 = arith.addf %766, %765 : vector<8x96xf32>
    %768 = arith.divf %766, %767 : vector<8x96xf32>
    %769 = vector.extract_strided_slice %768 {offsets = [0, 0], sizes = [8, 32], strides = [1, 1]} : vector<8x96xf32> to vector<8x32xf32>
    %770 = vector.extract_strided_slice %768 {offsets = [0, 32], sizes = [8, 32], strides = [1, 1]} : vector<8x96xf32> to vector<8x32xf32>
    %771 = vector.extract_strided_slice %768 {offsets = [0, 64], sizes = [8, 32], strides = [1, 1]} : vector<8x96xf32> to vector<8x32xf32>
    %772 = vector.extract_strided_slice %762 {offsets = [0, 96], sizes = [8, 32], strides = [1, 1]} : vector<8x128xf32> to vector<8x32xf32>
    %773 = math.tanh %772 : vector<8x32xf32>
    %774 = arith.mulf %770, %752 : vector<8x32xf32>
    %775 = arith.mulf %769, %773 : vector<8x32xf32>
    %776 = arith.addf %774, %775 : vector<8x32xf32>
    %777 = math.tanh %776 : vector<8x32xf32>
    %778 = arith.mulf %771, %777 : vector<8x32xf32>
    %779 = arith.index_cast %758 : i32 to index
    %c0_421 = arith.constant 0 : index
    %780 = vector.load %arg24[%779, %c0_421] : memref<64x32xf32, #tpu.memory_space<vmem>>, vector<8x32xf32>
    tpu.vector_store %arg24[%779, %c0_421], %778 {strides = array<i32>} : memref<64x32xf32, #tpu.memory_space<vmem>>, vector<8x32xf32>,
    %c4_i32_422 = arith.constant 4 : i32
    %c8_i32_423 = arith.constant 8 : i32
    %781 = arith.muli %c4_i32_422, %c8_i32_423 : i32
    %782 = tpu.assume_multiple %781, 8 : i32
    %cst_424 = arith.constant dense<0.000000e+00> : vector<8x128xf32>
    %783 = tpu.matmul %778, %625, %cst_424 {dimension_numbers = #tpu.dot_dimension_numbers<[1], [0], [0], [1], [0, 0, 1, 1], [], []>} : vector<8x32xf32>, vector<32x128xf32>, vector<8x128xf32> -> vector<8x128xf32>
    %784 = arith.index_cast %782 : i32 to index
    %c0_425 = arith.constant 0 : index
    %785 = vector.load %arg23[%784, %c0_425] : memref<64x128xf32, #tpu.memory_space<vmem>>, vector<8x128xf32>
    %786 = arith.addf %783, %785 : vector<8x128xf32>
    %787 = vector.extract_strided_slice %786 {offsets = [0, 0], sizes = [8, 96], strides = [1, 1]} : vector<8x128xf32> to vector<8x96xf32>
    %788 = arith.negf %787 : vector<8x96xf32>
    %789 = math.exp %788 : vector<8x96xf32>
    %cst_426 = arith.constant 1.000000e+00 : f32
    %790 = vector.broadcast %cst_426 : f32 to vector<8x96xf32>
    %791 = arith.addf %790, %789 : vector<8x96xf32>
    %792 = arith.divf %790, %791 : vector<8x96xf32>
    %793 = vector.extract_strided_slice %792 {offsets = [0, 0], sizes = [8, 32], strides = [1, 1]} : vector<8x96xf32> to vector<8x32xf32>
    %794 = vector.extract_strided_slice %792 {offsets = [0, 32], sizes = [8, 32], strides = [1, 1]} : vector<8x96xf32> to vector<8x32xf32>
    %795 = vector.extract_strided_slice %792 {offsets = [0, 64], sizes = [8, 32], strides = [1, 1]} : vector<8x96xf32> to vector<8x32xf32>
    %796 = vector.extract_strided_slice %786 {offsets = [0, 96], sizes = [8, 32], strides = [1, 1]} : vector<8x128xf32> to vector<8x32xf32>
    %797 = math.tanh %796 : vector<8x32xf32>
    %798 = arith.mulf %794, %776 : vector<8x32xf32>
    %799 = arith.mulf %793, %797 : vector<8x32xf32>
    %800 = arith.addf %798, %799 : vector<8x32xf32>
    %801 = math.tanh %800 : vector<8x32xf32>
    %802 = arith.mulf %795, %801 : vector<8x32xf32>
    %803 = arith.index_cast %782 : i32 to index
    %c0_427 = arith.constant 0 : index
    %804 = vector.load %arg24[%803, %c0_427] : memref<64x32xf32, #tpu.memory_space<vmem>>, vector<8x32xf32>
    tpu.vector_store %arg24[%803, %c0_427], %802 {strides = array<i32>} : memref<64x32xf32, #tpu.memory_space<vmem>>, vector<8x32xf32>,
    %c5_i32_428 = arith.constant 5 : i32
    %c8_i32_429 = arith.constant 8 : i32
    %805 = arith.muli %c5_i32_428, %c8_i32_429 : i32
    %806 = tpu.assume_multiple %805, 8 : i32
    %cst_430 = arith.constant dense<0.000000e+00> : vector<8x128xf32>
    %807 = tpu.matmul %802, %625, %cst_430 {dimension_numbers = #tpu.dot_dimension_numbers<[1], [0], [0], [1], [0, 0, 1, 1], [], []>} : vector<8x32xf32>, vector<32x128xf32>, vector<8x128xf32> -> vector<8x128xf32>
    %808 = arith.index_cast %806 : i32 to index
    %c0_431 = arith.constant 0 : index
    %809 = vector.load %arg23[%808, %c0_431] : memref<64x128xf32, #tpu.memory_space<vmem>>, vector<8x128xf32>
    %810 = arith.addf %807, %809 : vector<8x128xf32>
    %811 = vector.extract_strided_slice %810 {offsets = [0, 0], sizes = [8, 96], strides = [1, 1]} : vector<8x128xf32> to vector<8x96xf32>
    %812 = arith.negf %811 : vector<8x96xf32>
    %813 = math.exp %812 : vector<8x96xf32>
    %cst_432 = arith.constant 1.000000e+00 : f32
    %814 = vector.broadcast %cst_432 : f32 to vector<8x96xf32>
    %815 = arith.addf %814, %813 : vector<8x96xf32>
    %816 = arith.divf %814, %815 : vector<8x96xf32>
    %817 = vector.extract_strided_slice %816 {offsets = [0, 0], sizes = [8, 32], strides = [1, 1]} : vector<8x96xf32> to vector<8x32xf32>
    %818 = vector.extract_strided_slice %816 {offsets = [0, 32], sizes = [8, 32], strides = [1, 1]} : vector<8x96xf32> to vector<8x32xf32>
    %819 = vector.extract_strided_slice %816 {offsets = [0, 64], sizes = [8, 32], strides = [1, 1]} : vector<8x96xf32> to vector<8x32xf32>
    %820 = vector.extract_strided_slice %810 {offsets = [0, 96], sizes = [8, 32], strides = [1, 1]} : vector<8x128xf32> to vector<8x32xf32>
    %821 = math.tanh %820 : vector<8x32xf32>
    %822 = arith.mulf %818, %800 : vector<8x32xf32>
    %823 = arith.mulf %817, %821 : vector<8x32xf32>
    %824 = arith.addf %822, %823 : vector<8x32xf32>
    %825 = math.tanh %824 : vector<8x32xf32>
    %826 = arith.mulf %819, %825 : vector<8x32xf32>
    %827 = arith.index_cast %806 : i32 to index
    %c0_433 = arith.constant 0 : index
    %828 = vector.load %arg24[%827, %c0_433] : memref<64x32xf32, #tpu.memory_space<vmem>>, vector<8x32xf32>
    tpu.vector_store %arg24[%827, %c0_433], %826 {strides = array<i32>} : memref<64x32xf32, #tpu.memory_space<vmem>>, vector<8x32xf32>,
    %c6_i32_434 = arith.constant 6 : i32
    %c8_i32_435 = arith.constant 8 : i32
    %829 = arith.muli %c6_i32_434, %c8_i32_435 : i32
    %830 = tpu.assume_multiple %829, 8 : i32
    %cst_436 = arith.constant dense<0.000000e+00> : vector<8x128xf32>
    %831 = tpu.matmul %826, %625, %cst_436 {dimension_numbers = #tpu.dot_dimension_numbers<[1], [0], [0], [1], [0, 0, 1, 1], [], []>} : vector<8x32xf32>, vector<32x128xf32>, vector<8x128xf32> -> vector<8x128xf32>
    %832 = arith.index_cast %830 : i32 to index
    %c0_437 = arith.constant 0 : index
    %833 = vector.load %arg23[%832, %c0_437] : memref<64x128xf32, #tpu.memory_space<vmem>>, vector<8x128xf32>
    %834 = arith.addf %831, %833 : vector<8x128xf32>
    %835 = vector.extract_strided_slice %834 {offsets = [0, 0], sizes = [8, 96], strides = [1, 1]} : vector<8x128xf32> to vector<8x96xf32>
    %836 = arith.negf %835 : vector<8x96xf32>
    %837 = math.exp %836 : vector<8x96xf32>
    %cst_438 = arith.constant 1.000000e+00 : f32
    %838 = vector.broadcast %cst_438 : f32 to vector<8x96xf32>
    %839 = arith.addf %838, %837 : vector<8x96xf32>
    %840 = arith.divf %838, %839 : vector<8x96xf32>
    %841 = vector.extract_strided_slice %840 {offsets = [0, 0], sizes = [8, 32], strides = [1, 1]} : vector<8x96xf32> to vector<8x32xf32>
    %842 = vector.extract_strided_slice %840 {offsets = [0, 32], sizes = [8, 32], strides = [1, 1]} : vector<8x96xf32> to vector<8x32xf32>
    %843 = vector.extract_strided_slice %840 {offsets = [0, 64], sizes = [8, 32], strides = [1, 1]} : vector<8x96xf32> to vector<8x32xf32>
    %844 = vector.extract_strided_slice %834 {offsets = [0, 96], sizes = [8, 32], strides = [1, 1]} : vector<8x128xf32> to vector<8x32xf32>
    %845 = math.tanh %844 : vector<8x32xf32>
    %846 = arith.mulf %842, %824 : vector<8x32xf32>
    %847 = arith.mulf %841, %845 : vector<8x32xf32>
    %848 = arith.addf %846, %847 : vector<8x32xf32>
    %849 = math.tanh %848 : vector<8x32xf32>
    %850 = arith.mulf %843, %849 : vector<8x32xf32>
    %851 = arith.index_cast %830 : i32 to index
    %c0_439 = arith.constant 0 : index
    %852 = vector.load %arg24[%851, %c0_439] : memref<64x32xf32, #tpu.memory_space<vmem>>, vector<8x32xf32>
    tpu.vector_store %arg24[%851, %c0_439], %850 {strides = array<i32>} : memref<64x32xf32, #tpu.memory_space<vmem>>, vector<8x32xf32>,
    %c7_i32_440 = arith.constant 7 : i32
    %c8_i32_441 = arith.constant 8 : i32
    %853 = arith.muli %c7_i32_440, %c8_i32_441 : i32
    %854 = tpu.assume_multiple %853, 8 : i32
    %cst_442 = arith.constant dense<0.000000e+00> : vector<8x128xf32>
    %855 = tpu.matmul %850, %625, %cst_442 {dimension_numbers = #tpu.dot_dimension_numbers<[1], [0], [0], [1], [0, 0, 1, 1], [], []>} : vector<8x32xf32>, vector<32x128xf32>, vector<8x128xf32> -> vector<8x128xf32>
    %856 = arith.index_cast %854 : i32 to index
    %c0_443 = arith.constant 0 : index
    %857 = vector.load %arg23[%856, %c0_443] : memref<64x128xf32, #tpu.memory_space<vmem>>, vector<8x128xf32>
    %858 = arith.addf %855, %857 : vector<8x128xf32>
    %859 = vector.extract_strided_slice %858 {offsets = [0, 0], sizes = [8, 96], strides = [1, 1]} : vector<8x128xf32> to vector<8x96xf32>
    %860 = arith.negf %859 : vector<8x96xf32>
    %861 = math.exp %860 : vector<8x96xf32>
    %cst_444 = arith.constant 1.000000e+00 : f32
    %862 = vector.broadcast %cst_444 : f32 to vector<8x96xf32>
    %863 = arith.addf %862, %861 : vector<8x96xf32>
    %864 = arith.divf %862, %863 : vector<8x96xf32>
    %865 = vector.extract_strided_slice %864 {offsets = [0, 0], sizes = [8, 32], strides = [1, 1]} : vector<8x96xf32> to vector<8x32xf32>
    %866 = vector.extract_strided_slice %864 {offsets = [0, 32], sizes = [8, 32], strides = [1, 1]} : vector<8x96xf32> to vector<8x32xf32>
    %867 = vector.extract_strided_slice %864 {offsets = [0, 64], sizes = [8, 32], strides = [1, 1]} : vector<8x96xf32> to vector<8x32xf32>
    %868 = vector.extract_strided_slice %858 {offsets = [0, 96], sizes = [8, 32], strides = [1, 1]} : vector<8x128xf32> to vector<8x32xf32>
    %869 = math.tanh %868 : vector<8x32xf32>
    %870 = arith.mulf %866, %848 : vector<8x32xf32>
    %871 = arith.mulf %865, %869 : vector<8x32xf32>
    %872 = arith.addf %870, %871 : vector<8x32xf32>
    %873 = math.tanh %872 : vector<8x32xf32>
    %874 = arith.mulf %867, %873 : vector<8x32xf32>
    %875 = arith.index_cast %854 : i32 to index
    %c0_445 = arith.constant 0 : index
    %876 = vector.load %arg24[%875, %c0_445] : memref<64x32xf32, #tpu.memory_space<vmem>>, vector<8x32xf32>
    tpu.vector_store %arg24[%875, %c0_445], %874 {strides = array<i32>} : memref<64x32xf32, #tpu.memory_space<vmem>>, vector<8x32xf32>,
    %c8_i32_446 = arith.constant 8 : i32
    %877 = tpu.iota {dimensions = array<i32: 1>} : vector<8x32xi32>
    %c16_i32_447 = arith.constant 16 : i32
    %878 = vector.broadcast %c16_i32_447 : i32 to vector<8x32xi32>
    %879 = arith.cmpi slt, %877, %878 : vector<8x32xi32>
    %c0_448 = arith.constant 0 : index
    %c0_449 = arith.constant 0 : index
    %880 = vector.load %arg24[%c0_448, %c0_449] : memref<64x32xf32, #tpu.memory_space<vmem>>, vector<8x32xf32>
    %c56_450 = arith.constant 56 : index
    %c0_451 = arith.constant 0 : index
    %881 = vector.load %arg24[%c56_450, %c0_451] : memref<64x32xf32, #tpu.memory_space<vmem>>, vector<8x32xf32>
    %882 = arith.select %879, %880, %881 : vector<8x32xi1>, vector<8x32xf32>
    %c0_452 = arith.constant 0 : index
    %c0_453 = arith.constant 0 : index
    %883 = vector.load %arg25[%c0_452, %c0_453] : memref<64x32xf32, #tpu.memory_space<vmem>>, vector<8x32xf32>
    tpu.vector_store %arg25[%c0_452, %c0_453], %882 {strides = array<i32>} : memref<64x32xf32, #tpu.memory_space<vmem>>, vector<8x32xf32>,
    %c8_454 = arith.constant 8 : index
    %c0_455 = arith.constant 0 : index
    %884 = vector.load %arg24[%c8_454, %c0_455] : memref<64x32xf32, #tpu.memory_space<vmem>>, vector<8x32xf32>
    %c48_456 = arith.constant 48 : index
    %c0_457 = arith.constant 0 : index
    %885 = vector.load %arg24[%c48_456, %c0_457] : memref<64x32xf32, #tpu.memory_space<vmem>>, vector<8x32xf32>
    %886 = arith.select %879, %884, %885 : vector<8x32xi1>, vector<8x32xf32>
    %c8_458 = arith.constant 8 : index
    %c0_459 = arith.constant 0 : index
    %887 = vector.load %arg25[%c8_458, %c0_459] : memref<64x32xf32, #tpu.memory_space<vmem>>, vector<8x32xf32>
    tpu.vector_store %arg25[%c8_458, %c0_459], %886 {strides = array<i32>} : memref<64x32xf32, #tpu.memory_space<vmem>>, vector<8x32xf32>,
    %c16_460 = arith.constant 16 : index
    %c0_461 = arith.constant 0 : index
    %888 = vector.load %arg24[%c16_460, %c0_461] : memref<64x32xf32, #tpu.memory_space<vmem>>, vector<8x32xf32>
    %c40_462 = arith.constant 40 : index
    %c0_463 = arith.constant 0 : index
    %889 = vector.load %arg24[%c40_462, %c0_463] : memref<64x32xf32, #tpu.memory_space<vmem>>, vector<8x32xf32>
    %890 = arith.select %879, %888, %889 : vector<8x32xi1>, vector<8x32xf32>
    %c16_464 = arith.constant 16 : index
    %c0_465 = arith.constant 0 : index
    %891 = vector.load %arg25[%c16_464, %c0_465] : memref<64x32xf32, #tpu.memory_space<vmem>>, vector<8x32xf32>
    tpu.vector_store %arg25[%c16_464, %c0_465], %890 {strides = array<i32>} : memref<64x32xf32, #tpu.memory_space<vmem>>, vector<8x32xf32>,
    %c24_466 = arith.constant 24 : index
    %c0_467 = arith.constant 0 : index
    %892 = vector.load %arg24[%c24_466, %c0_467] : memref<64x32xf32, #tpu.memory_space<vmem>>, vector<8x32xf32>
    %c32_468 = arith.constant 32 : index
    %c0_469 = arith.constant 0 : index
    %893 = vector.load %arg24[%c32_468, %c0_469] : memref<64x32xf32, #tpu.memory_space<vmem>>, vector<8x32xf32>
    %894 = arith.select %879, %892, %893 : vector<8x32xi1>, vector<8x32xf32>
    %c24_470 = arith.constant 24 : index
    %c0_471 = arith.constant 0 : index
    %895 = vector.load %arg25[%c24_470, %c0_471] : memref<64x32xf32, #tpu.memory_space<vmem>>, vector<8x32xf32>
    tpu.vector_store %arg25[%c24_470, %c0_471], %894 {strides = array<i32>} : memref<64x32xf32, #tpu.memory_space<vmem>>, vector<8x32xf32>,
    %c32_472 = arith.constant 32 : index
    %c0_473 = arith.constant 0 : index
    %896 = vector.load %arg24[%c32_472, %c0_473] : memref<64x32xf32, #tpu.memory_space<vmem>>, vector<8x32xf32>
    %c24_474 = arith.constant 24 : index
    %c0_475 = arith.constant 0 : index
    %897 = vector.load %arg24[%c24_474, %c0_475] : memref<64x32xf32, #tpu.memory_space<vmem>>, vector<8x32xf32>
    %898 = arith.select %879, %896, %897 : vector<8x32xi1>, vector<8x32xf32>
    %c32_476 = arith.constant 32 : index
    %c0_477 = arith.constant 0 : index
    %899 = vector.load %arg25[%c32_476, %c0_477] : memref<64x32xf32, #tpu.memory_space<vmem>>, vector<8x32xf32>
    tpu.vector_store %arg25[%c32_476, %c0_477], %898 {strides = array<i32>} : memref<64x32xf32, #tpu.memory_space<vmem>>, vector<8x32xf32>,
    %c40_478 = arith.constant 40 : index
    %c0_479 = arith.constant 0 : index
    %900 = vector.load %arg24[%c40_478, %c0_479] : memref<64x32xf32, #tpu.memory_space<vmem>>, vector<8x32xf32>
    %c16_480 = arith.constant 16 : index
    %c0_481 = arith.constant 0 : index
    %901 = vector.load %arg24[%c16_480, %c0_481] : memref<64x32xf32, #tpu.memory_space<vmem>>, vector<8x32xf32>
    %902 = arith.select %879, %900, %901 : vector<8x32xi1>, vector<8x32xf32>
    %c40_482 = arith.constant 40 : index
    %c0_483 = arith.constant 0 : index
    %903 = vector.load %arg25[%c40_482, %c0_483] : memref<64x32xf32, #tpu.memory_space<vmem>>, vector<8x32xf32>
    tpu.vector_store %arg25[%c40_482, %c0_483], %902 {strides = array<i32>} : memref<64x32xf32, #tpu.memory_space<vmem>>, vector<8x32xf32>,
    %c48_484 = arith.constant 48 : index
    %c0_485 = arith.constant 0 : index
    %904 = vector.load %arg24[%c48_484, %c0_485] : memref<64x32xf32, #tpu.memory_space<vmem>>, vector<8x32xf32>
    %c8_486 = arith.constant 8 : index
    %c0_487 = arith.constant 0 : index
    %905 = vector.load %arg24[%c8_486, %c0_487] : memref<64x32xf32, #tpu.memory_space<vmem>>, vector<8x32xf32>
    %906 = arith.select %879, %904, %905 : vector<8x32xi1>, vector<8x32xf32>
    %c48_488 = arith.constant 48 : index
    %c0_489 = arith.constant 0 : index
    %907 = vector.load %arg25[%c48_488, %c0_489] : memref<64x32xf32, #tpu.memory_space<vmem>>, vector<8x32xf32>
    tpu.vector_store %arg25[%c48_488, %c0_489], %906 {strides = array<i32>} : memref<64x32xf32, #tpu.memory_space<vmem>>, vector<8x32xf32>,
    %c56_490 = arith.constant 56 : index
    %c0_491 = arith.constant 0 : index
    %908 = vector.load %arg24[%c56_490, %c0_491] : memref<64x32xf32, #tpu.memory_space<vmem>>, vector<8x32xf32>
    %c0_492 = arith.constant 0 : index
    %c0_493 = arith.constant 0 : index
    %909 = vector.load %arg24[%c0_492, %c0_493] : memref<64x32xf32, #tpu.memory_space<vmem>>, vector<8x32xf32>
    %910 = arith.select %879, %908, %909 : vector<8x32xi1>, vector<8x32xf32>
    %c56_494 = arith.constant 56 : index
    %c0_495 = arith.constant 0 : index
    %911 = vector.load %arg25[%c56_494, %c0_495] : memref<64x32xf32, #tpu.memory_space<vmem>>, vector<8x32xf32>
    tpu.vector_store %arg25[%c56_494, %c0_495], %910 {strides = array<i32>} : memref<64x32xf32, #tpu.memory_space<vmem>>, vector<8x32xf32>,
    %c0_496 = arith.constant 0 : index
    %c0_497 = arith.constant 0 : index
    %912 = vector.load %arg25[%c0_496, %c0_497] : memref<64x32xf32, #tpu.memory_space<vmem>>, vector<64x32xf32>
    %cst_498 = arith.constant dense<0.000000e+00> : vector<64xf32>
    %913 = vector.multi_reduction <add>, %912, %cst_498 [1] : vector<64x32xf32> to vector<64xf32>
    %914 = vector.shape_cast %913 : vector<64xf32> to vector<64x1xf32>
    %915 = arith.mulf %912, %912 : vector<64x32xf32>
    %cst_499 = arith.constant dense<0.000000e+00> : vector<64xf32>
    %916 = vector.multi_reduction <add>, %915, %cst_499 [1] : vector<64x32xf32> to vector<64xf32>
    %917 = vector.shape_cast %916 : vector<64xf32> to vector<64x1xf32>
    %cst_500 = arith.constant 3.125000e-02 : f32
    %918 = vector.broadcast %cst_500 : f32 to vector<64x1xf32>
    %919 = arith.mulf %914, %918 : vector<64x1xf32>
    %cst_501 = arith.constant 3.125000e-02 : f32
    %920 = vector.broadcast %cst_501 : f32 to vector<64x1xf32>
    %921 = arith.mulf %917, %920 : vector<64x1xf32>
    %922 = arith.mulf %919, %919 : vector<64x1xf32>
    %923 = arith.subf %921, %922 : vector<64x1xf32>
    %924 = vector.broadcast %919 : vector<64x1xf32> to vector<64x32xf32>
    %925 = arith.subf %912, %924 : vector<64x32xf32>
    %cst_502 = arith.constant 9.99999974E-6 : f32
    %926 = vector.broadcast %cst_502 : f32 to vector<64x1xf32>
    %927 = arith.addf %923, %926 : vector<64x1xf32>
    %928 = math.rsqrt %927 : vector<64x1xf32>
    %929 = vector.broadcast %928 : vector<64x1xf32> to vector<64x32xf32>
    %930 = arith.mulf %925, %929 : vector<64x32xf32>
    %c0_503 = arith.constant 0 : index
    %c0_504 = arith.constant 0 : index
    %931 = vector.load %arg15[%c0_503, %c0_504] : memref<1x32xf32, #tpu.memory_space<vmem>>, vector<1x32xf32>
    %932 = vector.broadcast %931 : vector<1x32xf32> to vector<64x32xf32>
    %933 = arith.mulf %930, %932 : vector<64x32xf32>
    %c0_505 = arith.constant 0 : index
    %c0_506 = arith.constant 0 : index
    %934 = vector.load %arg16[%c0_505, %c0_506] : memref<1x32xf32, #tpu.memory_space<vmem>>, vector<1x32xf32>
    %935 = vector.broadcast %934 : vector<1x32xf32> to vector<64x32xf32>
    %936 = arith.addf %933, %935 : vector<64x32xf32>
    %937 = vector.extract_strided_slice %936 {offsets = [56, 0], sizes = [8, 32], strides = [1, 1]} : vector<64x32xf32> to vector<8x32xf32>
    %c0_507 = arith.constant 0 : index
    %c0_508 = arith.constant 0 : index
    %938 = vector.load %arg17[%c0_507, %c0_508] : memref<32x32xf32, #tpu.memory_space<vmem>>, vector<32x32xf32>
    %cst_509 = arith.constant dense<0.000000e+00> : vector<8x32xf32>
    %939 = tpu.matmul %937, %938, %cst_509 {dimension_numbers = #tpu.dot_dimension_numbers<[1], [0], [0], [1], [0, 0, 1, 1], [], []>} : vector<8x32xf32>, vector<32x32xf32>, vector<8x32xf32> -> vector<8x32xf32>
    %c0_510 = arith.constant 0 : index
    %c0_511 = arith.constant 0 : index
    %940 = vector.load %arg18[%c0_510, %c0_511] : memref<1x32xf32, #tpu.memory_space<vmem>>, vector<1x32xf32>
    %941 = vector.broadcast %940 : vector<1x32xf32> to vector<8x32xf32>
    %942 = arith.addf %939, %941 : vector<8x32xf32>
    %cst_512 = arith.constant 0.000000e+00 : f32
    %943 = vector.broadcast %cst_512 : f32 to vector<8x32xf32>
    %944 = arith.maximumf %942, %943 : vector<8x32xf32>
    %c0_513 = arith.constant 0 : index
    %c0_514 = arith.constant 0 : index
    %945 = vector.load %arg19[%c0_513, %c0_514] : memref<32x1xf32, #tpu.memory_space<vmem>>, vector<32x1xf32>
    %cst_515 = arith.constant dense<0.000000e+00> : vector<8x1xf32>
    %946 = tpu.matmul %944, %945, %cst_515 {dimension_numbers = #tpu.dot_dimension_numbers<[1], [0], [0], [1], [0, 0, 1, 1], [], []>} : vector<8x32xf32>, vector<32x1xf32>, vector<8x1xf32> -> vector<8x1xf32>
    %c0_516 = arith.constant 0 : index
    %c0_517 = arith.constant 0 : index
    %947 = vector.load %arg20[%c0_516, %c0_517] : memref<1x1xf32, #tpu.memory_space<vmem>>, vector<1x1xf32>
    %948 = vector.broadcast %947 : vector<1x1xf32> to vector<8x1xf32>
    %949 = arith.addf %946, %948 : vector<8x1xf32>
    %950 = arith.negf %949 : vector<8x1xf32>
    %951 = math.exp %950 : vector<8x1xf32>
    %cst_518 = arith.constant 1.000000e+00 : f32
    %952 = vector.broadcast %cst_518 : f32 to vector<8x1xf32>
    %953 = arith.addf %952, %951 : vector<8x1xf32>
    %954 = arith.divf %952, %953 : vector<8x1xf32>
    %c0_519 = arith.constant 0 : index
    %c0_520 = arith.constant 0 : index
    %955 = vector.load %arg21[%c0_519, %c0_520] : memref<8x1xf32, #tpu.memory_space<vmem>>, vector<8x1xf32>
    tpu.vector_store %arg21[%c0_519, %c0_520], %954 {strides = array<i32>} : memref<8x1xf32, #tpu.memory_space<vmem>>, vector<8x1xf32>,
    return
  }
  func.func @transform_0(%arg0: i32) -> (i32, i32) {
    %c0_i32 = arith.constant 0 : i32
    %c0_i32_0 = arith.constant 0 : i32
    %c0_i32_1 = arith.constant 0 : i32
    return %c0_i32, %c0_i32_0 : i32, i32
  }
  func.func @transform_1(%arg0: i32) -> (i32, i32) {
    %c0_i32 = arith.constant 0 : i32
    %c0_i32_0 = arith.constant 0 : i32
    %c0_i32_1 = arith.constant 0 : i32
    return %c0_i32, %c0_i32_0 : i32, i32
  }
  func.func @transform_2(%arg0: i32) -> (i32, i32) {
    %c0_i32 = arith.constant 0 : i32
    %c0_i32_0 = arith.constant 0 : i32
    %c0_i32_1 = arith.constant 0 : i32
    return %c0_i32, %c0_i32_0 : i32, i32
  }
  func.func @transform_3(%arg0: i32) -> (i32, i32) {
    %c0_i32 = arith.constant 0 : i32
    %c0_i32_0 = arith.constant 0 : i32
    %c0_i32_1 = arith.constant 0 : i32
    return %c0_i32, %c0_i32_0 : i32, i32
  }
  func.func @transform_4(%arg0: i32) -> (i32, i32) {
    %c0_i32 = arith.constant 0 : i32
    %c0_i32_0 = arith.constant 0 : i32
    %c0_i32_1 = arith.constant 0 : i32
    return %c0_i32, %c0_i32_0 : i32, i32
  }
  func.func @transform_5(%arg0: i32) -> (i32, i32) {
    %c0_i32 = arith.constant 0 : i32
    %c0_i32_0 = arith.constant 0 : i32
    %c0_i32_1 = arith.constant 0 : i32
    return %c0_i32, %c0_i32_0 : i32, i32
  }
  func.func @transform_6(%arg0: i32) -> (i32, i32) {
    %c0_i32 = arith.constant 0 : i32
    %c0_i32_0 = arith.constant 0 : i32
    %c0_i32_1 = arith.constant 0 : i32
    return %c0_i32, %c0_i32_0 : i32, i32
  }
  func.func @transform_7(%arg0: i32) -> (i32, i32) {
    %c0_i32 = arith.constant 0 : i32
    %c0_i32_0 = arith.constant 0 : i32
    %c0_i32_1 = arith.constant 0 : i32
    return %c0_i32, %c0_i32_0 : i32, i32
  }
  func.func @transform_8(%arg0: i32) -> (i32, i32) {
    %c0_i32 = arith.constant 0 : i32
    %c0_i32_0 = arith.constant 0 : i32
    %c0_i32_1 = arith.constant 0 : i32
    return %c0_i32, %c0_i32_0 : i32, i32
  }
  func.func @transform_9(%arg0: i32) -> (i32, i32) {
    %c0_i32 = arith.constant 0 : i32
    %c0_i32_0 = arith.constant 0 : i32
    %c0_i32_1 = arith.constant 0 : i32
    return %c0_i32, %c0_i32_0 : i32, i32
  }
  func.func @transform_10(%arg0: i32) -> (i32, i32) {
    %c0_i32 = arith.constant 0 : i32
    %c0_i32_0 = arith.constant 0 : i32
    %c0_i32_1 = arith.constant 0 : i32
    return %c0_i32, %c0_i32_0 : i32, i32
  }
  func.func @transform_11(%arg0: i32) -> (i32, i32) {
    %c0_i32 = arith.constant 0 : i32
    %c0_i32_0 = arith.constant 0 : i32
    %c0_i32_1 = arith.constant 0 : i32
    return %c0_i32, %c0_i32_0 : i32, i32
  }
  func.func @transform_12(%arg0: i32) -> (i32, i32) {
    %c0_i32 = arith.constant 0 : i32
    %c0_i32_0 = arith.constant 0 : i32
    %c0_i32_1 = arith.constant 0 : i32
    return %c0_i32, %c0_i32_0 : i32, i32
  }
  func.func @transform_13(%arg0: i32) -> (i32, i32) {
    %c0_i32 = arith.constant 0 : i32
    %c0_i32_0 = arith.constant 0 : i32
    %c0_i32_1 = arith.constant 0 : i32
    return %c0_i32, %c0_i32_0 : i32, i32
  }
  func.func @transform_14(%arg0: i32) -> (i32, i32) {
    %c0_i32 = arith.constant 0 : i32
    %c0_i32_0 = arith.constant 0 : i32
    %c0_i32_1 = arith.constant 0 : i32
    return %c0_i32, %c0_i32_0 : i32, i32
  }
  func.func @transform_15(%arg0: i32) -> (i32, i32) {
    %c0_i32 = arith.constant 0 : i32
    %c0_i32_0 = arith.constant 0 : i32
    %c0_i32_1 = arith.constant 0 : i32
    return %c0_i32, %c0_i32_0 : i32, i32
  }
  func.func @transform_16(%arg0: i32) -> (i32, i32) {
    %c0_i32 = arith.constant 0 : i32
    %c0_i32_0 = arith.constant 0 : i32
    %c0_i32_1 = arith.constant 0 : i32
    return %c0_i32, %c0_i32_0 : i32, i32
  }
  func.func @transform_17(%arg0: i32) -> (i32, i32) {
    %c0_i32 = arith.constant 0 : i32
    %c0_i32_0 = arith.constant 0 : i32
    %c0_i32_1 = arith.constant 0 : i32
    return %c0_i32, %c0_i32_0 : i32, i32
  }
  func.func @transform_18(%arg0: i32) -> (i32, i32) {
    %c0_i32 = arith.constant 0 : i32
    %c0_i32_0 = arith.constant 0 : i32
    %c0_i32_1 = arith.constant 0 : i32
    return %c0_i32, %c0_i32_0 : i32, i32
  }
  func.func @transform_19(%arg0: i32) -> (i32, i32) {
    %c0_i32 = arith.constant 0 : i32
    %c0_i32_0 = arith.constant 0 : i32
    %c0_i32_1 = arith.constant 0 : i32
    return %c0_i32, %c0_i32_0 : i32, i32
  }
  func.func @transform_20(%arg0: i32) -> (i32, i32) {
    %c0_i32 = arith.constant 0 : i32
    %c0_i32_0 = arith.constant 0 : i32
    %c0_i32_1 = arith.constant 0 : i32
    return %c0_i32, %c0_i32_0 : i32, i32
  }
}

</mosaic_0001>

<bundles_post_ra>
// kernel: tpu_custom_call.1
= control target key start
LH: loop header
LB: loop body
LE: loop exit
PB: predicated region body
PF: predicated region fallthrough
CT: control target
= control target key end

     0   :  { %s4266_s0 = inlined_call_operand.vmem [shape: f32[64,16], index: 0, kind: input, shape index: {}]   ;;  %s4267_s1 = inlined_call_operand.hbm [shape: f32[16,128], index: 1, kind: input, shape index: {}]   ;;  %s4268_s2 = inlined_call_operand.vmem [shape: f32[1,128], index: 2, kind: input, shape index: {}]   ;;  %s4269_s3 = inlined_call_operand.vmem [shape: f32[32,128], index: 3, kind: input, shape index: {}]   ;;  %s4270_s4 = inlined_call_operand.vmem [shape: f32[1,32], index: 4, kind: input, shape index: {}]   ;;  %s4271_s5 = inlined_call_operand.vmem [shape: f32[1,32], index: 5, kind: input, shape index: {}]   ;;  %s4272_s6 = inlined_call_operand.vmem [shape: f32[32,128], index: 6, kind: input, shape index: {}]   ;;  %s4273_s7 = inlined_call_operand.vmem [shape: f32[1,128], index: 7, kind: input, shape index: {}]   ;;  %s4274_s8 = inlined_call_operand.vmem [shape: f32[32,128], index: 8, kind: input, shape index: {}]   ;;  %s4275_s9 = inlined_call_operand.vmem [shape: f32[1,32], index: 9, kind: input, shape index: {}]   ;;  %s4276_s10 = inlined_call_operand.vmem [shape: f32[1,32], index: 10, kind: input, shape index: {}]   ;;  %s4277_s11 = inlined_call_operand.hbm [shape: f32[32,128], index: 11, kind: input, shape index: {}]   ;;  %s4278_s12 = inlined_call_operand.vmem [shape: f32[1,128], index: 12, kind: input, shape index: {}]   ;;  %s4279_s13 = inlined_call_operand.hbm [shape: f32[32,128], index: 13, kind: input, shape index: {}]   ;;  %s4280_s14 = inlined_call_operand.vmem [shape: f32[1,32], index: 14, kind: input, shape index: {}]   ;;  %s4281_s15 = inlined_call_operand.vmem [shape: f32[1,32], index: 15, kind: input, shape index: {}]   ;;  %s4282_s16 = inlined_call_operand.hbm [shape: f32[32,32], index: 16, kind: input, shape index: {}]   ;;  %s4283_s17 = inlined_call_operand.vmem [shape: f32[1,32], index: 17, kind: input, shape index: {}]   ;;  %s4284_s18 = inlined_call_operand.vmem [shape: f32[32,1], index: 18, kind: input, shape index: {}]   ;;  %s4285_s19 = inlined_call_operand.<no memory space> [shape: f32[1,1], index: 19, kind: input, shape index: {}]   ;;  %s4286_s20 = inlined_call_operand.vmem [shape: f32[8,1], index: 20, kind: output, shape index: {}]  }
   0x1   :  { %4289 = sst [smem:[#allocation17_spill]] %s4266_s0  ;;  %v25_v0 = vstv %s4285_s19 }
   0x2   :  { %4290 = sst [smem:[#allocation18_spill]] %s4267_s1  ;;  %26 = vst [vmem:[#allocation6] sm:$0x1] %v25_v0 }
   0x3   :  { %4291 = sst [smem:[#allocation19_spill]] %s4268_s2 }
   0x4   :  { %4292 = sst [smem:[#allocation20_spill]] %s4269_s3 }
   0x5   :  { %4293 = sst [smem:[#allocation21_spill]] %s4270_s4 }
   0x6   :  { %27 = vsyncpa [#allocation8], 0 }
   0x7   :  { %28 = vsyncpa [#allocation10], 0 }
   0x8   :  { %29 = vsyncpa [#allocation13], 0  ;;  %s67_s2 = sshll.u32 %s4277_s11, 4  ;;  %s3174_s25 = smov [#allocation9]   ;;  %s68_s2 = int_to_ptr.hbm [resolvable:$true] %s67_s2 }
   0x9   :  { %s69_s3 = sshll.u32 %s3174_s25, 4  ;;  %s4294_s28 = sld [smem:[#allocation18_spill]]  ;;  %s70_s3 = int_to_ptr.vmem [resolvable:$true] %s69_s3 }
   0xa   :  { %s3175_s29 = smov 128   ;;  %s3176_s30 = smov 8  }
   0xb   :  { %75 = dma.hbm_to_vmem [thread:$0]  %s68_s2, 512, %s70_s3, [#allocation10], %s3175_s29, %s3175_s29, %s3176_s30  }
   0xc   :  { %s3177_s19 = smov [#allocation7]   ;;  %s82_s22 = sshll.u32 %s4279_s13, 4  ;;  %s83_s22 = int_to_ptr.hbm [resolvable:$true] %s82_s22 }
   0xd   :  { %s38_s0 = sshll.u32 %s3177_s19, 4  ;;  %s99_s24 = sshll.u32 %s4282_s16, 4  ;;  %s39_s0 = int_to_ptr.vmem [resolvable:$true] %s38_s0  ;;  %s100_s24 = int_to_ptr.hbm [resolvable:$true] %s99_s24 }
   0xe   :  { %s3178_s25 = smov [#allocation11]   ;;  %s3179_s2 = smov [#allocation12]  }
   0xf   :  { %s36_s4 = sshll.u32 %s4294_s28, 4  ;;  %s84_s26 = sshll.u32 %s3178_s25, 4  ;;  %s37_s4 = int_to_ptr.hbm [resolvable:$true] %s36_s4  ;;  %s85_s26 = int_to_ptr.vmem [resolvable:$true] %s84_s26 }
  0x10   :  { %44 = dma.hbm_to_vmem [thread:$0]  %s37_s4, 256, %s39_s0, [#allocation8], %s3175_s29, %s3175_s29, %s3176_s30  }
  0x11   :  { %90 = dma.hbm_to_vmem [thread:$0]  %s83_s22, 512, %s85_s26, [#allocation10], %s3175_s29, %s3175_s29, %s3176_s30  }
  0x12   :  { %s101_s3 = sshll.u32 %s3179_s2, 4  ;;  %s102_s3 = int_to_ptr.vmem [resolvable:$true] %s101_s3 }
  0x13   :  { %107 = dma.hbm_to_vmem [thread:$0]  %s100_s24, 512, %s102_s3, [#allocation13], %s3175_s29, %s3175_s29, %s3176_s30  }
  0x14   :  { %3168 = dma.done.wait [#allocation8], 256  }
  0x15   :  { %3169 = vsyncadd [#allocation8], 4294967040 }
  0x16   :  { %3170 = dma.done.wait [#allocation10], 1024  }
  0x17   :  { %3171 = vsyncadd [#allocation10], 4294966272 }
  0x18   :  { %3172 = dma.done.wait [#allocation13], 512  }
  0x19   :  { %3173 = vsyncadd [#allocation13], 4294966784  ;;  %v143_v1 = vld [vmem:[#allocation7 + $0x8] sm:$0xff]  ;;  %v142_v2 = vld [vmem:[#allocation7] sm:$0xff]  ;;  %s4295_s27 = sld [smem:[#allocation17_spill]]  ;;  %vm148_vm0 = vcmask 130048   ;;  %v222_v22 = vlaneseq }
  0x1a   :  { %187 = vmatpush.msra.mxu0 %v143_v1  ;;  %s4296_s19 = sld [smem:[#allocation20_spill]]  ;;  %v3180_v15 = vmov 0.0   ;;  %s3182_s22 = smov 64   ;;  %vm270_vm6 = vcmask 261120  }
  0x1b   :  { %s4297_s1 = sld [smem:[#allocation19_spill]]  ;;  %v3391_v24 = vand.u32 127, %v222_v22 }
  0x1c   :  { %188 = vmatpush.msra.mxu0 %v142_v2  ;;  %s4300_s28 = sld [smem:[#allocation21_spill]] }
  0x1d   :  { %v228_v26 = vand.u32 31, %v3391_v24 }
  0x1f   :  { %v130_v3 = vld [vmem:[%s4295_s27] sm:$0xff]  ;;  %v131_v7 = vld [vmem:[%s4295_s27 + $0x8] sm:$0xff]  ;;  %v132_v8 = vld [vmem:[%s4295_s27 + $0x10] sm:$0xff]  ;;  %vm3396_vm1 = vcmp.lt.s32.totalorder %v228_v26, 16 }
  0x20   :  { %v3309_v4 = vld [vmem:[%s4296_s19 + $0x18] sm:$0xff]  ;;  %v3314_v5 = vld [vmem:[%s4296_s19 + $0x10] sm:$0xff]  ;;  %2746 = vmatmul.msk.f32.vlgmr.msra.gmra.mxu0 %vm148_vm0, %v130_v3  ;;  %v3323_v6 = vld [vmem:[%s4296_s19 + $0x8] sm:$0xff] }
  0x21   :  { %352 = vmatpush.msra.mxu2 %v3309_v4  ;;  %419 = vmatpush.msra.mxu3 %v3309_v4  ;;  %v3345_v9 = vld [vmem:[%s4296_s19] sm:$0xff]  ;;  %v133_v10 = vld [vmem:[%s4295_s27 + $0x18] sm:$0xff]  ;;  %v135_v12 = vld [vmem:[%s4295_s27 + $0x28] sm:$0xff] }
  0x22   :  { %486 = vmatpush.msra.mxu1 %v3309_v4  ;;  %286 = vmatpush.msrb.mxu0 %v3309_v4  ;;  %v134_v11 = vld [vmem:[%s4295_s27 + $0x20] sm:$0xff]  ;;  %v136_v13 = vld [vmem:[%s4295_s27 + $0x30] sm:$0xff]  ;;  %v137_v14 = vld [vmem:[%s4295_s27 + $0x38] sm:$0xff]  ;;  %s3181_s27 = smov 32  }
  0x23   :  { %353 = vmatpush.msra.mxu2 %v3314_v5  ;;  %420 = vmatpush.msra.mxu3 %v3314_v5  ;;  %v2831_v17 = vld [vmem:[%s4297_s1] ss:$0 sm:$0xff] }
  0x24   :  { %487 = vmatpush.msra.mxu1 %v3314_v5  ;;  %287 = vmatpush.msrb.mxu0 %v3314_v5 }
  0x25   :  { %354 = vmatpush.msra.mxu2 %v3323_v6  ;;  %421 = vmatpush.msra.mxu3 %v3323_v6 }
  0x26   :  { %488 = vmatpush.msra.mxu1 %v3323_v6  ;;  %288 = vmatpush.msrb.mxu0 %v3323_v6 }
  0x27   :  { %355 = vmatpush.msra.mxu2 %v3345_v9  ;;  %422 = vmatpush.msra.mxu3 %v3345_v9 }
  0x28   :  { %2747 = vmatmul.msk.f32.gmra.mxu0 %vm148_vm0, %v131_v7  ;;  %489 = vmatpush.msra.mxu1 %v3345_v9 }
  0x29   :  { %289 = vmatpush.msrb.mxu0 %v3345_v9  ;;  %553 = vmatpush.msrb.mxu2 %v3309_v4 }
  0x2a   :  { %620 = vmatpush.msrb.mxu3 %v3309_v4  ;;  %687 = vmatpush.msrb.mxu1 %v3309_v4 }
  0x2b   :  { %554 = vmatpush.msrb.mxu2 %v3314_v5 }
  0x2c   :  { %621 = vmatpush.msrb.mxu3 %v3314_v5  ;;  %688 = vmatpush.msrb.mxu1 %v3314_v5 }
  0x2d   :  { %555 = vmatpush.msrb.mxu2 %v3323_v6 }
  0x2e   :  { %622 = vmatpush.msrb.mxu3 %v3323_v6  ;;  %689 = vmatpush.msrb.mxu1 %v3323_v6 }
  0x2f   :  { %556 = vmatpush.msrb.mxu2 %v3345_v9 }
  0x30   :  { %2748 = vmatmul.msk.f32.gmra.mxu0 %vm148_vm0, %v132_v8  ;;  %623 = vmatpush.msrb.mxu3 %v3345_v9 }
  0x31   :  { %690 = vmatpush.msrb.mxu1 %v3345_v9 }
  0x38   :  { %2749 = vmatmul.msk.f32.gmra.mxu0 %vm148_vm0, %v133_v10 }
  0x40   :  { %2750 = vmatmul.msk.f32.gmra.mxu0 %vm148_vm0, %v134_v11 }
  0x48   :  { %2751 = vmatmul.msk.f32.gmra.mxu0 %vm148_vm0, %v135_v12 }
  0x50   :  { %2752 = vmatmul.msk.f32.gmra.mxu0 %vm148_vm0, %v136_v13 }
  0x58   :  { %2753 = vmatmul.msk.f32.gmra.mxu0 %vm148_vm0, %v137_v14 }
  0x60   :  { %290 = vmatmul.f32.vlgmr.msrb.gmra.mxu0 %v3180_v15 }
  0x9d   :  { %v190_v16 = vpop.f32.mrf.mxu0 }
  0x9e   :  { %v3430_v41 = vadd.f32 %v2831_v17, %v190_v16 }
  0xa5   :  { %v193_v18 = vpop.f32.mrf.mxu0 }
  0xa6   :  { %v3387_v19 = vadd.f32 %v2831_v17, %v193_v18 }
  0xad   :  { %v196_v20 = vpop.f32.mrf.mxu0 }
  0xae   :  { %v3389_v21 = vadd.f32 %v2831_v17, %v196_v20 }
  0xb5   :  { %v199_v23 = vpop.f32.mrf.mxu0 }
  0xb6   :  { %v3393_v25 = vadd.f32 %v2831_v17, %v199_v23 }
  0xbd   :  { %v202_v27 = vpop.f32.mrf.mxu0 }
  0xbe   :  { %v3400_v29 = vadd.f32 %v2831_v17, %v202_v27 }
  0xc0   :  { %v251_v30 = vsel %vm3396_vm1, %v3393_v25, %v3400_v29  ;;  %v255_v31 = vsel %vm3396_vm1, %v3400_v29, %v3393_v25 }
  0xc5   :  { %v205_v32 = vpop.f32.mrf.mxu0 }
  0xc6   :  { %v3410_v33 = vadd.f32 %v2831_v17, %v205_v32 }
  0xc8   :  { %v247_v34 = vsel %vm3396_vm1, %v3389_v21, %v3410_v33  ;;  %v259_v35 = vsel %vm3396_vm1, %v3410_v33, %v3389_v21 }
  0xcd   :  { %v208_v36 = vpop.f32.mrf.mxu0 }
  0xce   :  { %v3420_v37 = vadd.f32 %v2831_v17, %v208_v36 }
  0xd0   :  { %v243_v38 = vsel %vm3396_vm1, %v3387_v19, %v3420_v37  ;;  %v263_v39 = vsel %vm3396_vm1, %v3420_v37, %v3387_v19 }
  0xd5   :  { %v211_v40 = vpop.f32.mrf.mxu0 }
  0xd6   :  { %v3432_v42 = vadd.f32 %v2831_v17, %v211_v40 }
  0xd8   :  { %v267_v43 = vsel %vm3396_vm1, %v3432_v42, %v3430_v41  ;;  %v239_v44 = vsel %vm3396_vm1, %v3430_v41, %v3432_v42 }
  0xdd   :  { %v291_v45 = vpop.f32.mrf.mxu0 }
  0xde   :  { %v292_v46 = vadd.f32 %v291_v45, %v239_v44 }
  0xe0   :  { %2842 = vtanh.f32 %v292_v46  ;;  %v2754_v48 = vmul.f32 -1.442695, %v292_v46 }
  0xe2   :  { %2844 = vpow2.f32 %v2754_v48 }
  0xe6   :  { %v2843_v47 = vpop.eup %2842 }
  0xe7   :  { %316 = vrot.lane.b32.xlu0 %v2843_v47, %s3181_s27 }
  0xe8   :  { %v2845_v49 = vpop.eup %2844 }
  0xe9   :  { %v297_v50 = vadd.f32 1.0, %v2845_v49 }
  0xeb   :  { %2846 = vrcp.f32 %v297_v50  ;;  %v309_v56 = vand.u32 2147483648, %v297_v50  ;;  %vm303_vm3 = vweird.f32 %v297_v50  ;;  %v307_v57 = vand.u32 2147483647, %v297_v50 }
  0xed   :  { %v310_v59 = vor.u32 1.1754944e-38, %v309_v56  ;;  %vm308_vm5 = vcmp.eq.f32.partialorder %v307_v57, 8.507059e+37 }
  0xf1   :  { %v2847_v51 = vpop.eup %2846 }
  0xf2   :  { %v299_v52 = vmul.f32 %v2847_v51, %v297_v50  ;;  %vm304_vm2 = vweird.f32 %v2847_v51 }
  0xf3   :  { %vm305_vm4 = vmor %vm303_vm3, %vm304_vm2 }
  0xf4   :  { %v300_v53 = vsub.f32 1.0, %v299_v52 }
  0xf6   :  { %v301_v54 = vmul.f32 %v2847_v51, %v300_v53 }
  0xf8   :  { %v302_v55 = vadd.f32 %v2847_v51, %v301_v54 }
  0xfa   :  { %v306_v58 = vsel %vm305_vm4, %v2847_v51, %v302_v55 }
  0xfb   :  { %v311_v61 = vsel %vm308_vm5, %v310_v59, %v306_v58 }
  0xfc   :  { %v314_v63 = vmul.f32 0.0, %v311_v61 }
 0x159   :  { %v317_v60 = vpop.permute.xlu0 %316 }
 0x15a   :  { %v319_v62 = vmul.f32 %v317_v60, %v311_v61 }
 0x15c   :  { %321 = vrot.lane.b32.xlu0 %v319_v62, %s3181_s27 }
 0x1ce   :  { %v322_v0 = vpop.permute.xlu0 %321 }
 0x1cf   :  { %v324_v1 = vadd.f32 %v322_v0, %v314_v63 }
 0x1d1   :  { %2848 = vtanh.f32 %v324_v1 }
 0x1d7   :  { %v2849_v2 = vpop.eup %2848 }
 0x1d8   :  { %327 = vrot.lane.b32.xlu1 %v2849_v2, %s3181_s27 }
 0x24a   :  { %v328_v3 = vpop.permute.xlu1 %327 }
 0x24b   :  { %v330_v7 = vmul.f32 %v328_v3, %v311_v61 }
 0x24d   :  { %332 = vrot.lane.b32.xlu1 %v330_v7, %s3182_s22 }
 0x2bf   :  { %v333_v8 = vpop.permute.xlu1 %332 }
 0x2c0   :  { %335 = vst.msk [vmem:[#allocation4] sm:$0xff] %vm270_vm6, %v333_v8  ;;  %2755 = vmatmul.msk.f32.vlgmr.msra.gmra.mxu2 %vm270_vm6, %v333_v8 }
 0x2c1   :  { %754 = vmatpush.msra.mxu2 %v3309_v4 }
 0x2c3   :  { %755 = vmatpush.msra.mxu2 %v3314_v5 }
 0x2c5   :  { %756 = vmatpush.msra.mxu2 %v3323_v6 }
 0x2c7   :  { %757 = vmatpush.msra.mxu2 %v3345_v9 }
 0x343   :  { %v357_v10 = vpop.f32.mrf.mxu2 }
 0x344   :  { %v358_v11 = vadd.f32 %v357_v10, %v243_v38 }
 0x346   :  { %2850 = vtanh.f32 %v358_v11  ;;  %v2756_v13 = vmul.f32 -1.442695, %v358_v11 }
 0x348   :  { %2852 = vpow2.f32 %v2756_v13 }
 0x34c   :  { %v2851_v12 = vpop.eup %2850 }
 0x34d   :  { %382 = vrot.lane.b32.xlu2 %v2851_v12, %s3181_s27 }
 0x34e   :  { %v2853_v14 = vpop.eup %2852 }
 0x34f   :  { %v363_v16 = vadd.f32 1.0, %v2853_v14 }
 0x351   :  { %2854 = vrcp.f32 %v363_v16  ;;  %v375_v6 = vand.u32 2147483648, %v363_v16  ;;  %vm369_vm8 = vweird.f32 %v363_v16  ;;  %v373_v9 = vand.u32 2147483647, %v363_v16 }
 0x353   :  { %v376_v23 = vor.u32 1.1754944e-38, %v375_v6  ;;  %vm374_vm10 = vcmp.eq.f32.partialorder %v373_v9, 8.507059e+37 }
 0x357   :  { %v2855_v17 = vpop.eup %2854 }
 0x358   :  { %v365_v18 = vmul.f32 %v2855_v17, %v363_v16  ;;  %vm370_vm7 = vweird.f32 %v2855_v17 }
 0x359   :  { %vm371_vm9 = vmor %vm369_vm8, %vm370_vm7 }
 0x35a   :  { %v366_v4 = vsub.f32 1.0, %v365_v18 }
 0x35c   :  { %v367_v20 = vmul.f32 %v2855_v17, %v366_v4 }
 0x35e   :  { %v368_v5 = vadd.f32 %v2855_v17, %v367_v20 }
 0x360   :  { %v372_v22 = vsel %vm371_vm9, %v2855_v17, %v368_v5  ;;  %vm805_vm9 = vcmp.lt.s32.totalorder %v3391_v24, 16 }
 0x361   :  { %v377_v27 = vsel %vm374_vm10, %v376_v23, %v372_v22 }
 0x362   :  { %v380_v36 = vmul.f32 %v377_v27, %v324_v1 }
 0x3a7   :  { %v383_v26 = vpop.permute.xlu2 %382 }
 0x3a8   :  { %v385_v32 = vmul.f32 %v383_v26, %v377_v27 }
 0x3aa   :  { %387 = vrot.lane.b32.xlu2 %v385_v32, %s3181_s27 }
 0x404   :  { %v388_v38 = vpop.permute.xlu2 %387 }
 0x405   :  { %v390_v40 = vadd.f32 %v388_v38, %v380_v36 }
 0x407   :  { %2856 = vtanh.f32 %v390_v40 }
 0x40d   :  { %v2857_v44 = vpop.eup %2856 }
 0x40e   :  { %393 = vrot.lane.b32.xlu0 %v2857_v44, %s3181_s27 }
 0x480   :  { %v394_v45 = vpop.permute.xlu0 %393 }
 0x481   :  { %v396_v46 = vmul.f32 %v394_v45, %v377_v27 }
 0x483   :  { %398 = vrot.lane.b32.xlu1 %v396_v46, %s3182_s22 }
 0x4f5   :  { %v399_v47 = vpop.permute.xlu1 %398 }
 0x4f6   :  { %402 = vst.msk [vmem:[#allocation4 + $0x8] sm:$0xff] %vm270_vm6, %v399_v47  ;;  %2757 = vmatmul.msk.f32.vlgmr.msra.gmra.mxu3 %vm270_vm6, %v399_v47 }
 0x579   :  { %v424_v48 = vpop.f32.mrf.mxu3 }
 0x57a   :  { %v425_v49 = vadd.f32 %v424_v48, %v247_v34 }
 0x57c   :  { %2858 = vtanh.f32 %v425_v49  ;;  %v2758_v51 = vmul.f32 -1.442695, %v425_v49 }
 0x57e   :  { %2860 = vpow2.f32 %v2758_v51 }
 0x582   :  { %v2859_v50 = vpop.eup %2858 }
 0x583   :  { %449 = vrot.lane.b32.xlu2 %v2859_v50, %s3181_s27 }
 0x584   :  { %v2861_v52 = vpop.eup %2860 }
 0x585   :  { %v430_v53 = vadd.f32 1.0, %v2861_v52 }
 0x587   :  { %2862 = vrcp.f32 %v430_v53  ;;  %v442_v59 = vand.u32 2147483648, %v430_v53  ;;  %vm436_vm12 = vweird.f32 %v430_v53  ;;  %v440_v60 = vand.u32 2147483647, %v430_v53 }
 0x589   :  { %v443_v61 = vor.u32 1.1754944e-38, %v442_v59  ;;  %vm441_vm14 = vcmp.eq.f32.partialorder %v440_v60, 8.507059e+37 }
 0x58d   :  { %v2863_v54 = vpop.eup %2862 }
 0x58e   :  { %v432_v55 = vmul.f32 %v2863_v54, %v430_v53  ;;  %vm437_vm11 = vweird.f32 %v2863_v54 }
 0x58f   :  { %vm438_vm13 = vmor %vm436_vm12, %vm437_vm11 }
 0x590   :  { %v433_v56 = vsub.f32 1.0, %v432_v55 }
 0x592   :  { %v434_v57 = vmul.f32 %v2863_v54, %v433_v56 }
 0x594   :  { %v435_v58 = vadd.f32 %v2863_v54, %v434_v57 }
 0x596   :  { %v439_v34 = vsel %vm438_vm13, %v2863_v54, %v435_v58 }
 0x597   :  { %v444_v63 = vsel %vm441_vm14, %v443_v61, %v439_v34 }
 0x598   :  { %v447_v1 = vmul.f32 %v444_v63, %v390_v40 }
 0x5dd   :  { %v450_v62 = vpop.permute.xlu2 %449 }
 0x5de   :  { %v452_v0 = vmul.f32 %v450_v62, %v444_v63 }
 0x5e0   :  { %454 = vrot.lane.b32.xlu0 %v452_v0, %s3181_s27 }
 0x652   :  { %v455_v2 = vpop.permute.xlu0 %454 }
 0x653   :  { %v457_v3 = vadd.f32 %v455_v2, %v447_v1 }
 0x655   :  { %2864 = vtanh.f32 %v457_v3 }
 0x65b   :  { %v2865_v7 = vpop.eup %2864 }
 0x65c   :  { %460 = vrot.lane.b32.xlu1 %v2865_v7, %s3181_s27 }
 0x6ce   :  { %v461_v8 = vpop.permute.xlu1 %460 }
 0x6cf   :  { %v463_v10 = vmul.f32 %v461_v8, %v444_v63 }
 0x6d1   :  { %465 = vrot.lane.b32.xlu2 %v463_v10, %s3182_s22 }
 0x72b   :  { %v466_v11 = vpop.permute.xlu2 %465 }
 0x72c   :  { %469 = vst.msk [vmem:[#allocation4 + $0x10] sm:$0xff] %vm270_vm6, %v466_v11  ;;  %2759 = vmatmul.msk.f32.vlgmr.msra.gmra.mxu1 %vm270_vm6, %v466_v11 }
 0x7a9   :  { %v491_v12 = vpop.f32.mrf.mxu1 }
 0x7aa   :  { %v492_v13 = vadd.f32 %v491_v12, %v251_v30 }
 0x7ac   :  { %2866 = vtanh.f32 %v492_v13  ;;  %v2760_v16 = vmul.f32 -1.442695, %v492_v13 }
 0x7ae   :  { %2868 = vpow2.f32 %v2760_v16 }
 0x7b2   :  { %v2867_v14 = vpop.eup %2866 }
 0x7b3   :  { %516 = vrot.lane.b32.xlu0 %v2867_v14, %s3181_s27 }
 0x7b4   :  { %v2869_v17 = vpop.eup %2868 }
 0x7b5   :  { %v497_v18 = vadd.f32 1.0, %v2869_v17 }
 0x7b7   :  { %2870 = vrcp.f32 %v497_v18  ;;  %v509_v22 = vand.u32 2147483648, %v497_v18  ;;  %vm503_vm0 = vweird.f32 %v497_v18  ;;  %v507_v23 = vand.u32 2147483647, %v497_v18 }
 0x7b9   :  { %v510_v26 = vor.u32 1.1754944e-38, %v509_v22  ;;  %vm508_vm3 = vcmp.eq.f32.partialorder %v507_v23, 8.507059e+37 }
 0x7bd   :  { %v2871_v4 = vpop.eup %2870 }
 0x7be   :  { %v499_v20 = vmul.f32 %v2871_v4, %v497_v18  ;;  %vm504_vm15 = vweird.f32 %v2871_v4 }
 0x7bf   :  { %vm505_vm2 = vmor %vm503_vm0, %vm504_vm15 }
 0x7c0   :  { %v500_v5 = vsub.f32 1.0, %v499_v20 }
 0x7c2   :  { %v501_v6 = vmul.f32 %v2871_v4, %v500_v5 }
 0x7c4   :  { %v502_v9 = vadd.f32 %v2871_v4, %v501_v6 }
 0x7c6   :  { %v506_v30 = vsel %vm505_vm2, %v2871_v4, %v502_v9 }
 0x7c7   :  { %v511_v32 = vsel %vm508_vm3, %v510_v26, %v506_v30 }
 0x7c8   :  { %v514_v38 = vmul.f32 %v511_v32, %v457_v3 }
 0x825   :  { %v517_v27 = vpop.permute.xlu0 %516 }
 0x826   :  { %v519_v36 = vmul.f32 %v517_v27, %v511_v32 }
 0x828   :  { %521 = vrot.lane.b32.xlu1 %v519_v36, %s3181_s27 }
 0x89a   :  { %v522_v40 = vpop.permute.xlu1 %521 }
 0x89b   :  { %v524_v44 = vadd.f32 %v522_v40, %v514_v38 }
 0x89d   :  { %2872 = vtanh.f32 %v524_v44 }
 0x8a3   :  { %v2873_v45 = vpop.eup %2872 }
 0x8a4   :  { %527 = vrot.lane.b32.xlu2 %v2873_v45, %s3181_s27 }
 0x8fe   :  { %v528_v46 = vpop.permute.xlu2 %527 }
 0x8ff   :  { %v530_v47 = vmul.f32 %v528_v46, %v511_v32 }
 0x901   :  { %532 = vrot.lane.b32.xlu0 %v530_v47, %s3182_s22 }
 0x973   :  { %v533_v48 = vpop.permute.xlu0 %532 }
 0x974   :  { %536 = vst.msk [vmem:[#allocation4 + $0x18] sm:$0xff] %vm270_vm6, %v533_v48  ;;  %2761 = vmatmul.msk.f32.vlgmr.msrb.gmra.mxu2 %vm270_vm6, %v533_v48  ;;  %v814_v48 = vld [vmem:[#allocation4 + $0x10] sm:$0xff] }
 0x97b   :  { %v818_v10 = vld [vmem:[#allocation4 + $0x18] sm:$0xff] }
 0x9f7   :  { %v558_v49 = vpop.f32.mrf.mxu2 }
 0x9f8   :  { %v559_v50 = vadd.f32 %v558_v49, %v255_v31 }
 0x9fa   :  { %2874 = vtanh.f32 %v559_v50  ;;  %v2762_v52 = vmul.f32 -1.442695, %v559_v50 }
 0x9fc   :  { %2876 = vpow2.f32 %v2762_v52 }
 0xa00   :  { %v2875_v51 = vpop.eup %2874 }
 0xa01   :  { %583 = vrot.lane.b32.xlu1 %v2875_v51, %s3181_s27 }
 0xa02   :  { %v2877_v53 = vpop.eup %2876 }
 0xa03   :  { %v564_v54 = vadd.f32 1.0, %v2877_v53 }
 0xa05   :  { %2878 = vrcp.f32 %v564_v54  ;;  %v576_v60 = vand.u32 2147483648, %v564_v54  ;;  %vm570_vm5 = vweird.f32 %v564_v54  ;;  %v574_v34 = vand.u32 2147483647, %v564_v54 }
 0xa07   :  { %v577_v29 = vor.u32 1.1754944e-38, %v576_v60  ;;  %vm575_vm8 = vcmp.eq.f32.partialorder %v574_v34, 8.507059e+37 }
 0xa0b   :  { %v2879_v55 = vpop.eup %2878 }
 0xa0c   :  { %v566_v56 = vmul.f32 %v2879_v55, %v564_v54  ;;  %vm571_vm4 = vweird.f32 %v2879_v55 }
 0xa0d   :  { %vm572_vm7 = vmor %vm570_vm5, %vm571_vm4 }
 0xa0e   :  { %v567_v57 = vsub.f32 1.0, %v566_v56 }
 0xa10   :  { %v568_v58 = vmul.f32 %v2879_v55, %v567_v57 }
 0xa12   :  { %v569_v59 = vadd.f32 %v2879_v55, %v568_v58 }
 0xa14   :  { %v573_v25 = vsel %vm572_vm7, %v2879_v55, %v569_v59 }
 0xa15   :  { %v578_v61 = vsel %vm575_vm8, %v577_v29, %v573_v25 }
 0xa16   :  { %v581_v63 = vmul.f32 %v578_v61, %v524_v44 }
 0xa73   :  { %v584_v31 = vpop.permute.xlu1 %583 }
 0xa74   :  { %v586_v62 = vmul.f32 %v584_v31, %v578_v61 }
 0xa76   :  { %588 = vrot.lane.b32.xlu2 %v586_v62, %s3181_s27 }
 0xad0   :  { %v589_v0 = vpop.permute.xlu2 %588 }
 0xad1   :  { %v591_v1 = vadd.f32 %v589_v0, %v581_v63 }
 0xad3   :  { %2880 = vtanh.f32 %v591_v1 }
 0xad9   :  { %v2881_v2 = vpop.eup %2880 }
 0xada   :  { %594 = vrot.lane.b32.xlu0 %v2881_v2, %s3181_s27 }
 0xb4c   :  { %v595_v3 = vpop.permute.xlu0 %594 }
 0xb4d   :  { %v597_v7 = vmul.f32 %v595_v3, %v578_v61 }
 0xb4f   :  { %599 = vrot.lane.b32.xlu1 %v597_v7, %s3182_s22 }
 0xbc1   :  { %v600_v8 = vpop.permute.xlu1 %599 }
 0xbc2   :  { %603 = vst.msk [vmem:[#allocation4 + $0x20] sm:$0xff] %vm270_vm6, %v600_v8  ;;  %2763 = vmatmul.msk.f32.vlgmr.msrb.gmra.mxu3 %vm270_vm6, %v600_v8 }
 0xbc9   :  { %v819_v11 = vld [vmem:[#allocation4 + $0x20] sm:$0xff] }
 0xbca   :  { %v820_v12 = vsel %vm805_vm9, %v818_v10, %v819_v11  ;;  %v824_v13 = vsel %vm805_vm9, %v819_v11, %v818_v10  ;;  %v810_v10 = vld [vmem:[#allocation4 + $0x8] sm:$0xff] }
 0xbcb   :  { %825 = vst.msk [vmem:[#allocation5 + $0x20] sm:$0xff] %vm270_vm6, %v824_v13 }
 0xbcc   :  { %821 = vst.msk [vmem:[#allocation5 + $0x18] sm:$0xff] %vm270_vm6, %v820_v12 }
 0xc45   :  { %v625_v14 = vpop.f32.mrf.mxu3 }
 0xc46   :  { %v626_v16 = vadd.f32 %v625_v14, %v259_v35 }
 0xc48   :  { %2882 = vtanh.f32 %v626_v16  ;;  %v2764_v18 = vmul.f32 -1.442695, %v626_v16 }
 0xc4a   :  { %2884 = vpow2.f32 %v2764_v18 }
 0xc4e   :  { %v2883_v17 = vpop.eup %2882 }
 0xc4f   :  { %650 = vrot.lane.b32.xlu2 %v2883_v17, %s3181_s27 }
 0xc50   :  { %v2885_v4 = vpop.eup %2884 }
 0xc51   :  { %v631_v20 = vadd.f32 1.0, %v2885_v4 }
 0xc53   :  { %2886 = vrcp.f32 %v631_v20  ;;  %v643_v30 = vand.u32 2147483648, %v631_v20  ;;  %vm637_vm11 = vweird.f32 %v631_v20  ;;  %v641_v26 = vand.u32 2147483647, %v631_v20 }
 0xc55   :  { %v644_v33 = vor.u32 1.1754944e-38, %v643_v30  ;;  %vm642_vm13 = vcmp.eq.f32.partialorder %v641_v26, 8.507059e+37 }
 0xc59   :  { %v2887_v5 = vpop.eup %2886 }
 0xc5a   :  { %v633_v6 = vmul.f32 %v2887_v5, %v631_v20  ;;  %vm638_vm10 = vweird.f32 %v2887_v5 }
 0xc5b   :  { %vm639_vm12 = vmor %vm637_vm11, %vm638_vm10 }
 0xc5c   :  { %v634_v9 = vsub.f32 1.0, %v633_v6 }
 0xc5e   :  { %v635_v22 = vmul.f32 %v2887_v5, %v634_v9 }
 0xc60   :  { %v636_v23 = vadd.f32 %v2887_v5, %v635_v22 }
 0xc62   :  { %v640_v21 = vsel %vm639_vm12, %v2887_v5, %v636_v23 }
 0xc63   :  { %v645_v27 = vsel %vm642_vm13, %v644_v33, %v640_v21 }
 0xc64   :  { %v648_v36 = vmul.f32 %v645_v27, %v591_v1 }
 0xca9   :  { %v651_v35 = vpop.permute.xlu2 %650 }
 0xcaa   :  { %v653_v32 = vmul.f32 %v651_v35, %v645_v27 }
 0xcac   :  { %655 = vrot.lane.b32.xlu0 %v653_v32, %s3181_s27 }
 0xd1e   :  { %v656_v38 = vpop.permute.xlu0 %655 }
 0xd1f   :  { %v658_v40 = vadd.f32 %v656_v38, %v648_v36 }
 0xd21   :  { %2888 = vtanh.f32 %v658_v40 }
 0xd27   :  { %v2889_v44 = vpop.eup %2888 }
 0xd28   :  { %661 = vrot.lane.b32.xlu1 %v2889_v44, %s3181_s27 }
 0xd9a   :  { %v662_v45 = vpop.permute.xlu1 %661 }
 0xd9b   :  { %v664_v46 = vmul.f32 %v662_v45, %v645_v27 }
 0xd9d   :  { %666 = vrot.lane.b32.xlu2 %v664_v46, %s3182_s22  ;;  %v3545_v46 = vld [vmem:[#allocation5 + $0x18] sm:$0xff] }
 0xdf7   :  { %v667_v47 = vpop.permute.xlu2 %666 }
 0xdf8   :  { %670 = vst.msk [vmem:[#allocation4 + $0x28] sm:$0xff] %vm270_vm6, %v667_v47  ;;  %2765 = vmatmul.msk.f32.vlgmr.msrb.gmra.mxu1 %vm270_vm6, %v667_v47  ;;  %v855_v47 = vsel %vm270_vm6, %v3545_v46, 0.0 }
 0xdff   :  { %v815_v49 = vld [vmem:[#allocation4 + $0x28] sm:$0xff] }
 0xe00   :  { %v816_v50 = vsel %vm805_vm9, %v814_v48, %v815_v49  ;;  %v828_v51 = vsel %vm805_vm9, %v815_v49, %v814_v48  ;;  %v3549_v48 = vld [vmem:[#allocation5 + $0x20] sm:$0xff] }
 0xe01   :  { %817 = vst.msk [vmem:[#allocation5 + $0x10] sm:$0xff] %vm270_vm6, %v816_v50  ;;  %v874_v49 = vmul.f32 %v3549_v48, %v3549_v48 }
 0xe02   :  { %829 = vst.msk [vmem:[#allocation5 + $0x28] sm:$0xff] %vm270_vm6, %v828_v51 }
 0xe03   :  { %v890_v50 = vsel %vm270_vm6, %v874_v49, 0.0 }
 0xe75   :  { %v692_v52 = vpop.f32.mrf.mxu1 }
 0xe76   :  { %v693_v53 = vadd.f32 %v692_v52, %v263_v39 }
 0xe78   :  { %2890 = vtanh.f32 %v693_v53  ;;  %v2766_v55 = vmul.f32 -1.442695, %v693_v53 }
 0xe7a   :  { %2892 = vpow2.f32 %v2766_v55 }
 0xe7e   :  { %v2891_v54 = vpop.eup %2890 }
 0xe7f   :  { %717 = vrot.lane.b32.xlu0 %v2891_v54, %s3181_s27  ;;  %v806_v54 = vld [vmem:[#allocation4] sm:$0xff] }
 0xe80   :  { %v2893_v56 = vpop.eup %2892 }
 0xe81   :  { %v698_v57 = vadd.f32 1.0, %v2893_v56 }
 0xe83   :  { %2894 = vrcp.f32 %v698_v57  ;;  %v710_v29 = vand.u32 2147483648, %v698_v57  ;;  %vm704_vm15 = vweird.f32 %v698_v57  ;;  %v708_v31 = vand.u32 2147483647, %v698_v57 }
 0xe85   :  { %v711_v37 = vor.u32 1.1754944e-38, %v710_v29  ;;  %vm709_vm2 = vcmp.eq.f32.partialorder %v708_v31, 8.507059e+37 }
 0xe89   :  { %v2895_v58 = vpop.eup %2894 }
 0xe8a   :  { %v700_v59 = vmul.f32 %v2895_v58, %v698_v57  ;;  %vm705_vm14 = vweird.f32 %v2895_v58 }
 0xe8b   :  { %vm706_vm0 = vmor %vm704_vm15, %vm705_vm14 }
 0xe8c   :  { %v701_v60 = vsub.f32 1.0, %v700_v59 }
 0xe8e   :  { %v702_v34 = vmul.f32 %v2895_v58, %v701_v60 }
 0xe90   :  { %v703_v25 = vadd.f32 %v2895_v58, %v702_v34 }
 0xe92   :  { %v707_v19 = vsel %vm706_vm0, %v2895_v58, %v703_v25 }
 0xe93   :  { %v712_v61 = vsel %vm709_vm2, %v711_v37, %v707_v19  ;;  %v3577_v19 = vld [vmem:[#allocation5 + $0x10] sm:$0xff] }
 0xe94   :  { %v715_v63 = vmul.f32 %v712_v61, %v658_v40 }
 0xef1   :  { %v718_v39 = vpop.permute.xlu0 %717 }
 0xef2   :  { %v720_v62 = vmul.f32 %v718_v39, %v712_v61  ;;  %v872_v39 = vmul.f32 %v3577_v19, %v3577_v19 }
 0xef4   :  { %722 = vrot.lane.b32.xlu1 %v720_v62, %s3181_s27  ;;  %v884_v62 = vsel %vm270_vm6, %v872_v39, 0.0 }
 0xf66   :  { %v723_v0 = vpop.permute.xlu1 %722 }
 0xf67   :  { %v725_v1 = vadd.f32 %v723_v0, %v715_v63  ;;  %v852_v63 = vsel %vm270_vm6, %v3577_v19, 0.0  ;;  %v858_v0 = vsel %vm270_vm6, %v3549_v48, 0.0 }
 0xf69   :  { %2896 = vtanh.f32 %v725_v1 }
 0xf6f   :  { %v2897_v2 = vpop.eup %2896 }
 0xf70   :  { %728 = vrot.lane.b32.xlu2 %v2897_v2, %s3181_s27  ;;  %v873_v2 = vmul.f32 %v3545_v46, %v3545_v46 }
 0xfca   :  { %v729_v3 = vpop.permute.xlu2 %728 }
 0xfcb   :  { %v731_v7 = vmul.f32 %v729_v3, %v712_v61 }
 0xfcd   :  { %733 = vrot.lane.b32.xlu0 %v731_v7, %s3182_s22  ;;  %v887_v7 = vsel %vm270_vm6, %v873_v2, 0.0  ;;  %v3638_v2 = vld [vmem:[%s4300_s28] ss:$0 sm:$0xff] }
0x103f   :  { %v734_v8 = vpop.permute.xlu0 %733 }
0x1040   :  { %737 = vst.msk [vmem:[#allocation4 + $0x30] sm:$0xff] %vm270_vm6, %v734_v8  ;;  %2767 = vmatmul.msk.f32.vlgmr.msra.gmra.mxu2 %vm270_vm6, %v734_v8 }
0x1047   :  { %v811_v11 = vld [vmem:[#allocation4 + $0x30] sm:$0xff] }
0x1048   :  { %v812_v12 = vsel %vm805_vm9, %v810_v10, %v811_v11  ;;  %v832_v13 = vsel %vm805_vm9, %v811_v11, %v810_v10 }
0x1049   :  { %813 = vst.msk [vmem:[#allocation5 + $0x8] sm:$0xff] %vm270_vm6, %v812_v12 }
0x104a   :  { %833 = vst.msk [vmem:[#allocation5 + $0x30] sm:$0xff] %vm270_vm6, %v832_v13 }
0x1050   :  { %v3541_v44 = vld [vmem:[#allocation5 + $0x8] sm:$0xff] }
0x1051   :  { %v849_v45 = vsel %vm270_vm6, %v3541_v44, 0.0  ;;  %v3554_v51 = vld [vmem:[#allocation5 + $0x30] sm:$0xff]  ;;  %v871_v37 = vmul.f32 %v3541_v44, %v3541_v44 }
0x1052   :  { %v864_v52 = vsel %vm270_vm6, %v3554_v51, 0.0  ;;  %v876_v12 = vmul.f32 %v3554_v51, %v3554_v51 }
0x1053   :  { %v881_v61 = vsel %vm270_vm6, %v871_v37, 0.0 }
0x1054   :  { %v896_v13 = vsel %vm270_vm6, %v876_v12, 0.0 }
0x10c3   :  { %v759_v14 = vpop.f32.mrf.mxu2 }
0x10c4   :  { %v760_v16 = vadd.f32 %v759_v14, %v267_v43  ;;  %v1069_v14 = vld [vmem:[%s4272_s6 + $0x18] sm:$0xff] }
0x10c5   :  { %1110 = vmatpush.msra.mxu3 %v1069_v14 }
0x10c6   :  { %2898 = vtanh.f32 %v760_v16  ;;  %v2768_v18 = vmul.f32 -1.442695, %v760_v16 }
0x10c8   :  { %2900 = vpow2.f32 %v2768_v18  ;;  %v1067_v18 = vld [vmem:[%s4272_s6 + $0x8] sm:$0xff] }
0x10cc   :  { %v2899_v17 = vpop.eup %2898 }
0x10cd   :  { %784 = vrot.lane.b32.xlu1 %v2899_v17, %s3181_s27  ;;  %v1068_v17 = vld [vmem:[%s4272_s6 + $0x10] sm:$0xff] }
0x10ce   :  { %v2901_v4 = vpop.eup %2900  ;;  %1111 = vmatpush.msra.mxu3 %v1068_v17 }
0x10cf   :  { %v765_v20 = vadd.f32 1.0, %v2901_v4 }
0x10d0   :  { %1112 = vmatpush.msra.mxu3 %v1067_v18 }
0x10d1   :  { %2902 = vrcp.f32 %v765_v20  ;;  %v777_v30 = vand.u32 2147483648, %v765_v20  ;;  %vm771_vm4 = vweird.f32 %v765_v20  ;;  %v775_v26 = vand.u32 2147483647, %v765_v20 }
0x10d3   :  { %v778_v42 = vor.u32 1.1754944e-38, %v777_v30  ;;  %vm776_vm7 = vcmp.eq.f32.partialorder %v775_v26, 8.507059e+37 }
0x10d7   :  { %v2903_v5 = vpop.eup %2902 }
0x10d8   :  { %v767_v6 = vmul.f32 %v2903_v5, %v765_v20  ;;  %vm772_vm3 = vweird.f32 %v2903_v5  ;;  %v1066_v20 = vld [vmem:[%s4272_s6] sm:$0xff] }
0x10d9   :  { %vm773_vm5 = vmor %vm771_vm4, %vm772_vm3  ;;  %1113 = vmatpush.msra.mxu3 %v1066_v20 }
0x10da   :  { %v768_v9 = vsub.f32 1.0, %v767_v6 }
0x10dc   :  { %v769_v22 = vmul.f32 %v2903_v5, %v768_v9 }
0x10de   :  { %v770_v23 = vadd.f32 %v2903_v5, %v769_v22 }
0x10e0   :  { %v774_v41 = vsel %vm773_vm5, %v2903_v5, %v770_v23 }
0x10e1   :  { %v779_v21 = vsel %vm776_vm7, %v778_v42, %v774_v41 }
0x10e2   :  { %v782_v35 = vmul.f32 %v779_v21, %v725_v1  ;;  %v3589_v1 = vld [vmem:[#allocation5 + $0x28] sm:$0xff] }
0x10e3   :  { %v875_v3 = vmul.f32 %v3589_v1, %v3589_v1  ;;  %v861_v10 = vsel %vm270_vm6, %v3589_v1, 0.0 }
0x10e5   :  { %v893_v8 = vsel %vm270_vm6, %v875_v3, 0.0 }
0x113f   :  { %v785_v43 = vpop.permute.xlu1 %784 }
0x1140   :  { %v787_v33 = vmul.f32 %v785_v43, %v779_v21 }
0x1142   :  { %789 = vrot.lane.b32.xlu2 %v787_v33, %s3181_s27 }
0x119c   :  { %v790_v27 = vpop.permute.xlu2 %789 }
0x119d   :  { %v792_v32 = vadd.f32 %v790_v27, %v782_v35 }
0x119f   :  { %2904 = vtanh.f32 %v792_v32 }
0x11a5   :  { %v2905_v36 = vpop.eup %2904 }
0x11a6   :  { %795 = vrot.lane.b32.xlu0 %v2905_v36, %s3181_s27 }
0x1218   :  { %v796_v38 = vpop.permute.xlu0 %795 }
0x1219   :  { %v798_v40 = vmul.f32 %v796_v38, %v779_v21 }
0x121b   :  { %800 = vrot.lane.b32.xlu1 %v798_v40, %s3182_s22 }
0x1245   :  { %850 = vadd.xlane.f32.xlu1 %v849_v45 }
0x124d   :  { %856 = vadd.xlane.f32.xlu1 %v855_v47 }
0x1255   :  { %891 = vadd.xlane.f32.xlu1 %v890_v50 }
0x125d   :  { %865 = vadd.xlane.f32.xlu1 %v864_v52 }
0x128d   :  { %v801_v53 = vpop.permute.xlu1 %800 }
0x128e   :  { %804 = vst.msk [vmem:[#allocation4 + $0x38] sm:$0xff] %vm270_vm6, %v801_v53 }
0x1295   :  { %v807_v55 = vld [vmem:[#allocation4 + $0x38] sm:$0xff] }
0x1296   :  { %v808_v56 = vsel %vm805_vm9, %v806_v54, %v807_v55  ;;  %v836_v57 = vsel %vm805_vm9, %v807_v55, %v806_v54 }
0x1297   :  { %837 = vst.msk [vmem:[#allocation5 + $0x38] sm:$0xff] %vm270_vm6, %v836_v57 }
0x1298   :  { %809 = vst.msk [vmem:[#allocation5] sm:$0xff] %vm270_vm6, %v808_v56 }
0x129e   :  { %v3565_v58 = vld [vmem:[#allocation5 + $0x38] sm:$0xff] }
0x129f   :  { %v3567_v59 = vld [vmem:[#allocation5] sm:$0xff]  ;;  %v877_v60 = vmul.f32 %v3565_v58, %v3565_v58  ;;  %v867_v11 = vsel %vm270_vm6, %v3565_v58, 0.0 }
0x12a0   :  { %v846_v34 = vsel %vm270_vm6, %v3567_v59, 0.0  ;;  %v870_v25 = vmul.f32 %v3567_v59, %v3567_v59 }
0x12a1   :  { %847 = vadd.xlane.f32.xlu2 %v846_v34  ;;  %v899_v29 = vsel %vm270_vm6, %v877_v60, 0.0 }
0x12a2   :  { %900 = vadd.xlane.f32.xlu1 %v899_v29  ;;  %v878_v31 = vsel %vm270_vm6, %v870_v25, 0.0 }
0x12a3   :  { %879 = vadd.xlane.f32.xlu0 %v878_v31 }
0x12a9   :  { %882 = vadd.xlane.f32.xlu2 %v881_v61 }
0x12ab   :  { %885 = vadd.xlane.f32.xlu0 %v884_v62 }
0x12b1   :  { %853 = vadd.xlane.f32.xlu2 %v852_v63 }
0x12b3   :  { %859 = vadd.xlane.f32.xlu0 %v858_v0 }
0x12b8   :  { %v851_v16 = vpop.xlane.xlu1 %850 }
0x12b9   :  { %888 = vadd.xlane.f32.xlu2 %v887_v7  ;;  %v3616_v23 = vmul.f32 0.03125, %v851_v16 }
0x12bb   :  { %894 = vadd.xlane.f32.xlu0 %v893_v8  ;;  %v919_v43 = vmul.f32 %v3616_v23, %v3616_v23 }
0x12c0   :  { %v857_v26 = vpop.xlane.xlu1 %856 }
0x12c1   :  { %862 = vadd.xlane.f32.xlu2 %v861_v10  ;;  %v3626_v54 = vmul.f32 0.03125, %v857_v26 }
0x12c3   :  { %868 = vadd.xlane.f32.xlu0 %v867_v11  ;;  %v921_v39 = vmul.f32 %v3626_v54, %v3626_v54 }
0x12c8   :  { %v892_v36 = vpop.xlane.xlu1 %891 }
0x12c9   :  { %897 = vadd.xlane.f32.xlu2 %v896_v13  ;;  %v914_v57 = vmul.f32 0.03125, %v892_v36 }
0x12d0   :  { %v866_v8 = vpop.xlane.xlu1 %865 }
0x1314   :  { %v848_v4 = vpop.xlane.xlu2 %847 }
0x1315   :  { %v902_v5 = vmul.f32 0.03125, %v848_v4 }
0x1316   :  { %v880_v6 = vpop.xlane.xlu0 %879 }
0x1317   :  { %v918_v9 = vmul.f32 %v902_v5, %v902_v5  ;;  %v910_v22 = vmul.f32 0.03125, %v880_v6  ;;  %v934_v0 = vsub.f32 %v3567_v59, %v902_v5  ;;  %v3647_v59 = vld [vmem:[%s4271_s5] ss:$0 sm:$0xff]  ;;  %v935_v5 = vsub.f32 %v3541_v44, %v3616_v23 }
0x1319   :  { %v926_v30 = vsub.f32 %v910_v22, %v918_v9 }
0x131b   :  { %v942_v41 = vadd.f32 1e-05, %v926_v30 }
0x131c   :  { %v883_v42 = vpop.xlane.xlu2 %882 }
0x131d   :  { %2906 = vrsqrt.f32 %v942_v41  ;;  %v911_v21 = vmul.f32 0.03125, %v883_v42  ;;  %vm956_vm10 = vweird.f32 %v942_v41 }
0x131e   :  { %v886_v33 = vpop.xlane.xlu0 %885 }
0x131f   :  { %v927_v35 = vsub.f32 %v911_v21, %v919_v43  ;;  %v912_v50 = vmul.f32 0.03125, %v886_v33  ;;  %v901_v43 = vpop.xlane.xlu1 %900 }
0x1321   :  { %v943_v27 = vadd.f32 1e-05, %v927_v35 }
0x1323   :  { %v2907_v32 = vpop.eup %2906  ;;  %2908 = vrsqrt.f32 %v943_v27  ;;  %vm966_vm13 = vweird.f32 %v943_v27 }
0x1324   :  { %v951_v38 = vmul.f32 %v2907_v32, %v942_v41  ;;  %v854_v40 = vpop.xlane.xlu2 %853  ;;  %vm957_vm8 = vweird.f32 %v2907_v32 }
0x1325   :  { %v3620_v45 = vmul.f32 0.03125, %v854_v40  ;;  %vm958_vm11 = vmor %vm956_vm10, %vm957_vm8 }
0x1326   :  { %v952_v47 = vmul.f32 %v2907_v32, %v951_v38  ;;  %v860_v49 = vpop.xlane.xlu0 %859 }
0x1327   :  { %v920_v52 = vmul.f32 %v3620_v45, %v3620_v45  ;;  %v3624_v53 = vmul.f32 0.03125, %v860_v49  ;;  %v917_v49 = vmul.f32 0.03125, %v901_v43 }
0x1328   :  { %v953_v55 = vmul.f32 0.5, %v952_v47  ;;  %v3667_v47 = vmul.f32 0.03125, %v866_v8 }
0x1329   :  { %v2909_v56 = vpop.eup %2908  ;;  %v928_v60 = vsub.f32 %v912_v50, %v920_v52  ;;  %v922_v34 = vmul.f32 %v3624_v53, %v3624_v53 }
0x132a   :  { %v954_v25 = vsub.f32 1.5, %v953_v55  ;;  %v961_v29 = vmul.f32 %v2909_v56, %v943_v27  ;;  %vm967_vm12 = vweird.f32 %v2909_v56 }
0x132b   :  { %v3630_v31 = vadd.f32 1e-05, %v928_v60  ;;  %v930_v37 = vsub.f32 %v914_v57, %v922_v34  ;;  %vm968_vm14 = vmor %vm966_vm13, %vm967_vm12 }
0x132c   :  { %v955_v61 = vmul.f32 %v2907_v32, %v954_v25  ;;  %v962_v62 = vmul.f32 %v2909_v56, %v961_v29  ;;  %v889_v63 = vpop.xlane.xlu2 %888 }
0x132d   :  { %2910 = vrsqrt.f32 %v3630_v31  ;;  %v3641_v3 = vadd.f32 1e-05, %v930_v37  ;;  %v913_v7 = vmul.f32 0.03125, %v889_v63  ;;  %vm976_vm0 = vweird.f32 %v3630_v31 }
0x132e   :  { %v959_v10 = vsel %vm958_vm11, %v2907_v32, %v955_v61  ;;  %v963_v11 = vmul.f32 0.5, %v962_v62  ;;  %v895_v12 = vpop.xlane.xlu0 %894  ;;  %v924_v61 = vmul.f32 %v3667_v47, %v3667_v47  ;;  %v936_v62 = vsub.f32 %v3577_v19, %v3620_v45 }
0x132f   :  { %v1030_v13 = vmul.f32 %v959_v10, %v934_v0  ;;  %2912 = vrsqrt.f32 %v3641_v3  ;;  %v929_v14 = vsub.f32 %v913_v7, %v921_v39  ;;  %v915_v33 = vmul.f32 0.03125, %v895_v12 }
0x1330   :  { %v964_v16 = vsub.f32 1.5, %v963_v11  ;;  %v937_v45 = vsub.f32 %v3545_v46, %v3626_v54  ;;  %vm996_vm8 = vweird.f32 %v3641_v3 }
0x1331   :  { %v1042_v17 = vmul.f32 %v3638_v2, %v1030_v13  ;;  %v945_v18 = vadd.f32 1e-05, %v929_v14 }
0x1332   :  { %v965_v4 = vmul.f32 %v2909_v56, %v964_v16 }
0x1333   :  { %v2911_v20 = vpop.eup %2910  ;;  %2914 = vrsqrt.f32 %v945_v18  ;;  %v1054_v6 = vadd.f32 %v3647_v59, %v1042_v17  ;;  %vm986_vm4 = vweird.f32 %v945_v18 }
0x1334   :  { %v971_v9 = vmul.f32 %v2911_v20, %v3630_v31  ;;  %v863_v22 = vpop.xlane.xlu2 %862  ;;  %v969_v30 = vsel %vm968_vm14, %v2909_v56, %v965_v4  ;;  %vm977_vm15 = vweird.f32 %v2911_v20 }
0x1335   :  { %v3654_v26 = vpop.eup %2912  ;;  %v3656_v41 = vmul.f32 0.03125, %v863_v22  ;;  %2769 = vmatmul.msk.f32.vlgmr.msra.gmra.mxu3 %vm270_vm6, %v1054_v6  ;;  %v1031_v42 = vmul.f32 %v969_v30, %v935_v5  ;;  %vm978_vm2 = vmor %vm976_vm0, %vm977_vm15 }
0x1336   :  { %v972_v21 = vmul.f32 %v2911_v20, %v971_v9  ;;  %v991_v44 = vmul.f32 %v3654_v26, %v3641_v3  ;;  %v869_v23 = vpop.xlane.xlu0 %868  ;;  %vm997_vm7 = vweird.f32 %v3654_v26 }
0x1337   :  { %v923_v35 = vmul.f32 %v3656_v41, %v3656_v41  ;;  %v3663_v27 = vmul.f32 0.03125, %v869_v23  ;;  %v1043_v32 = vmul.f32 %v3638_v2, %v1031_v42  ;;  %vm998_vm10 = vmor %vm996_vm8, %vm997_vm7  ;;  %v938_v42 = vsub.f32 %v3549_v48, %v3624_v53  ;;  %v3711_v48 = vld [vmem:[%s4274_s8 + $0x10] sm:$0xff] }
0x1338   :  { %v973_v36 = vmul.f32 0.5, %v972_v21  ;;  %v992_v38 = vmul.f32 %v3654_v26, %v991_v44 }
0x1339   :  { %v2915_v40 = vpop.eup %2914  ;;  %v931_v50 = vsub.f32 %v915_v33, %v923_v35  ;;  %v925_v52 = vmul.f32 %v3663_v27, %v3663_v27  ;;  %v1055_v34 = vadd.f32 %v3647_v59, %v1043_v32 }
0x133a   :  { %v974_v55 = vsub.f32 1.5, %v973_v36  ;;  %v981_v56 = vmul.f32 %v2915_v40, %v945_v18  ;;  %v993_v29 = vmul.f32 0.5, %v992_v38  ;;  %vm987_vm3 = vweird.f32 %v2915_v40  ;;  %v3719_v36 = vld [vmem:[%s4274_s8 + $0x8] sm:$0xff] }
0x133b   :  { %v947_v57 = vadd.f32 1e-05, %v931_v50  ;;  %v933_v60 = vsub.f32 %v917_v49, %v925_v52  ;;  %vm988_vm5 = vmor %vm986_vm4, %vm987_vm3  ;;  %v939_v50 = vsub.f32 %v3589_v1, %v3656_v41  ;;  %v3729_v52 = vld [vmem:[%s4274_s8] sm:$0xff] }
0x133c   :  { %v975_v25 = vmul.f32 %v2911_v20, %v974_v55  ;;  %v982_v37 = vmul.f32 %v2915_v40, %v981_v56  ;;  %v898_v39 = vpop.xlane.xlu2 %897  ;;  %v994_v11 = vsub.f32 1.5, %v993_v29 }
0x133d   :  { %2916 = vrsqrt.f32 %v947_v57  ;;  %v916_v63 = vmul.f32 0.03125, %v898_v39  ;;  %2770 = vmatmul.msk.f32.gmra.mxu3 %vm270_vm6, %v1055_v34  ;;  %v3678_v8 = vadd.f32 1e-05, %v933_v60  ;;  %vm1006_vm12 = vweird.f32 %v947_v57 }
0x133e   :  { %v979_v0 = vsel %vm978_vm2, %v2911_v20, %v975_v25  ;;  %v983_v7 = vmul.f32 0.5, %v982_v37  ;;  %v995_v4 = vmul.f32 %v3654_v26, %v994_v11  ;;  %v940_v25 = vsub.f32 %v3554_v51, %v3667_v47 }
0x133f   :  { %v1032_v10 = vmul.f32 %v979_v0, %v936_v62  ;;  %v932_v31 = vsub.f32 %v916_v63, %v924_v61  ;;  %2918 = vrsqrt.f32 %v3678_v8  ;;  %vm1026_vm3 = vweird.f32 %v3678_v8 }
0x1340   :  { %v984_v12 = vsub.f32 1.5, %v983_v7  ;;  %v999_v9 = vsel %vm998_vm10, %v3654_v26, %v995_v4  ;;  %v3706_v26 = vld [vmem:[%s4274_s8 + $0x18] sm:$0xff]  ;;  %v941_v61 = vsub.f32 %v3565_v58, %v3663_v27  ;;  %v2834_v58 = vld [vmem:[%s4273_s7] ss:$0 sm:$0xff] }
0x1341   :  { %v3680_v13 = vadd.f32 1e-05, %v932_v31  ;;  %v1044_v14 = vmul.f32 %v3638_v2, %v1032_v10  ;;  %v1034_v44 = vmul.f32 %v999_v9, %v938_v42  ;;  %1192 = vmatpush.msra.mxu1 %v3706_v26  ;;  %1257 = vmatpush.msrb.mxu2 %v3706_v26 }
0x1342   :  { %v985_v16 = vmul.f32 %v2915_v40, %v984_v12 }
0x1343   :  { %v2917_v19 = vpop.eup %2916  ;;  %2920 = vrsqrt.f32 %v3680_v13  ;;  %v1056_v17 = vadd.f32 %v3647_v59, %v1044_v14  ;;  %v1046_v32 = vmul.f32 %v3638_v2, %v1034_v44  ;;  %1193 = vmatpush.msra.mxu1 %v3711_v48  ;;  %1258 = vmatpush.msrb.mxu2 %v3711_v48  ;;  %vm1016_vm15 = vweird.f32 %v3680_v13 }
0x1344   :  { %v1001_v20 = vmul.f32 %v2917_v19, %v947_v57  ;;  %v989_v5 = vsel %vm988_vm5, %v2915_v40, %v985_v16  ;;  %vm1007_vm11 = vweird.f32 %v2917_v19 }
0x1345   :  { %2771 = vmatmul.msk.f32.gmra.mxu3 %vm270_vm6, %v1056_v17  ;;  %v1033_v18 = vmul.f32 %v989_v5, %v937_v45  ;;  %v3693_v54 = vpop.eup %2918  ;;  %vm1008_vm13 = vmor %vm1006_vm12, %vm1007_vm11  ;;  %1194 = vmatpush.msra.mxu1 %v3719_v36  ;;  %v1058_v56 = vadd.f32 %v3647_v59, %v1046_v32 }
0x1346   :  { %v1002_v6 = vmul.f32 %v2917_v19, %v1001_v20  ;;  %v1021_v33 = vmul.f32 %v3693_v54, %v3678_v8  ;;  %1259 = vmatpush.msrb.mxu2 %v3719_v36  ;;  %vm1027_vm2 = vweird.f32 %v3693_v54 }
0x1347   :  { %v1045_v46 = vmul.f32 %v3638_v2, %v1033_v18  ;;  %1195 = vmatpush.msra.mxu1 %v3729_v52  ;;  %vm1028_vm4 = vmor %vm1026_vm3, %vm1027_vm2 }
0x1348   :  { %v1003_v22 = vmul.f32 0.5, %v1002_v6  ;;  %v1022_v40 = vmul.f32 %v3693_v54, %v1021_v33  ;;  %1260 = vmatpush.msrb.mxu2 %v3729_v52  ;;  %1196 = vmatmul.f32.vlgmr.msra.gmra.mxu1 %v3180_v15 }
0x1349   :  { %v2921_v30 = vpop.eup %2920  ;;  %v1057_v23 = vadd.f32 %v3647_v59, %v1045_v46  ;;  %1322 = vmatpush.msrb.mxu1 %v3706_v26 }
0x134a   :  { %v1004_v43 = vsub.f32 1.5, %v1003_v22  ;;  %v1011_v21 = vmul.f32 %v2921_v30, %v3680_v13  ;;  %v1023_v57 = vmul.f32 0.5, %v1022_v40  ;;  %vm1017_vm14 = vweird.f32 %v2921_v30  ;;  %1387 = vmatpush.msra.mxu2 %v3706_v26 }
0x134b   :  { %vm1018_vm0 = vmor %vm1016_vm15, %vm1017_vm14  ;;  %1323 = vmatpush.msrb.mxu1 %v3711_v48 }
0x134c   :  { %v1005_v3 = vmul.f32 %v2917_v19, %v1004_v43  ;;  %v1012_v35 = vmul.f32 %v2921_v30, %v1011_v21  ;;  %v1024_v41 = vsub.f32 1.5, %v1023_v57  ;;  %1388 = vmatpush.msra.mxu2 %v3711_v48 }
0x134d   :  { %2772 = vmatmul.msk.f32.gmra.mxu3 %vm270_vm6, %v1057_v23  ;;  %1324 = vmatpush.msrb.mxu1 %v3719_v36 }
0x134e   :  { %v1013_v53 = vmul.f32 0.5, %v1012_v35  ;;  %v1009_v38 = vsel %vm1008_vm13, %v2917_v19, %v1005_v3  ;;  %1389 = vmatpush.msra.mxu2 %v3719_v36  ;;  %v1025_v39 = vmul.f32 %v3693_v54, %v1024_v41 }
0x134f   :  { %v1035_v55 = vmul.f32 %v1009_v38, %v939_v50  ;;  %1325 = vmatpush.msrb.mxu1 %v3729_v52 }
0x1350   :  { %v1014_v49 = vsub.f32 1.5, %v1013_v53  ;;  %1390 = vmatpush.msra.mxu2 %v3729_v52  ;;  %v1029_v47 = vsel %vm1028_vm4, %v3693_v54, %v1025_v39 }
0x1351   :  { %v1047_v1 = vmul.f32 %v3638_v2, %v1035_v55  ;;  %1452 = vmatpush.msra.mxu1 %v3706_v26  ;;  %v1037_v62 = vmul.f32 %v1029_v47, %v941_v61 }
0x1352   :  { %v1015_v60 = vmul.f32 %v2921_v30, %v1014_v49 }
0x1353   :  { %v1059_v29 = vadd.f32 %v3647_v59, %v1047_v1  ;;  %1453 = vmatpush.msra.mxu1 %v3711_v48  ;;  %v1049_v0 = vmul.f32 %v3638_v2, %v1037_v62 }
0x1354   :  { %v1019_v34 = vsel %vm1018_vm0, %v2921_v30, %v1015_v60 }
0x1355   :  { %2773 = vmatmul.msk.f32.gmra.mxu3 %vm270_vm6, %v1058_v56  ;;  %v1036_v37 = vmul.f32 %v1019_v34, %v940_v25  ;;  %1454 = vmatpush.msra.mxu1 %v3719_v36  ;;  %v1061_v7 = vadd.f32 %v3647_v59, %v1049_v0 }
0x1357   :  { %v1048_v51 = vmul.f32 %v3638_v2, %v1036_v37  ;;  %1455 = vmatpush.msra.mxu1 %v3729_v52 }
0x1359   :  { %v1060_v63 = vadd.f32 %v3647_v59, %v1048_v51 }
0x135d   :  { %2774 = vmatmul.msk.f32.gmra.mxu3 %vm270_vm6, %v1059_v29 }
0x1365   :  { %2775 = vmatmul.msk.f32.gmra.mxu3 %vm270_vm6, %v1060_v63 }
0x136d   :  { %2776 = vmatmul.msk.f32.gmra.mxu3 %vm270_vm6, %v1061_v7 }
0x13b8   :  { %v1115_v8 = vpop.f32.mrf.mxu3 }
0x13b9   :  { %v3807_v54 = vadd.f32 %v2834_v58, %v1115_v8 }
0x13c0   :  { %v1118_v27 = vpop.f32.mrf.mxu3 }
0x13c1   :  { %v3771_v10 = vadd.f32 %v2834_v58, %v1118_v27 }
0x13c5   :  { %v1197_v22 = vpop.f32.mrf.mxu1 }
0x13c8   :  { %v1121_v31 = vpop.f32.mrf.mxu3 }
0x13c9   :  { %v3773_v11 = vadd.f32 %v2834_v58, %v1121_v31 }
0x13d0   :  { %v1124_v12 = vpop.f32.mrf.mxu3 }
0x13d1   :  { %v3775_v13 = vadd.f32 %v2834_v58, %v1124_v12 }
0x13d8   :  { %v1127_v14 = vpop.f32.mrf.mxu3 }
0x13d9   :  { %v3777_v2 = vadd.f32 %v2834_v58, %v1127_v14 }
0x13db   :  { %v1161_v59 = vsel %vm3396_vm1, %v3775_v13, %v3777_v2  ;;  %v1165_v16 = vsel %vm3396_vm1, %v3777_v2, %v3775_v13 }
0x13e0   :  { %v1130_v19 = vpop.f32.mrf.mxu3 }
0x13e1   :  { %v3787_v45 = vadd.f32 %v2834_v58, %v1130_v19 }
0x13e3   :  { %v1157_v17 = vsel %vm3396_vm1, %v3773_v11, %v3787_v45  ;;  %v1169_v4 = vsel %vm3396_vm1, %v3787_v45, %v3773_v11 }
0x13e8   :  { %v1133_v20 = vpop.f32.mrf.mxu3 }
0x13e9   :  { %v3797_v5 = vadd.f32 %v2834_v58, %v1133_v20 }
0x13eb   :  { %v1153_v18 = vsel %vm3396_vm1, %v3771_v10, %v3797_v5  ;;  %v1173_v6 = vsel %vm3396_vm1, %v3797_v5, %v3771_v10 }
0x13f0   :  { %v1136_v46 = vpop.f32.mrf.mxu3 }
0x13f1   :  { %v3809_v9 = vadd.f32 %v2834_v58, %v1136_v46 }
0x13f3   :  { %v1149_v30 = vsel %vm3396_vm1, %v3807_v54, %v3809_v9  ;;  %v1177_v42 = vsel %vm3396_vm1, %v3809_v9, %v3807_v54 }
0x13f4   :  { %v1198_v43 = vadd.f32 %v1197_v22, %v1149_v30 }
0x13f6   :  { %2922 = vtanh.f32 %v1198_v43  ;;  %v2777_v44 = vmul.f32 -1.442695, %v1198_v43 }
0x13f8   :  { %2924 = vpow2.f32 %v2777_v44 }
0x13fc   :  { %v2923_v21 = vpop.eup %2922 }
0x13fd   :  { %1222 = vrot.lane.b32.xlu2 %v2923_v21, %s3181_s27 }
0x13fe   :  { %v2925_v23 = vpop.eup %2924 }
0x13ff   :  { %v1203_v3 = vadd.f32 1.0, %v2925_v23 }
0x1401   :  { %2926 = vrcp.f32 %v1203_v3  ;;  %v1215_v40 = vand.u32 2147483648, %v1203_v3  ;;  %vm1209_vm7 = vweird.f32 %v1203_v3  ;;  %v1213_v49 = vand.u32 2147483647, %v1203_v3 }
0x1403   :  { %v1216_v55 = vor.u32 1.1754944e-38, %v1215_v40  ;;  %vm1214_vm10 = vcmp.eq.f32.partialorder %v1213_v49, 8.507059e+37 }
0x1407   :  { %v2927_v33 = vpop.eup %2926 }
0x1408   :  { %v1205_v35 = vmul.f32 %v2927_v33, %v1203_v3  ;;  %vm1210_vm5 = vweird.f32 %v2927_v33 }
0x1409   :  { %vm1211_vm8 = vmor %vm1209_vm7, %vm1210_vm5 }
0x140a   :  { %v1206_v53 = vsub.f32 1.0, %v1205_v35 }
0x140c   :  { %v1207_v32 = vmul.f32 %v2927_v33, %v1206_v53 }
0x140e   :  { %v1208_v38 = vadd.f32 %v2927_v33, %v1207_v32 }
0x1410   :  { %v1212_v50 = vsel %vm1211_vm8, %v2927_v33, %v1208_v38 }
0x1411   :  { %v1217_v57 = vsel %vm1214_vm10, %v1216_v55, %v1212_v50 }
0x1412   :  { %v1220_v1 = vmul.f32 0.0, %v1217_v57 }
0x1457   :  { %v1223_v56 = vpop.permute.xlu2 %1222 }
0x1458   :  { %v1225_v60 = vmul.f32 %v1223_v56, %v1217_v57 }
0x145a   :  { %1227 = vrot.lane.b32.xlu0 %v1225_v60, %s3181_s27 }
0x14cc   :  { %v1228_v41 = vpop.permute.xlu0 %1227 }
0x14cd   :  { %v1230_v34 = vadd.f32 %v1228_v41, %v1220_v1 }
0x14cf   :  { %2928 = vtanh.f32 %v1230_v34 }
0x14d5   :  { %v2929_v25 = vpop.eup %2928 }
0x14d6   :  { %1233 = vrot.lane.b32.xlu1 %v2929_v25, %s3181_s27 }
0x1548   :  { %v1234_v29 = vpop.permute.xlu1 %1233 }
0x1549   :  { %v1236_v37 = vmul.f32 %v1234_v29, %v1217_v57 }
0x154b   :  { %1238 = vrot.lane.b32.xlu0 %v1236_v37, %s3182_s22 }
0x15bd   :  { %v1239_v39 = vpop.permute.xlu0 %1238 }
0x15be   :  { %1241 = vst.msk [vmem:[#allocation4] sm:$0xff] %vm270_vm6, %v1239_v39  ;;  %2778 = vmatmul.msk.f32.vlgmr.msrb.gmra.mxu2 %vm270_vm6, %v1239_v39 }
0x15bf   :  { %1517 = vmatpush.msrb.mxu2 %v3706_v26 }
0x15c1   :  { %1518 = vmatpush.msrb.mxu2 %v3711_v48 }
0x15c3   :  { %1519 = vmatpush.msrb.mxu2 %v3719_v36 }
0x15c5   :  { %1520 = vmatpush.msrb.mxu2 %v3729_v52 }
0x1641   :  { %v1262_v51 = vpop.f32.mrf.mxu2 }
0x1642   :  { %v1263_v47 = vadd.f32 %v1262_v51, %v1153_v18 }
0x1644   :  { %2930 = vtanh.f32 %v1263_v47  ;;  %v2779_v62 = vmul.f32 -1.442695, %v1263_v47 }
0x1646   :  { %2932 = vpow2.f32 %v2779_v62 }
0x164a   :  { %v2931_v61 = vpop.eup %2930 }
0x164b   :  { %1287 = vrot.lane.b32.xlu2 %v2931_v61, %s3181_s27 }
0x164c   :  { %v2933_v63 = vpop.eup %2932 }
0x164d   :  { %v1268_v0 = vadd.f32 1.0, %v2933_v63 }
0x164f   :  { %2934 = vrcp.f32 %v1268_v0  ;;  %v1280_v12 = vand.u32 2147483648, %v1268_v0  ;;  %vm1274_vm12 = vweird.f32 %v1268_v0  ;;  %v1278_v14 = vand.u32 2147483647, %v1268_v0 }
0x1651   :  { %v1281_v20 = vor.u32 1.1754944e-38, %v1280_v12  ;;  %vm1279_vm14 = vcmp.eq.f32.partialorder %v1278_v14, 8.507059e+37 }
0x1655   :  { %v2935_v7 = vpop.eup %2934 }
0x1656   :  { %v1270_v8 = vmul.f32 %v2935_v7, %v1268_v0  ;;  %vm1275_vm11 = vweird.f32 %v2935_v7 }
0x1657   :  { %vm1276_vm13 = vmor %vm1274_vm12, %vm1275_vm11 }
0x1658   :  { %v1271_v58 = vsub.f32 1.0, %v1270_v8 }
0x165a   :  { %v1272_v27 = vmul.f32 %v2935_v7, %v1271_v58 }
0x165c   :  { %v1273_v31 = vadd.f32 %v2935_v7, %v1272_v27 }
0x165e   :  { %v1277_v19 = vsel %vm1276_vm13, %v2935_v7, %v1273_v31 }
0x165f   :  { %v1282_v46 = vsel %vm1279_vm14, %v1281_v20, %v1277_v19 }
0x1660   :  { %v1285_v30 = vmul.f32 %v1282_v46, %v1230_v34 }
0x16a5   :  { %v1288_v18 = vpop.permute.xlu2 %1287 }
0x16a6   :  { %v1290_v22 = vmul.f32 %v1288_v18, %v1282_v46 }
0x16a8   :  { %1292 = vrot.lane.b32.xlu1 %v1290_v22, %s3181_s27 }
0x171a   :  { %v1293_v43 = vpop.permute.xlu1 %1292 }
0x171b   :  { %v1295_v21 = vadd.f32 %v1293_v43, %v1285_v30 }
0x171d   :  { %2936 = vtanh.f32 %v1295_v21 }
0x1723   :  { %v2937_v44 = vpop.eup %2936 }
0x1724   :  { %1298 = vrot.lane.b32.xlu0 %v2937_v44, %s3181_s27 }
0x1796   :  { %v1299_v23 = vpop.permute.xlu0 %1298 }
0x1797   :  { %v1301_v3 = vmul.f32 %v1299_v23, %v1282_v46 }
0x1799   :  { %1303 = vrot.lane.b32.xlu2 %v1301_v3, %s3182_s22 }
0x17f3   :  { %v1304_v33 = vpop.permute.xlu2 %1303 }
0x17f4   :  { %1306 = vst.msk [vmem:[#allocation4 + $0x8] sm:$0xff] %vm270_vm6, %v1304_v33  ;;  %2780 = vmatmul.msk.f32.vlgmr.msrb.gmra.mxu1 %vm270_vm6, %v1304_v33 }
0x17f5   :  { %1582 = vmatpush.msrb.mxu1 %v3706_v26 }
0x17f7   :  { %1583 = vmatpush.msrb.mxu1 %v3711_v48 }
0x17f9   :  { %1584 = vmatpush.msrb.mxu1 %v3719_v36 }
0x17fb   :  { %1585 = vmatpush.msrb.mxu1 %v3729_v52 }
0x1871   :  { %v1327_v35 = vpop.f32.mrf.mxu1 }
0x1872   :  { %v1328_v53 = vadd.f32 %v1327_v35, %v1157_v17 }
0x1874   :  { %2938 = vtanh.f32 %v1328_v53  ;;  %v2781_v38 = vmul.f32 -1.442695, %v1328_v53 }
0x1876   :  { %2940 = vpow2.f32 %v2781_v38 }
0x187a   :  { %v2939_v32 = vpop.eup %2938 }
0x187b   :  { %1352 = vrot.lane.b32.xlu1 %v2939_v32, %s3181_s27 }
0x187c   :  { %v2941_v40 = vpop.eup %2940 }
0x187d   :  { %v1333_v49 = vadd.f32 1.0, %v2941_v40 }
0x187f   :  { %2942 = vrcp.f32 %v1333_v49  ;;  %v1345_v1 = vand.u32 2147483648, %v1333_v49  ;;  %vm1339_vm0 = vweird.f32 %v1333_v49  ;;  %v1343_v41 = vand.u32 2147483647, %v1333_v49 }
0x1881   :  { %v1346_v34 = vor.u32 1.1754944e-38, %v1345_v1  ;;  %vm1344_vm3 = vcmp.eq.f32.partialorder %v1343_v41, 8.507059e+37 }
0x1885   :  { %v2943_v50 = vpop.eup %2942 }
0x1886   :  { %v1335_v55 = vmul.f32 %v2943_v50, %v1333_v49  ;;  %vm1340_vm15 = vweird.f32 %v2943_v50 }
0x1887   :  { %vm1341_vm2 = vmor %vm1339_vm0, %vm1340_vm15 }
0x1888   :  { %v1336_v56 = vsub.f32 1.0, %v1335_v55 }
0x188a   :  { %v1337_v57 = vmul.f32 %v2943_v50, %v1336_v56 }
0x188c   :  { %v1338_v60 = vadd.f32 %v2943_v50, %v1337_v57 }
0x188e   :  { %v1342_v17 = vsel %vm1341_vm2, %v2943_v50, %v1338_v60 }
0x188f   :  { %v1347_v29 = vsel %vm1344_vm3, %v1346_v34, %v1342_v17 }
0x1890   :  { %v1350_v39 = vmul.f32 %v1347_v29, %v1295_v21 }
0x18ed   :  { %v1353_v25 = vpop.permute.xlu1 %1352 }
0x18ee   :  { %v1355_v37 = vmul.f32 %v1353_v25, %v1347_v29 }
0x18f0   :  { %1357 = vrot.lane.b32.xlu0 %v1355_v37, %s3181_s27 }
0x1962   :  { %v1358_v51 = vpop.permute.xlu0 %1357 }
0x1963   :  { %v1360_v47 = vadd.f32 %v1358_v51, %v1350_v39 }
0x1965   :  { %2944 = vtanh.f32 %v1360_v47 }
0x196b   :  { %v2945_v61 = vpop.eup %2944 }
0x196c   :  { %1363 = vrot.lane.b32.xlu2 %v2945_v61, %s3181_s27 }
0x19c6   :  { %v1364_v62 = vpop.permute.xlu2 %1363 }
0x19c7   :  { %v1366_v63 = vmul.f32 %v1364_v62, %v1347_v29 }
0x19c9   :  { %1368 = vrot.lane.b32.xlu1 %v1366_v63, %s3182_s22 }
0x1a3b   :  { %v1369_v0 = vpop.permute.xlu1 %1368 }
0x1a3c   :  { %1371 = vst.msk [vmem:[#allocation4 + $0x10] sm:$0xff] %vm270_vm6, %v1369_v0  ;;  %2782 = vmatmul.msk.f32.vlgmr.msra.gmra.mxu2 %vm270_vm6, %v1369_v0 }
0x1a3d   :  { %1647 = vmatpush.msra.mxu2 %v3706_v26 }
0x1a3f   :  { %1648 = vmatpush.msra.mxu2 %v3711_v48 }
0x1a41   :  { %1649 = vmatpush.msra.mxu2 %v3719_v36 }
0x1a43   :  { %1650 = vmatpush.msra.mxu2 %v3729_v52 }
0x1abf   :  { %v1392_v7 = vpop.f32.mrf.mxu2 }
0x1ac0   :  { %v1393_v8 = vadd.f32 %v1392_v7, %v1161_v59 }
0x1ac2   :  { %2946 = vtanh.f32 %v1393_v8  ;;  %v2783_v27 = vmul.f32 -1.442695, %v1393_v8 }
0x1ac4   :  { %2948 = vpow2.f32 %v2783_v27 }
0x1ac8   :  { %v2947_v58 = vpop.eup %2946 }
0x1ac9   :  { %1417 = vrot.lane.b32.xlu0 %v2947_v58, %s3181_s27 }
0x1aca   :  { %v2949_v26 = vpop.eup %2948 }
0x1acb   :  { %v1398_v31 = vadd.f32 1.0, %v2949_v26 }
0x1acd   :  { %2950 = vrcp.f32 %v1398_v31  ;;  %v1410_v19 = vand.u32 2147483648, %v1398_v31  ;;  %vm1404_vm5 = vweird.f32 %v1398_v31  ;;  %v1408_v20 = vand.u32 2147483647, %v1398_v31 }
0x1acf   :  { %v1411_v18 = vor.u32 1.1754944e-38, %v1410_v19  ;;  %vm1409_vm8 = vcmp.eq.f32.partialorder %v1408_v20, 8.507059e+37 }
0x1ad3   :  { %v2951_v48 = vpop.eup %2950 }
0x1ad4   :  { %v1400_v36 = vmul.f32 %v2951_v48, %v1398_v31  ;;  %vm1405_vm4 = vweird.f32 %v2951_v48 }
0x1ad5   :  { %vm1406_vm7 = vmor %vm1404_vm5, %vm1405_vm4 }
0x1ad6   :  { %v1401_v12 = vsub.f32 1.0, %v1400_v36 }
0x1ad8   :  { %v1402_v52 = vmul.f32 %v2951_v48, %v1401_v12 }
0x1ada   :  { %v1403_v14 = vadd.f32 %v2951_v48, %v1402_v52 }
0x1adc   :  { %v1407_v59 = vsel %vm1406_vm7, %v2951_v48, %v1403_v14 }
0x1add   :  { %v1412_v22 = vsel %vm1409_vm8, %v1411_v18, %v1407_v59 }
0x1ade   :  { %v1415_v43 = vmul.f32 %v1412_v22, %v1360_v47 }
0x1b3b   :  { %v1418_v46 = vpop.permute.xlu0 %1417 }
0x1b3c   :  { %v1420_v30 = vmul.f32 %v1418_v46, %v1412_v22 }
0x1b3e   :  { %1422 = vrot.lane.b32.xlu2 %v1420_v30, %s3181_s27 }
0x1b98   :  { %v1423_v21 = vpop.permute.xlu2 %1422 }
0x1b99   :  { %v1425_v44 = vadd.f32 %v1423_v21, %v1415_v43 }
0x1b9b   :  { %2952 = vtanh.f32 %v1425_v44 }
0x1ba1   :  { %v2953_v23 = vpop.eup %2952 }
0x1ba2   :  { %1428 = vrot.lane.b32.xlu1 %v2953_v23, %s3181_s27 }
0x1c14   :  { %v1429_v3 = vpop.permute.xlu1 %1428 }
0x1c15   :  { %v1431_v33 = vmul.f32 %v1429_v3, %v1412_v22 }
0x1c17   :  { %1433 = vrot.lane.b32.xlu0 %v1431_v33, %s3182_s22 }
0x1c89   :  { %v1434_v35 = vpop.permute.xlu0 %1433 }
0x1c8a   :  { %1436 = vst.msk [vmem:[#allocation4 + $0x18] sm:$0xff] %vm270_vm6, %v1434_v35  ;;  %2784 = vmatmul.msk.f32.vlgmr.msra.gmra.mxu1 %vm270_vm6, %v1434_v35  ;;  %v1705_v35 = vld [vmem:[#allocation4 + $0x10] sm:$0xff] }
0x1c91   :  { %v1709_v63 = vld [vmem:[#allocation4 + $0x18] sm:$0xff] }
0x1d07   :  { %v1457_v53 = vpop.f32.mrf.mxu1 }
0x1d08   :  { %v1458_v32 = vadd.f32 %v1457_v53, %v1165_v16 }
0x1d0a   :  { %2954 = vtanh.f32 %v1458_v32  ;;  %v2785_v40 = vmul.f32 -1.442695, %v1458_v32 }
0x1d0c   :  { %2956 = vpow2.f32 %v2785_v40 }
0x1d10   :  { %v2955_v38 = vpop.eup %2954 }
0x1d11   :  { %1482 = vrot.lane.b32.xlu2 %v2955_v38, %s3181_s27 }
0x1d12   :  { %v2957_v49 = vpop.eup %2956 }
0x1d13   :  { %v1463_v50 = vadd.f32 1.0, %v2957_v49 }
0x1d15   :  { %2958 = vrcp.f32 %v1463_v50  ;;  %v1475_v41 = vand.u32 2147483648, %v1463_v50  ;;  %vm1469_vm11 = vweird.f32 %v1463_v50  ;;  %v1473_v17 = vand.u32 2147483647, %v1463_v50 }
0x1d17   :  { %v1476_v2 = vor.u32 1.1754944e-38, %v1475_v41  ;;  %vm1474_vm13 = vcmp.eq.f32.partialorder %v1473_v17, 8.507059e+37 }
0x1d1b   :  { %v2959_v55 = vpop.eup %2958 }
0x1d1c   :  { %v1465_v56 = vmul.f32 %v2959_v55, %v1463_v50  ;;  %vm1470_vm10 = vweird.f32 %v2959_v55 }
0x1d1d   :  { %vm1471_vm12 = vmor %vm1469_vm11, %vm1470_vm10 }
0x1d1e   :  { %v1466_v57 = vsub.f32 1.0, %v1465_v56 }
0x1d20   :  { %v1467_v60 = vmul.f32 %v2959_v55, %v1466_v57 }
0x1d22   :  { %v1468_v1 = vadd.f32 %v2959_v55, %v1467_v60 }
0x1d24   :  { %v1472_v13 = vsel %vm1471_vm12, %v2959_v55, %v1468_v1 }
0x1d25   :  { %v1477_v34 = vsel %vm1474_vm13, %v1476_v2, %v1472_v13 }
0x1d26   :  { %v1480_v29 = vmul.f32 %v1477_v34, %v1425_v44 }
0x1d6b   :  { %v1483_v16 = vpop.permute.xlu2 %1482 }
0x1d6c   :  { %v1485_v25 = vmul.f32 %v1483_v16, %v1477_v34 }
0x1d6e   :  { %1487 = vrot.lane.b32.xlu1 %v1485_v25, %s3181_s27 }
0x1de0   :  { %v1488_v37 = vpop.permute.xlu1 %1487 }
0x1de1   :  { %v1490_v39 = vadd.f32 %v1488_v37, %v1480_v29 }
0x1de3   :  { %2960 = vtanh.f32 %v1490_v39 }
0x1de9   :  { %v2961_v51 = vpop.eup %2960 }
0x1dea   :  { %1493 = vrot.lane.b32.xlu0 %v2961_v51, %s3181_s27 }
0x1e5c   :  { %v1494_v47 = vpop.permute.xlu0 %1493 }
0x1e5d   :  { %v1496_v61 = vmul.f32 %v1494_v47, %v1477_v34 }
0x1e5f   :  { %1498 = vrot.lane.b32.xlu2 %v1496_v61, %s3182_s22 }
0x1eb9   :  { %v1499_v62 = vpop.permute.xlu2 %1498 }
0x1eba   :  { %1501 = vst.msk [vmem:[#allocation4 + $0x20] sm:$0xff] %vm270_vm6, %v1499_v62  ;;  %2786 = vmatmul.msk.f32.vlgmr.msrb.gmra.mxu2 %vm270_vm6, %v1499_v62 }
0x1ec1   :  { %v1710_v0 = vld [vmem:[#allocation4 + $0x20] sm:$0xff] }
0x1ec2   :  { %v1711_v7 = vsel %vm805_vm9, %v1709_v63, %v1710_v0  ;;  %v1715_v8 = vsel %vm805_vm9, %v1710_v0, %v1709_v63  ;;  %v1701_v63 = vld [vmem:[#allocation4 + $0x8] sm:$0xff] }
0x1ec3   :  { %1712 = vst.msk [vmem:[#allocation5 + $0x18] sm:$0xff] %vm270_vm6, %v1711_v7 }
0x1ec4   :  { %1716 = vst.msk [vmem:[#allocation5 + $0x20] sm:$0xff] %vm270_vm6, %v1715_v8 }
0x1f3d   :  { %v1522_v58 = vpop.f32.mrf.mxu2 }
0x1f3e   :  { %v1523_v27 = vadd.f32 %v1522_v58, %v1169_v4 }
0x1f40   :  { %2962 = vtanh.f32 %v1523_v27  ;;  %v2787_v31 = vmul.f32 -1.442695, %v1523_v27 }
0x1f42   :  { %2964 = vpow2.f32 %v2787_v31 }
0x1f46   :  { %v2963_v26 = vpop.eup %2962 }
0x1f47   :  { %1547 = vrot.lane.b32.xlu1 %v2963_v26, %s3181_s27 }
0x1f48   :  { %v2965_v48 = vpop.eup %2964 }
0x1f49   :  { %v1528_v36 = vadd.f32 1.0, %v2965_v48 }
0x1f4b   :  { %2966 = vrcp.f32 %v1528_v36  ;;  %v1540_v59 = vand.u32 2147483648, %v1528_v36  ;;  %vm1534_vm15 = vweird.f32 %v1528_v36  ;;  %v1538_v18 = vand.u32 2147483647, %v1528_v36 }
0x1f4d   :  { %v1541_v45 = vor.u32 1.1754944e-38, %v1540_v59  ;;  %vm1539_vm2 = vcmp.eq.f32.partialorder %v1538_v18, 8.507059e+37 }
0x1f51   :  { %v2967_v12 = vpop.eup %2966 }
0x1f52   :  { %v1530_v52 = vmul.f32 %v2967_v12, %v1528_v36  ;;  %vm1535_vm14 = vweird.f32 %v2967_v12 }
0x1f53   :  { %vm1536_vm0 = vmor %vm1534_vm15, %vm1535_vm14 }
0x1f54   :  { %v1531_v14 = vsub.f32 1.0, %v1530_v52 }
0x1f56   :  { %v1532_v19 = vmul.f32 %v2967_v12, %v1531_v14 }
0x1f58   :  { %v1533_v20 = vadd.f32 %v2967_v12, %v1532_v19 }
0x1f5a   :  { %v1537_v11 = vsel %vm1536_vm0, %v2967_v12, %v1533_v20 }
0x1f5b   :  { %v1542_v46 = vsel %vm1539_vm2, %v1541_v45, %v1537_v11 }
0x1f5c   :  { %v1545_v30 = vmul.f32 %v1542_v46, %v1490_v39 }
0x1fb9   :  { %v1548_v4 = vpop.permute.xlu1 %1547 }
0x1fba   :  { %v1550_v22 = vmul.f32 %v1548_v4, %v1542_v46 }
0x1fbc   :  { %1552 = vrot.lane.b32.xlu0 %v1550_v22, %s3181_s27 }
0x202e   :  { %v1553_v43 = vpop.permute.xlu0 %1552 }
0x202f   :  { %v1555_v21 = vadd.f32 %v1553_v43, %v1545_v30 }
0x2031   :  { %2968 = vtanh.f32 %v1555_v21 }
0x2037   :  { %v2969_v44 = vpop.eup %2968 }
0x2038   :  { %1558 = vrot.lane.b32.xlu2 %v2969_v44, %s3181_s27 }
0x2092   :  { %v1559_v23 = vpop.permute.xlu2 %1558 }
0x2093   :  { %v1561_v3 = vmul.f32 %v1559_v23, %v1542_v46 }
0x2095   :  { %1563 = vrot.lane.b32.xlu1 %v1561_v3, %s3182_s22 }
0x2107   :  { %v1564_v33 = vpop.permute.xlu1 %1563 }
0x2108   :  { %1566 = vst.msk [vmem:[#allocation4 + $0x28] sm:$0xff] %vm270_vm6, %v1564_v33  ;;  %2788 = vmatmul.msk.f32.vlgmr.msrb.gmra.mxu1 %vm270_vm6, %v1564_v33 }
0x210f   :  { %v1706_v53 = vld [vmem:[#allocation4 + $0x28] sm:$0xff] }
0x2110   :  { %v1707_v32 = vsel %vm805_vm9, %v1705_v35, %v1706_v53  ;;  %v1719_v38 = vsel %vm805_vm9, %v1706_v53, %v1705_v35  ;;  %v1960_v35 = vld [vmem:[#allocation9 + $0x18] sm:$0xff] }
0x2111   :  { %1708 = vst.msk [vmem:[#allocation5 + $0x10] sm:$0xff] %vm270_vm6, %v1707_v32  ;;  %2818 = vmatpush.msrb.mxu3 %v1960_v35  ;;  %2001 = vmatpush.msra.mxu1 %v1960_v35  ;;  %v1959_v32 = vld [vmem:[#allocation9 + $0x10] sm:$0xff] }
0x2112   :  { %1720 = vst.msk [vmem:[#allocation5 + $0x28] sm:$0xff] %vm270_vm6, %v1719_v38  ;;  %v1958_v38 = vld [vmem:[#allocation9 + $0x8] sm:$0xff] }
0x2113   :  { %2819 = vmatpush.msrb.mxu3 %v1959_v32  ;;  %2002 = vmatpush.msra.mxu1 %v1959_v32 }
0x2115   :  { %2820 = vmatpush.msrb.mxu3 %v1958_v38  ;;  %2003 = vmatpush.msra.mxu1 %v1958_v38 }
0x2185   :  { %v1587_v40 = vpop.f32.mrf.mxu1 }
0x2186   :  { %v1588_v49 = vadd.f32 %v1587_v40, %v1173_v6  ;;  %v1957_v40 = vld [vmem:[#allocation9] sm:$0xff] }
0x2187   :  { %2821 = vmatpush.msrb.mxu3 %v1957_v40  ;;  %2004 = vmatpush.msra.mxu1 %v1957_v40 }
0x2188   :  { %2970 = vtanh.f32 %v1588_v49  ;;  %v2789_v55 = vmul.f32 -1.442695, %v1588_v49 }
0x218a   :  { %2972 = vpow2.f32 %v2789_v55 }
0x218e   :  { %v2971_v50 = vpop.eup %2970 }
0x218f   :  { %1612 = vrot.lane.b32.xlu0 %v2971_v50, %s3181_s27 }
0x2190   :  { %v2973_v56 = vpop.eup %2972 }
0x2191   :  { %v1593_v57 = vadd.f32 1.0, %v2973_v56 }
0x2193   :  { %2974 = vrcp.f32 %v1593_v57  ;;  %v1605_v2 = vand.u32 2147483648, %v1593_v57  ;;  %vm1599_vm4 = vweird.f32 %v1593_v57  ;;  %v1603_v16 = vand.u32 2147483647, %v1593_v57 }
0x2195   :  { %v1606_v5 = vor.u32 1.1754944e-38, %v1605_v2  ;;  %vm1604_vm7 = vcmp.eq.f32.partialorder %v1603_v16, 8.507059e+37 }
0x2199   :  { %v2975_v60 = vpop.eup %2974 }
0x219a   :  { %v1595_v1 = vmul.f32 %v2975_v60, %v1593_v57  ;;  %vm1600_vm3 = vweird.f32 %v2975_v60 }
0x219b   :  { %vm1601_vm5 = vmor %vm1599_vm4, %vm1600_vm3 }
0x219c   :  { %v1596_v41 = vsub.f32 1.0, %v1595_v1 }
0x219e   :  { %v1597_v17 = vmul.f32 %v2975_v60, %v1596_v41 }
0x21a0   :  { %v1598_v13 = vadd.f32 %v2975_v60, %v1597_v17 }
0x21a2   :  { %v1602_v10 = vsel %vm1601_vm5, %v2975_v60, %v1598_v13 }
0x21a3   :  { %v1607_v34 = vsel %vm1604_vm7, %v1606_v5, %v1602_v10  ;;  %v3930_v5 = vld [vmem:[%s4275_s9] ss:$0 sm:$0xff] }
0x21a4   :  { %v1610_v29 = vmul.f32 %v1607_v34, %v1555_v21 }
0x2201   :  { %v1613_v6 = vpop.permute.xlu0 %1612 }
0x2202   :  { %v1615_v25 = vmul.f32 %v1613_v6, %v1607_v34 }
0x2204   :  { %1617 = vrot.lane.b32.xlu2 %v1615_v25, %s3181_s27  ;;  %v3935_v25 = vld [vmem:[%s4276_s10] ss:$0 sm:$0xff] }
0x225e   :  { %v1618_v37 = vpop.permute.xlu2 %1617 }
0x225f   :  { %v1620_v39 = vadd.f32 %v1618_v37, %v1610_v29 }
0x2261   :  { %2976 = vtanh.f32 %v1620_v39 }
0x2267   :  { %v2977_v51 = vpop.eup %2976 }
0x2268   :  { %1623 = vrot.lane.b32.xlu1 %v2977_v51, %s3181_s27  ;;  %v1697_v51 = vld [vmem:[#allocation4] sm:$0xff] }
0x22da   :  { %v1624_v47 = vpop.permute.xlu1 %1623 }
0x22db   :  { %v1626_v61 = vmul.f32 %v1624_v47, %v1607_v34 }
0x22dd   :  { %1628 = vrot.lane.b32.xlu0 %v1626_v61, %s3182_s22 }
0x234f   :  { %v1629_v62 = vpop.permute.xlu0 %1628 }
0x2350   :  { %1631 = vst.msk [vmem:[#allocation4 + $0x30] sm:$0xff] %vm270_vm6, %v1629_v62  ;;  %2790 = vmatmul.msk.f32.vlgmr.msra.gmra.mxu2 %vm270_vm6, %v1629_v62 }
0x2357   :  { %v1702_v0 = vld [vmem:[#allocation4 + $0x30] sm:$0xff] }
0x2358   :  { %v1703_v7 = vsel %vm805_vm9, %v1701_v63, %v1702_v0  ;;  %v1723_v8 = vsel %vm805_vm9, %v1702_v0, %v1701_v63 }
0x2359   :  { %1704 = vst.msk [vmem:[#allocation5 + $0x8] sm:$0xff] %vm270_vm6, %v1703_v7 }
0x235a   :  { %1724 = vst.msk [vmem:[#allocation5 + $0x30] sm:$0xff] %vm270_vm6, %v1723_v8 }
0x2361   :  { %v1735_v4 = vld [vmem:[#allocation5 + $0x30] sm:$0xff] }
0x2362   :  { %v1755_v46 = vsel %vm270_vm6, %v1735_v4, 0.0  ;;  %v1767_v44 = vmul.f32 %v1735_v4, %v1735_v4 }
0x2364   :  { %v1787_v23 = vsel %vm270_vm6, %v1767_v44, 0.0 }
0x23d3   :  { %v1652_v58 = vpop.f32.mrf.mxu2 }
0x23d4   :  { %v1653_v27 = vadd.f32 %v1652_v58, %v1177_v42 }
0x23d6   :  { %2978 = vtanh.f32 %v1653_v27  ;;  %v2791_v31 = vmul.f32 -1.442695, %v1653_v27 }
0x23d8   :  { %2980 = vpow2.f32 %v2791_v31 }
0x23dc   :  { %v2979_v26 = vpop.eup %2978 }
0x23dd   :  { %1677 = vrot.lane.b32.xlu2 %v2979_v26, %s3181_s27 }
0x23de   :  { %v2981_v48 = vpop.eup %2980 }
0x23df   :  { %v1658_v36 = vadd.f32 1.0, %v2981_v48  ;;  %v3961_v48 = vld [vmem:[#allocation11 + $0x18] sm:$0xff] }
0x23e0   :  { %2083 = vmatpush.msrb.mxu2 %v3961_v48  ;;  %2148 = vmatpush.msra.mxu0 %v3961_v48 }
0x23e1   :  { %2982 = vrcp.f32 %v1658_v36  ;;  %v1670_v59 = vand.u32 2147483648, %v1658_v36  ;;  %vm1664_vm10 = vweird.f32 %v1658_v36  ;;  %v1668_v18 = vand.u32 2147483647, %v1658_v36  ;;  %2538 = vmatpush.msra.mxu3 %v3961_v48 }
0x23e3   :  { %v1671_v9 = vor.u32 1.1754944e-38, %v1670_v59  ;;  %vm1669_vm12 = vcmp.eq.f32.partialorder %v1668_v18, 8.507059e+37 }
0x23e7   :  { %v2983_v12 = vpop.eup %2982 }
0x23e8   :  { %v1660_v52 = vmul.f32 %v2983_v12, %v1658_v36  ;;  %vm1665_vm8 = vweird.f32 %v2983_v12  ;;  %v3965_v36 = vld [vmem:[#allocation11 + $0x10] sm:$0xff] }
0x23e9   :  { %vm1666_vm11 = vmor %vm1664_vm10, %vm1665_vm8  ;;  %2084 = vmatpush.msrb.mxu2 %v3965_v36  ;;  %2149 = vmatpush.msra.mxu0 %v3965_v36 }
0x23ea   :  { %v1661_v14 = vsub.f32 1.0, %v1660_v52  ;;  %2539 = vmatpush.msra.mxu3 %v3965_v36 }
0x23ec   :  { %v1662_v19 = vmul.f32 %v2983_v12, %v1661_v14  ;;  %v3970_v14 = vld [vmem:[#allocation11 + $0x8] sm:$0xff] }
0x23ed   :  { %2085 = vmatpush.msrb.mxu2 %v3970_v14  ;;  %2150 = vmatpush.msra.mxu0 %v3970_v14 }
0x23ee   :  { %v1663_v20 = vadd.f32 %v2983_v12, %v1662_v19  ;;  %2540 = vmatpush.msra.mxu3 %v3970_v14 }
0x23f0   :  { %v1667_v54 = vsel %vm1666_vm11, %v2983_v12, %v1663_v20 }
0x23f1   :  { %v1672_v11 = vsel %vm1669_vm12, %v1671_v9, %v1667_v54  ;;  %v3975_v54 = vld [vmem:[#allocation11] sm:$0xff] }
0x23f2   :  { %v1675_v22 = vmul.f32 %v1672_v11, %v1620_v39  ;;  %2086 = vmatpush.msrb.mxu2 %v3975_v54  ;;  %2151 = vmatpush.msra.mxu0 %v3975_v54 }
0x23f3   :  { %2087 = vmatmul.f32.vlgmr.msrb.gmra.mxu2 %v3180_v15  ;;  %2541 = vmatpush.msra.mxu3 %v3975_v54 }
0x23f4   :  { %2278 = vmatpush.msrb.mxu0 %v3961_v48  ;;  %2213 = vmatpush.msra.mxu2 %v3961_v48 }
0x23f6   :  { %2279 = vmatpush.msrb.mxu0 %v3965_v36  ;;  %2214 = vmatpush.msra.mxu2 %v3965_v36 }
0x23f8   :  { %2280 = vmatpush.msrb.mxu0 %v3970_v14  ;;  %2215 = vmatpush.msra.mxu2 %v3970_v14 }
0x23fa   :  { %2281 = vmatpush.msrb.mxu0 %v3975_v54  ;;  %2216 = vmatpush.msra.mxu2 %v3975_v54 }
0x23fc   :  { %2343 = vmatpush.msrb.mxu2 %v3961_v48 }
0x23fe   :  { %2344 = vmatpush.msrb.mxu2 %v3965_v36 }
0x2400   :  { %2345 = vmatpush.msrb.mxu2 %v3970_v14 }
0x2402   :  { %2346 = vmatpush.msrb.mxu2 %v3975_v54 }
0x2437   :  { %v1678_v42 = vpop.permute.xlu2 %1677 }
0x2438   :  { %v1680_v45 = vmul.f32 %v1678_v42, %v1672_v11 }
0x243a   :  { %1682 = vrot.lane.b32.xlu1 %v1680_v45, %s3181_s27 }
0x2464   :  { %1756 = vadd.xlane.f32.xlu1 %v1755_v46 }
0x24ac   :  { %v1683_v30 = vpop.permute.xlu1 %1682 }
0x24ad   :  { %v1685_v43 = vadd.f32 %v1683_v30, %v1675_v22 }
0x24af   :  { %2984 = vtanh.f32 %v1685_v43 }
0x24b5   :  { %v2985_v21 = vpop.eup %2984 }
0x24b6   :  { %1688 = vrot.lane.b32.xlu0 %v2985_v21, %s3181_s27 }
0x24d7   :  { %v1757_v53 = vpop.xlane.xlu1 %1756 }
0x24d8   :  { %v1799_v49 = vmul.f32 0.03125, %v1757_v53 }
0x24da   :  { %v1815_v55 = vmul.f32 %v1799_v49, %v1799_v49  ;;  %v1831_v10 = vsub.f32 %v1735_v4, %v1799_v49 }
0x24e0   :  { %1788 = vadd.xlane.f32.xlu0 %v1787_v23 }
0x2528   :  { %v1689_v3 = vpop.permute.xlu0 %1688 }
0x2529   :  { %v1691_v33 = vmul.f32 %v1689_v3, %v1672_v11 }
0x252b   :  { %1693 = vrot.lane.b32.xlu2 %v1691_v33, %s3182_s22 }
0x2553   :  { %v1789_v50 = vpop.xlane.xlu0 %1788 }
0x2554   :  { %v1807_v56 = vmul.f32 0.03125, %v1789_v50 }
0x2556   :  { %v1823_v57 = vsub.f32 %v1807_v56, %v1815_v55 }
0x2558   :  { %v1839_v60 = vadd.f32 1e-05, %v1823_v57 }
0x255a   :  { %2986 = vrsqrt.f32 %v1839_v60  ;;  %vm1907_vm14 = vweird.f32 %v1839_v60 }
0x2560   :  { %v2987_v1 = vpop.eup %2986 }
0x2561   :  { %v1902_v41 = vmul.f32 %v2987_v1, %v1839_v60  ;;  %vm1908_vm13 = vweird.f32 %v2987_v1 }
0x2562   :  { %vm1909_vm15 = vmor %vm1907_vm14, %vm1908_vm13 }
0x2563   :  { %v1903_v17 = vmul.f32 %v2987_v1, %v1902_v41 }
0x2565   :  { %v1904_v13 = vmul.f32 0.5, %v1903_v17 }
0x2567   :  { %v1905_v2 = vsub.f32 1.5, %v1904_v13 }
0x2569   :  { %v1906_v16 = vmul.f32 %v2987_v1, %v1905_v2 }
0x256b   :  { %v1910_v6 = vsel %vm1909_vm15, %v2987_v1, %v1906_v16  ;;  %v4007_v16 = vld [vmem:[%s4278_s12] ss:$0 sm:$0xff] }
0x256c   :  { %v1927_v34 = vmul.f32 %v1910_v6, %v1831_v10 }
0x256e   :  { %v1939_v29 = vmul.f32 %v3930_v5, %v1927_v34 }
0x2570   :  { %v1951_v37 = vadd.f32 %v3935_v25, %v1939_v29 }
0x2572   :  { %2798 = vmatmul.msk.f32.vlgmr.msrb.gmra.mxu3 %vm270_vm6, %v1951_v37  ;;  %v2088_v37 = vpop.f32.mrf.mxu2 }
0x2585   :  { %v1694_v39 = vpop.permute.xlu2 %1693 }
0x2586   :  { %1696 = vst.msk [vmem:[#allocation4 + $0x38] sm:$0xff] %vm270_vm6, %v1694_v39 }
0x258d   :  { %v1698_v47 = vld [vmem:[#allocation4 + $0x38] sm:$0xff] }
0x258e   :  { %v1727_v61 = vsel %vm805_vm9, %v1698_v47, %v1697_v51  ;;  %v1699_v62 = vsel %vm805_vm9, %v1697_v51, %v1698_v47 }
0x258f   :  { %1728 = vst.msk [vmem:[#allocation5 + $0x38] sm:$0xff] %vm270_vm6, %v1727_v61 }
0x2590   :  { %1700 = vst.msk [vmem:[#allocation5] sm:$0xff] %vm270_vm6, %v1699_v62  ;;  %v4024_v62 = vld [vmem:[#allocation5 + $0x8] sm:$0xff] }
0x2596   :  { %v3947_v63 = vld [vmem:[#allocation5 + $0x38] sm:$0xff] }
0x2597   :  { %v1758_v0 = vsel %vm270_vm6, %v3947_v63, 0.0  ;;  %v3951_v7 = vld [vmem:[#allocation5] sm:$0xff]  ;;  %v1768_v8 = vmul.f32 %v3947_v63, %v3947_v63 }
0x2598   :  { %1759 = vadd.xlane.f32.xlu2 %v1758_v0  ;;  %v1737_v58 = vsel %vm270_vm6, %v3951_v7, 0.0  ;;  %v1761_v26 = vmul.f32 %v3951_v7, %v3951_v7 }
0x2599   :  { %1738 = vadd.xlane.f32.xlu0 %v1737_v58  ;;  %v1790_v27 = vsel %vm270_vm6, %v1768_v8, 0.0 }
0x259a   :  { %1791 = vadd.xlane.f32.xlu1 %v1790_v27  ;;  %v1769_v31 = vsel %vm270_vm6, %v1761_v26, 0.0 }
0x25a0   :  { %1770 = vadd.xlane.f32.xlu2 %v1769_v31 }
0x25f5   :  { %v4002_v2 = vpop.f32.mrf.mxu3 }
0x260b   :  { %v1760_v12 = vpop.xlane.xlu2 %1759 }
0x260c   :  { %v1800_v52 = vmul.f32 0.03125, %v1760_v12  ;;  %v1739_v19 = vpop.xlane.xlu0 %1738 }
0x260d   :  { %v1792_v20 = vpop.xlane.xlu1 %1791  ;;  %v1793_v9 = vmul.f32 0.03125, %v1739_v19 }
0x260e   :  { %v1816_v59 = vmul.f32 %v1800_v52, %v1800_v52  ;;  %v1808_v18 = vmul.f32 0.03125, %v1792_v20  ;;  %v1832_v32 = vsub.f32 %v3947_v63, %v1800_v52  ;;  %v1762_v63 = vmul.f32 %v4024_v62, %v4024_v62 }
0x260f   :  { %v1809_v4 = vmul.f32 %v1793_v9, %v1793_v9  ;;  %v1825_v57 = vsub.f32 %v3951_v7, %v1793_v9  ;;  %v4029_v7 = vld [vmem:[#allocation5 + $0x18] sm:$0xff] }
0x2610   :  { %v1824_v42 = vsub.f32 %v1808_v18, %v1816_v59  ;;  %v1772_v0 = vsel %vm270_vm6, %v1762_v63, 0.0  ;;  %v1746_v8 = vsel %vm270_vm6, %v4029_v7, 0.0 }
0x2612   :  { %v1840_v11 = vadd.f32 1e-05, %v1824_v42 }
0x2613   :  { %v1771_v45 = vpop.xlane.xlu2 %1770 }
0x2614   :  { %2988 = vrsqrt.f32 %v1840_v11  ;;  %v1801_v46 = vmul.f32 0.03125, %v1771_v45  ;;  %vm1917_vm2 = vweird.f32 %v1840_v11 }
0x2616   :  { %v1817_v15 = vsub.f32 %v1801_v46, %v1809_v4  ;;  %v1740_v46 = vsel %vm270_vm6, %v4024_v62, 0.0 }
0x2618   :  { %v1833_v22 = vadd.f32 1e-05, %v1817_v15  ;;  %v4036_v15 = vld [vmem:[#allocation5 + $0x10] sm:$0xff] }
0x261a   :  { %v2989_v30 = vpop.eup %2988  ;;  %2990 = vrsqrt.f32 %v1833_v22  ;;  %vm1847_vm5 = vweird.f32 %v1833_v22 }
0x261b   :  { %v1912_v43 = vmul.f32 %v2989_v30, %v1840_v11  ;;  %vm1918_vm0 = vweird.f32 %v2989_v30 }
0x261c   :  { %vm1919_vm3 = vmor %vm1917_vm2, %vm1918_vm0 }
0x261d   :  { %v1913_v21 = vmul.f32 %v2989_v30, %v1912_v43  ;;  %v1764_v43 = vmul.f32 %v4029_v7, %v4029_v7 }
0x261f   :  { %v1914_v44 = vmul.f32 0.5, %v1913_v21  ;;  %v1778_v21 = vsel %vm270_vm6, %v1764_v43, 0.0 }
0x2620   :  { %v2991_v23 = vpop.eup %2990 }
0x2621   :  { %v1915_v3 = vsub.f32 1.5, %v1914_v44  ;;  %v1842_v33 = vmul.f32 %v2991_v23, %v1833_v22  ;;  %vm1848_vm4 = vweird.f32 %v2991_v23  ;;  %v1763_v22 = vmul.f32 %v4036_v15, %v4036_v15  ;;  %v4044_v44 = vld [vmem:[#allocation5 + $0x20] sm:$0xff] }
0x2622   :  { %vm1849_vm7 = vmor %vm1847_vm5, %vm1848_vm4 }
0x2623   :  { %v1916_v35 = vmul.f32 %v2989_v30, %v1915_v3  ;;  %v1843_v53 = vmul.f32 %v2991_v23, %v1842_v33  ;;  %v1765_v3 = vmul.f32 %v4044_v44, %v4044_v44 }
0x2625   :  { %v1844_v38 = vmul.f32 0.5, %v1843_v53  ;;  %v1920_v40 = vsel %vm1919_vm3, %v2989_v30, %v1916_v35  ;;  %v1775_v30 = vsel %vm270_vm6, %v1763_v22, 0.0  ;;  %v1781_v33 = vsel %vm270_vm6, %v1765_v3, 0.0  ;;  %v4051_v35 = vld [vmem:[#allocation5 + $0x28] sm:$0xff] }
0x2626   :  { %v1928_v49 = vmul.f32 %v1920_v40, %v1832_v32  ;;  %v1766_v53 = vmul.f32 %v4051_v35, %v4051_v35 }
0x2627   :  { %v1845_v50 = vsub.f32 1.5, %v1844_v38 }
0x2628   :  { %v1940_v55 = vmul.f32 %v3930_v5, %v1928_v49  ;;  %v1784_v32 = vsel %vm270_vm6, %v1766_v53, 0.0 }
0x2629   :  { %v1846_v56 = vmul.f32 %v2991_v23, %v1845_v50 }
0x262a   :  { %v1952_v60 = vadd.f32 %v3935_v25, %v1940_v55 }
0x262b   :  { %v1850_v1 = vsel %vm1849_vm7, %v2991_v23, %v1846_v56  ;;  %v1749_v23 = vsel %vm270_vm6, %v4044_v44, 0.0 }
0x262c   :  { %v1921_v41 = vmul.f32 %v1850_v1, %v1825_v57  ;;  %2799 = vmatmul.msk.f32.gmra.mxu3 %vm270_vm6, %v1952_v60 }
0x262e   :  { %v1933_v17 = vmul.f32 %v3930_v5, %v1921_v41 }
0x2630   :  { %v1945_v13 = vadd.f32 %v3935_v25, %v1933_v17 }
0x2632   :  { %2792 = vmatmul.msk.f32.vlgmr.msra.gmra.mxu1 %vm270_vm6, %v1945_v13 }
0x26af   :  { %v2006_v10 = vpop.f32.mrf.mxu1  ;;  %v2027_v6 = vpop.f32.mrf.mxu3 }
0x26b0   :  { %v4010_v34 = vadd.f32 %v4007_v16, %v2006_v10  ;;  %v4013_v29 = vadd.f32 %v4007_v16, %v2027_v6 }
0x26b2   :  { %v2040_v39 = vsel %vm3396_vm1, %v4010_v34, %v4013_v29  ;;  %v2068_v51 = vsel %vm3396_vm1, %v4013_v29, %v4010_v34 }
0x26b3   :  { %v2089_v47 = vadd.f32 %v2088_v37, %v2040_v39 }
0x26b5   :  { %2992 = vtanh.f32 %v2089_v47  ;;  %v2800_v58 = vmul.f32 -1.442695, %v2089_v47 }
0x26b7   :  { %2994 = vpow2.f32 %v2800_v58 }
0x26bb   :  { %v2993_v61 = vpop.eup %2992 }
0x26bc   :  { %2113 = vrot.lane.b32.xlu1 %v2993_v61, %s3181_s27 }
0x26bd   :  { %v2995_v27 = vpop.eup %2994 }
0x26be   :  { %v2094_v26 = vadd.f32 1.0, %v2995_v27 }
0x26c0   :  { %2996 = vrcp.f32 %v2094_v26  ;;  %v2106_v59 = vand.u32 2147483648, %v2094_v26  ;;  %vm2100_vm10 = vweird.f32 %v2094_v26  ;;  %v2104_v18 = vand.u32 2147483647, %v2094_v26 }
0x26c2   :  { %v2107_v42 = vor.u32 1.1754944e-38, %v2106_v59  ;;  %vm2105_vm12 = vcmp.eq.f32.partialorder %v2104_v18, 8.507059e+37 }
0x26c6   :  { %v2997_v31 = vpop.eup %2996 }
0x26c7   :  { %v2096_v12 = vmul.f32 %v2997_v31, %v2094_v26  ;;  %vm2101_vm8 = vweird.f32 %v2997_v31 }
0x26c8   :  { %vm2102_vm11 = vmor %vm2100_vm10, %vm2101_vm8 }
0x26c9   :  { %v2097_v52 = vsub.f32 1.0, %v2096_v12  ;;  %v4073_v12 = vadd.f32 %v4007_v16, %v4002_v2 }
0x26cb   :  { %v2098_v19 = vmul.f32 %v2997_v31, %v2097_v52 }
0x26cd   :  { %v2099_v20 = vadd.f32 %v2997_v31, %v2098_v19 }
0x26cf   :  { %v2103_v9 = vsel %vm2102_vm11, %v2997_v31, %v2099_v20 }
0x26d0   :  { %v2108_v45 = vsel %vm2105_vm12, %v2107_v42, %v2103_v9 }
0x26d1   :  { %v2111_v38 = vmul.f32 0.0, %v2108_v45 }
0x26e6   :  { %1773 = vadd.xlane.f32.xlu1 %v1772_v0 }
0x26ee   :  { %1747 = vadd.xlane.f32.xlu1 %v1746_v8 }
0x272e   :  { %v2114_v11 = vpop.permute.xlu1 %2113 }
0x272f   :  { %v2116_v4 = vmul.f32 %v2114_v11, %v2108_v45 }
0x2731   :  { %2118 = vrot.lane.b32.xlu0 %v2116_v4, %s3181_s27 }
0x2759   :  { %v1774_v55 = vpop.xlane.xlu1 %1773 }
0x275a   :  { %v1802_v60 = vmul.f32 0.03125, %v1774_v55 }
0x275b   :  { %1741 = vadd.xlane.f32.xlu0 %v1740_v46 }
0x2763   :  { %1776 = vadd.xlane.f32.xlu0 %v1775_v30 }
0x276b   :  { %1779 = vadd.xlane.f32.xlu0 %v1778_v21 }
0x2773   :  { %1750 = vadd.xlane.f32.xlu0 %v1749_v23 }
0x277b   :  { %1782 = vadd.xlane.f32.xlu0 %v1781_v33 }
0x2783   :  { %1785 = vadd.xlane.f32.xlu0 %v1784_v32 }
0x27a3   :  { %v2119_v40 = vpop.permute.xlu0 %2118 }
0x27a4   :  { %v4056_v49 = vadd.f32 %v2119_v40, %v2111_v38  ;;  %v1743_v38 = vsel %vm270_vm6, %v4036_v15, 0.0  ;;  %v1752_v40 = vsel %vm270_vm6, %v4051_v35, 0.0 }
0x27a6   :  { %2998 = vtanh.f32 %v4056_v49 }
0x27ac   :  { %v2999_v50 = vpop.eup %2998 }
0x27ad   :  { %2124 = vrot.lane.b32.xlu2 %v2999_v50, %s3181_s27 }
0x27ce   :  { %v1742_v56 = vpop.xlane.xlu0 %1741 }
0x27cf   :  { %v1794_v57 = vmul.f32 0.03125, %v1742_v56 }
0x27d1   :  { %v1810_v1 = vmul.f32 %v1794_v57, %v1794_v57  ;;  %v1826_v61 = vsub.f32 %v4024_v62, %v1794_v57 }
0x27d3   :  { %v1818_v41 = vsub.f32 %v1802_v60, %v1810_v1 }
0x27d5   :  { %v1834_v17 = vadd.f32 1e-05, %v1818_v41  ;;  %v1748_v41 = vpop.xlane.xlu1 %1747 }
0x27d6   :  { %v1777_v60 = vpop.xlane.xlu0 %1776 }
0x27d7   :  { %3000 = vrsqrt.f32 %v1834_v17  ;;  %vm1857_vm14 = vweird.f32 %v1834_v17 }
0x27dd   :  { %v3001_v13 = vpop.eup %3000 }
0x27de   :  { %v1852_v10 = vmul.f32 %v3001_v13, %v1834_v17  ;;  %vm1858_vm13 = vweird.f32 %v3001_v13  ;;  %v1780_v1 = vpop.xlane.xlu0 %1779 }
0x27df   :  { %vm1859_vm15 = vmor %vm1857_vm14, %vm1858_vm13 }
0x27e0   :  { %v1853_v6 = vmul.f32 %v3001_v13, %v1852_v10  ;;  %v1804_v10 = vmul.f32 0.03125, %v1780_v1 }
0x27e2   :  { %v1854_v37 = vmul.f32 0.5, %v1853_v6 }
0x27e4   :  { %v1855_v39 = vsub.f32 1.5, %v1854_v37 }
0x27e6   :  { %v1856_v47 = vmul.f32 %v3001_v13, %v1855_v39  ;;  %v1751_v17 = vpop.xlane.xlu0 %1750 }
0x27e8   :  { %v1860_v63 = vsel %vm1859_vm15, %v3001_v13, %v1856_v47  ;;  %v1796_v13 = vmul.f32 0.03125, %v1748_v41  ;;  %v4101_v47 = vmul.f32 0.03125, %v1751_v17 }
0x27e9   :  { %v1922_v0 = vmul.f32 %v1860_v63, %v1826_v61 }
0x27ea   :  { %v1812_v6 = vmul.f32 %v1796_v13, %v1796_v13  ;;  %v1813_v63 = vmul.f32 %v4101_v47, %v4101_v47 }
0x27eb   :  { %v1934_v8 = vmul.f32 %v3930_v5, %v1922_v0 }
0x27ec   :  { %v1820_v37 = vsub.f32 %v1804_v10, %v1812_v6 }
0x27ed   :  { %v1946_v58 = vadd.f32 %v3935_v25, %v1934_v8 }
0x27ee   :  { %v1783_v39 = vpop.xlane.xlu0 %1782 }
0x27ef   :  { %2793 = vmatmul.msk.f32.gmra.mxu1 %vm270_vm6, %v1946_v58  ;;  %v1805_v61 = vmul.f32 0.03125, %v1783_v39 }
0x27f1   :  { %v1821_v0 = vsub.f32 %v1805_v61, %v1813_v63  ;;  %v1828_v63 = vsub.f32 %v4029_v7, %v1796_v13 }
0x2807   :  { %v2125_v27 = vpop.permute.xlu2 %2124 }
0x2808   :  { %v2127_v26 = vmul.f32 %v2125_v27, %v2108_v45  ;;  %v1803_v27 = vmul.f32 0.03125, %v1777_v60 }
0x280a   :  { %2129 = vrot.lane.b32.xlu2 %v2127_v26, %s3182_s22  ;;  %v1837_v26 = vadd.f32 1e-05, %v1821_v0 }
0x280c   :  { %vm1887_vm14 = vweird.f32 %v1837_v26 }
0x2864   :  { %v2130_v31 = vpop.permute.xlu2 %2129 }
0x2865   :  { %2132 = vst.msk [vmem:[#allocation4] sm:$0xff] %vm270_vm6, %v2130_v31  ;;  %2801 = vmatmul.msk.f32.vlgmr.msra.gmra.mxu0 %vm270_vm6, %v2130_v31 }
0x2866   :  { %2408 = vmatpush.msra.mxu0 %v3961_v48 }
0x2868   :  { %2409 = vmatpush.msra.mxu0 %v3965_v36 }
0x286a   :  { %2410 = vmatpush.msra.mxu0 %v3970_v14 }
0x286c   :  { %v2009_v62 = vpop.f32.mrf.mxu1  ;;  %2411 = vmatpush.msra.mxu0 %v3975_v54 }
0x286d   :  { %v4076_v52 = vadd.f32 %v4007_v16, %v2009_v62 }
0x286f   :  { %v2064_v19 = vsel %vm3396_vm1, %v4073_v12, %v4076_v52  ;;  %v2044_v20 = vsel %vm3396_vm1, %v4076_v52, %v4073_v12 }
0x28e2   :  { %v2153_v59 = vpop.f32.mrf.mxu0 }
0x28e3   :  { %v2154_v18 = vadd.f32 %v2153_v59, %v2044_v20 }
0x28e5   :  { %3002 = vtanh.f32 %v2154_v18  ;;  %v2802_v2 = vmul.f32 -1.442695, %v2154_v18 }
0x28e7   :  { %3004 = vpow2.f32 %v2802_v2 }
0x28eb   :  { %v3003_v9 = vpop.eup %3002 }
0x28ec   :  { %2178 = vrot.lane.b32.xlu2 %v3003_v9, %s3181_s27  ;;  %v1786_v9 = vpop.xlane.xlu0 %1785 }
0x28ed   :  { %v3005_v42 = vpop.eup %3004 }
0x28ee   :  { %v2159_v11 = vadd.f32 1.0, %v3005_v42 }
0x28f0   :  { %3006 = vrcp.f32 %v2159_v11  ;;  %v2171_v43 = vand.u32 2147483648, %v2159_v11  ;;  %vm2165_vm2 = vweird.f32 %v2159_v11  ;;  %v2169_v21 = vand.u32 2147483647, %v2159_v11 }
0x28f2   :  { %v2172_v3 = vor.u32 1.1754944e-38, %v2171_v43  ;;  %vm2170_vm4 = vcmp.eq.f32.partialorder %v2169_v21, 8.507059e+37 }
0x28f6   :  { %v3007_v45 = vpop.eup %3006 }
0x28f7   :  { %v2161_v4 = vmul.f32 %v3007_v45, %v2159_v11  ;;  %vm2166_vm0 = vweird.f32 %v3007_v45 }
0x28f8   :  { %vm2167_vm3 = vmor %vm2165_vm2, %vm2166_vm0 }
0x28f9   :  { %v2162_v46 = vsub.f32 1.0, %v2161_v4 }
0x28fb   :  { %v2163_v22 = vmul.f32 %v3007_v45, %v2162_v46 }
0x28fd   :  { %v2164_v30 = vadd.f32 %v3007_v45, %v2163_v22 }
0x28ff   :  { %v2168_v23 = vsel %vm2167_vm3, %v3007_v45, %v2164_v30  ;;  %v1806_v45 = vmul.f32 0.03125, %v1786_v9 }
0x2900   :  { %v4087_v53 = vsel %vm2170_vm4, %v2172_v3, %v2168_v23 }
0x2901   :  { %v2176_v50 = vmul.f32 %v4087_v53, %v4056_v49  ;;  %v1836_v49 = vadd.f32 1e-05, %v1820_v37 }
0x2903   :  { %vm1877_vm11 = vweird.f32 %v1836_v49 }
0x2946   :  { %v2179_v33 = vpop.permute.xlu2 %2178 }
0x2947   :  { %v2181_v32 = vmul.f32 %v2179_v33, %v4087_v53 }
0x2949   :  { %2183 = vrot.lane.b32.xlu2 %v2181_v32, %s3181_s27 }
0x2972   :  { %1744 = vadd.xlane.f32.xlu2 %v1743_v38 }
0x297a   :  { %1753 = vadd.xlane.f32.xlu2 %v1752_v40 }
0x29a3   :  { %v2184_v55 = vpop.permute.xlu2 %2183 }
0x29a4   :  { %v4097_v56 = vadd.f32 %v2184_v55, %v2176_v50 }
0x29a6   :  { %3008 = vtanh.f32 %v4097_v56 }
0x29a7   :  { %3010 = vrsqrt.f32 %v1836_v49 }
0x29a8   :  { %3012 = vrsqrt.f32 %v1837_v26 }
0x29ac   :  { %v3009_v57 = vpop.eup %3008 }
0x29ad   :  { %2189 = vrot.lane.b32.xlu1 %v3009_v57, %s3181_s27  ;;  %v3011_v62 = vpop.eup %3010 }
0x29ae   :  { %v1872_v59 = vmul.f32 %v3011_v62, %v1836_v49  ;;  %v3013_v46 = vpop.eup %3012  ;;  %vm1878_vm7 = vweird.f32 %v3011_v62 }
0x29af   :  { %v1882_v23 = vmul.f32 %v3013_v46, %v1837_v26  ;;  %vm1879_vm12 = vmor %vm1877_vm11, %vm1878_vm7  ;;  %vm1888_vm13 = vweird.f32 %v3013_v46 }
0x29b0   :  { %v1873_v11 = vmul.f32 %v3011_v62, %v1872_v59  ;;  %vm1889_vm15 = vmor %vm1887_vm14, %vm1888_vm13 }
0x29b1   :  { %v1883_v38 = vmul.f32 %v3013_v46, %v1882_v23 }
0x29b2   :  { %v1874_v43 = vmul.f32 0.5, %v1873_v11 }
0x29b3   :  { %v1884_v60 = vmul.f32 0.5, %v1883_v38 }
0x29b4   :  { %v1875_v32 = vsub.f32 1.5, %v1874_v43 }
0x29b5   :  { %v1885_v37 = vsub.f32 1.5, %v1884_v60 }
0x29b6   :  { %v1876_v57 = vmul.f32 %v3011_v62, %v1875_v32 }
0x29b8   :  { %v1880_v61 = vsel %vm1879_vm12, %v3011_v62, %v1876_v57  ;;  %v1829_v62 = vsub.f32 %v4044_v44, %v4101_v47 }
0x29e5   :  { %v1745_v8 = vpop.xlane.xlu2 %1744 }
0x29e6   :  { %v1795_v58 = vmul.f32 0.03125, %v1745_v8 }
0x29e8   :  { %v1811_v31 = vmul.f32 %v1795_v58, %v1795_v58  ;;  %v1827_v17 = vsub.f32 %v4036_v15, %v1795_v58 }
0x29ea   :  { %v1819_v20 = vsub.f32 %v1803_v27, %v1811_v31  ;;  %v1924_v27 = vmul.f32 %v1880_v61, %v1828_v63  ;;  %v1886_v31 = vmul.f32 %v3013_v46, %v1885_v37 }
0x29ec   :  { %v1835_v18 = vadd.f32 1e-05, %v1819_v20  ;;  %v1936_v15 = vmul.f32 %v3930_v5, %v1924_v27  ;;  %v1890_v58 = vsel %vm1889_vm15, %v3013_v46, %v1886_v31 }
0x29ed   :  { %v1754_v2 = vpop.xlane.xlu2 %1753  ;;  %v1925_v13 = vmul.f32 %v1890_v58, %v1829_v62 }
0x29ee   :  { %3014 = vrsqrt.f32 %v1835_v18  ;;  %v1798_v42 = vmul.f32 0.03125, %v1754_v2  ;;  %vm1867_vm8 = vweird.f32 %v1835_v18  ;;  %v1948_v7 = vadd.f32 %v3935_v25, %v1936_v15 }
0x29f0   :  { %v1814_v4 = vmul.f32 %v1798_v42, %v1798_v42  ;;  %v1830_v9 = vsub.f32 %v4051_v35, %v1798_v42 }
0x29f2   :  { %v1822_v22 = vsub.f32 %v1806_v45, %v1814_v4 }
0x29f4   :  { %v3015_v30 = vpop.eup %3014  ;;  %v1838_v21 = vadd.f32 1e-05, %v1822_v22 }
0x29f5   :  { %v1862_v3 = vmul.f32 %v3015_v30, %v1835_v18  ;;  %vm1868_vm5 = vweird.f32 %v3015_v30  ;;  %v1937_v18 = vmul.f32 %v3930_v5, %v1925_v13 }
0x29f6   :  { %3016 = vrsqrt.f32 %v1838_v21  ;;  %vm1869_vm10 = vmor %vm1867_vm8, %vm1868_vm5  ;;  %vm1897_vm2 = vweird.f32 %v1838_v21 }
0x29f7   :  { %v1863_v33 = vmul.f32 %v3015_v30, %v1862_v3  ;;  %v1949_v11 = vadd.f32 %v3935_v25, %v1937_v18 }
0x29f9   :  { %v1864_v40 = vmul.f32 0.5, %v1863_v33 }
0x29fb   :  { %v1865_v50 = vsub.f32 1.5, %v1864_v40 }
0x29fc   :  { %v3017_v55 = vpop.eup %3016 }
0x29fd   :  { %v1866_v1 = vmul.f32 %v3015_v30, %v1865_v50  ;;  %v1892_v41 = vmul.f32 %v3017_v55, %v1838_v21  ;;  %vm1898_vm0 = vweird.f32 %v3017_v55 }
0x29fe   :  { %vm1899_vm3 = vmor %vm1897_vm2, %vm1898_vm0 }
0x29ff   :  { %v1870_v10 = vsel %vm1869_vm10, %v3015_v30, %v1866_v1  ;;  %v1893_v39 = vmul.f32 %v3017_v55, %v1892_v41 }
0x2a00   :  { %v1923_v6 = vmul.f32 %v1870_v10, %v1827_v17 }
0x2a01   :  { %v1894_v20 = vmul.f32 0.5, %v1893_v39 }
0x2a02   :  { %v1935_v0 = vmul.f32 %v3930_v5, %v1923_v6 }
0x2a03   :  { %v1895_v49 = vsub.f32 1.5, %v1894_v20 }
0x2a04   :  { %v1947_v8 = vadd.f32 %v3935_v25, %v1935_v0 }
0x2a05   :  { %v1896_v59 = vmul.f32 %v3017_v55, %v1895_v49 }
0x2a06   :  { %2794 = vmatmul.msk.f32.gmra.mxu1 %vm270_vm6, %v1947_v8 }
0x2a07   :  { %v1900_v26 = vsel %vm1899_vm3, %v3017_v55, %v1896_v59 }
0x2a08   :  { %v1926_v2 = vmul.f32 %v1900_v26, %v1830_v9 }
0x2a0a   :  { %v1938_v44 = vmul.f32 %v3930_v5, %v1926_v2 }
0x2a0c   :  { %v1950_v47 = vadd.f32 %v3935_v25, %v1938_v44 }
0x2a0e   :  { %2795 = vmatmul.msk.f32.gmra.mxu1 %vm270_vm6, %v1948_v7 }
0x2a16   :  { %2796 = vmatmul.msk.f32.gmra.mxu1 %vm270_vm6, %v1949_v11 }
0x2a1e   :  { %2797 = vmatmul.msk.f32.gmra.mxu1 %vm270_vm6, %v1950_v47 }
0x2a1f   :  { %v2190_v45 = vpop.permute.xlu1 %2189 }
0x2a20   :  { %v2192_v4 = vmul.f32 %v2190_v45, %v4087_v53 }
0x2a22   :  { %2194 = vrot.lane.b32.xlu1 %v2192_v4, %s3182_s22 }
0x2a83   :  { %v2012_v46 = vpop.f32.mrf.mxu1 }
0x2a84   :  { %v4144_v21 = vadd.f32 %v4007_v16, %v2012_v46 }
0x2a8b   :  { %v2015_v22 = vpop.f32.mrf.mxu1 }
0x2a8c   :  { %v4125_v35 = vadd.f32 %v4007_v16, %v2015_v22 }
0x2a93   :  { %v2018_v30 = vpop.f32.mrf.mxu1 }
0x2a94   :  { %v4128_v42 = vadd.f32 %v4007_v16, %v2018_v30  ;;  %v2195_v43 = vpop.permute.xlu1 %2194 }
0x2a95   :  { %2197 = vst.msk [vmem:[#allocation4 + $0x8] sm:$0xff] %vm270_vm6, %v2195_v43  ;;  %2803 = vmatmul.msk.f32.vlgmr.msra.gmra.mxu2 %vm270_vm6, %v2195_v43 }
0x2a96   :  { %v2052_v5 = vsel %vm3396_vm1, %v4125_v35, %v4128_v42  ;;  %v2056_v25 = vsel %vm3396_vm1, %v4128_v42, %v4125_v35  ;;  %2473 = vmatpush.msra.mxu2 %v3961_v48 }
0x2a98   :  { %2474 = vmatpush.msra.mxu2 %v3965_v36 }
0x2a9a   :  { %2475 = vmatpush.msra.mxu2 %v3970_v14 }
0x2a9b   :  { %v2021_v53 = vpop.f32.mrf.mxu1 }
0x2a9c   :  { %v4147_v23 = vadd.f32 %v4007_v16, %v2021_v53  ;;  %2476 = vmatpush.msra.mxu2 %v3975_v54 }
0x2a9e   :  { %v2060_v3 = vsel %vm3396_vm1, %v4147_v23, %v4144_v21  ;;  %v2048_v48 = vsel %vm3396_vm1, %v4144_v21, %v4147_v23 }
0x2b18   :  { %v2218_v36 = vpop.f32.mrf.mxu2 }
0x2b19   :  { %v2219_v14 = vadd.f32 %v2218_v36, %v2048_v48 }
0x2b1b   :  { %3018 = vtanh.f32 %v2219_v14  ;;  %v2804_v16 = vmul.f32 -1.442695, %v2219_v14 }
0x2b1d   :  { %3020 = vpow2.f32 %v2804_v16 }
0x2b21   :  { %v3019_v33 = vpop.eup %3018 }
0x2b22   :  { %2243 = vrot.lane.b32.xlu2 %v3019_v33, %s3181_s27 }
0x2b23   :  { %v3021_v32 = vpop.eup %3020 }
0x2b24   :  { %v2224_v54 = vadd.f32 1.0, %v3021_v32 }
0x2b26   :  { %3022 = vrcp.f32 %v2224_v54  ;;  %v2236_v60 = vand.u32 2147483648, %v2224_v54  ;;  %vm2230_vm5 = vweird.f32 %v2224_v54  ;;  %v2234_v1 = vand.u32 2147483647, %v2224_v54 }
0x2b28   :  { %v2237_v17 = vor.u32 1.1754944e-38, %v2236_v60  ;;  %vm2235_vm8 = vcmp.eq.f32.partialorder %v2234_v1, 8.507059e+37 }
0x2b2c   :  { %v3023_v38 = vpop.eup %3022 }
0x2b2d   :  { %v2226_v40 = vmul.f32 %v3023_v38, %v2224_v54  ;;  %vm2231_vm4 = vweird.f32 %v3023_v38 }
0x2b2e   :  { %vm2232_vm7 = vmor %vm2230_vm5, %vm2231_vm4 }
0x2b2f   :  { %v2227_v50 = vsub.f32 1.0, %v2226_v40 }
0x2b31   :  { %v2228_v55 = vmul.f32 %v3023_v38, %v2227_v50 }
0x2b33   :  { %v2229_v57 = vadd.f32 %v3023_v38, %v2228_v55 }
0x2b35   :  { %v2233_v41 = vsel %vm2232_vm7, %v3023_v38, %v2229_v57 }
0x2b36   :  { %v2238_v6 = vsel %vm2235_vm8, %v2237_v17, %v2233_v41 }
0x2b37   :  { %v2241_v39 = vmul.f32 %v2238_v6, %v4097_v56 }
0x2b7c   :  { %v2244_v10 = vpop.permute.xlu2 %2243 }
0x2b7d   :  { %v2246_v37 = vmul.f32 %v2244_v10, %v2238_v6 }
0x2b7f   :  { %2248 = vrot.lane.b32.xlu0 %v2246_v37, %s3181_s27 }
0x2bf1   :  { %v2249_v61 = vpop.permute.xlu0 %2248 }
0x2bf2   :  { %v2251_v63 = vadd.f32 %v2249_v61, %v2241_v39 }
0x2bf4   :  { %3024 = vtanh.f32 %v2251_v63 }
0x2bfa   :  { %v3025_v0 = vpop.eup %3024 }
0x2bfb   :  { %2254 = vrot.lane.b32.xlu1 %v3025_v0, %s3181_s27 }
0x2c6d   :  { %v2255_v8 = vpop.permute.xlu1 %2254 }
0x2c6e   :  { %v2257_v27 = vmul.f32 %v2255_v8, %v2238_v6 }
0x2c70   :  { %2259 = vrot.lane.b32.xlu1 %v2257_v27, %s3182_s22 }
0x2ce2   :  { %v2260_v31 = vpop.permute.xlu1 %2259 }
0x2ce3   :  { %2262 = vst.msk [vmem:[#allocation4 + $0x10] sm:$0xff] %vm270_vm6, %v2260_v31  ;;  %2805 = vmatmul.msk.f32.vlgmr.msrb.gmra.mxu0 %vm270_vm6, %v2260_v31 }
0x2d60   :  { %v2283_v20 = vpop.f32.mrf.mxu0 }
0x2d61   :  { %v2284_v15 = vadd.f32 %v2283_v20, %v2052_v5 }
0x2d63   :  { %3026 = vtanh.f32 %v2284_v15  ;;  %v2806_v56 = vmul.f32 -1.442695, %v2284_v15 }
0x2d65   :  { %3028 = vpow2.f32 %v2806_v56 }
0x2d69   :  { %v3027_v49 = vpop.eup %3026 }
0x2d6a   :  { %2308 = vrot.lane.b32.xlu1 %v3027_v49, %s3181_s27 }
0x2d6b   :  { %v3029_v58 = vpop.eup %3028 }
0x2d6c   :  { %v2289_v62 = vadd.f32 1.0, %v3029_v58 }
0x2d6e   :  { %3030 = vrcp.f32 %v2289_v62  ;;  %v2301_v9 = vand.u32 2147483648, %v2289_v62  ;;  %vm2295_vm11 = vweird.f32 %v2289_v62  ;;  %v2299_v2 = vand.u32 2147483647, %v2289_v62 }
0x2d70   :  { %v2302_v44 = vor.u32 1.1754944e-38, %v2301_v9  ;;  %vm2300_vm13 = vcmp.eq.f32.partialorder %v2299_v2, 8.507059e+37 }
0x2d74   :  { %v3031_v7 = vpop.eup %3030 }
0x2d75   :  { %v2291_v13 = vmul.f32 %v3031_v7, %v2289_v62  ;;  %vm2296_vm10 = vweird.f32 %v3031_v7 }
0x2d76   :  { %vm2297_vm12 = vmor %vm2295_vm11, %vm2296_vm10 }
0x2d77   :  { %v2292_v59 = vsub.f32 1.0, %v2291_v13 }
0x2d79   :  { %v2293_v18 = vmul.f32 %v3031_v7, %v2292_v59 }
0x2d7b   :  { %v2294_v26 = vadd.f32 %v3031_v7, %v2293_v18 }
0x2d7d   :  { %v2298_v11 = vsel %vm2297_vm12, %v3031_v7, %v2294_v26 }
0x2d7e   :  { %v2303_v45 = vsel %vm2300_vm13, %v2302_v44, %v2298_v11 }
0x2d7f   :  { %v2306_v46 = vmul.f32 %v2303_v45, %v2251_v63 }
0x2ddc   :  { %v2309_v47 = vpop.permute.xlu1 %2308 }
0x2ddd   :  { %v2311_v4 = vmul.f32 %v2309_v47, %v2303_v45 }
0x2ddf   :  { %2313 = vrot.lane.b32.xlu0 %v2311_v4, %s3181_s27 }
0x2e51   :  { %v2314_v22 = vpop.permute.xlu0 %2313 }
0x2e52   :  { %v2316_v30 = vadd.f32 %v2314_v22, %v2306_v46 }
0x2e54   :  { %3032 = vtanh.f32 %v2316_v30 }
0x2e5a   :  { %v3033_v43 = vpop.eup %3032 }
0x2e5b   :  { %2319 = vrot.lane.b32.xlu2 %v3033_v43, %s3181_s27 }
0x2eb5   :  { %v2320_v5 = vpop.permute.xlu2 %2319 }
0x2eb6   :  { %v2322_v53 = vmul.f32 %v2320_v5, %v2303_v45 }
0x2eb8   :  { %2324 = vrot.lane.b32.xlu1 %v2322_v53, %s3182_s22  ;;  %v2596_v53 = vld [vmem:[#allocation4 + $0x10] sm:$0xff] }
0x2f2a   :  { %v2325_v48 = vpop.permute.xlu1 %2324 }
0x2f2b   :  { %2327 = vst.msk [vmem:[#allocation4 + $0x18] sm:$0xff] %vm270_vm6, %v2325_v48  ;;  %2807 = vmatmul.msk.f32.vlgmr.msrb.gmra.mxu2 %vm270_vm6, %v2325_v48 }
0x2f32   :  { %v2600_v8 = vld [vmem:[#allocation4 + $0x18] sm:$0xff] }
0x2fae   :  { %v2348_v36 = vpop.f32.mrf.mxu2 }
0x2faf   :  { %v2349_v14 = vadd.f32 %v2348_v36, %v2056_v25 }
0x2fb1   :  { %3034 = vtanh.f32 %v2349_v14  ;;  %v2808_v16 = vmul.f32 -1.442695, %v2349_v14 }
0x2fb3   :  { %3036 = vpow2.f32 %v2808_v16 }
0x2fb7   :  { %v3035_v33 = vpop.eup %3034 }
0x2fb8   :  { %2373 = vrot.lane.b32.xlu0 %v3035_v33, %s3181_s27 }
0x2fb9   :  { %v3037_v32 = vpop.eup %3036 }
0x2fba   :  { %v2354_v54 = vadd.f32 1.0, %v3037_v32 }
0x2fbc   :  { %3038 = vrcp.f32 %v2354_v54  ;;  %v2366_v60 = vand.u32 2147483648, %v2354_v54  ;;  %vm2360_vm15 = vweird.f32 %v2354_v54  ;;  %v2364_v1 = vand.u32 2147483647, %v2354_v54 }
0x2fbe   :  { %v2367_v42 = vor.u32 1.1754944e-38, %v2366_v60  ;;  %vm2365_vm2 = vcmp.eq.f32.partialorder %v2364_v1, 8.507059e+37 }
0x2fc2   :  { %v3039_v38 = vpop.eup %3038 }
0x2fc3   :  { %v2356_v40 = vmul.f32 %v3039_v38, %v2354_v54  ;;  %vm2361_vm14 = vweird.f32 %v3039_v38 }
0x2fc4   :  { %vm2362_vm0 = vmor %vm2360_vm15, %vm2361_vm14 }
0x2fc5   :  { %v2357_v50 = vsub.f32 1.0, %v2356_v40 }
0x2fc7   :  { %v2358_v55 = vmul.f32 %v3039_v38, %v2357_v50 }
0x2fc9   :  { %v2359_v57 = vadd.f32 %v3039_v38, %v2358_v55 }
0x2fcb   :  { %v2363_v35 = vsel %vm2362_vm0, %v3039_v38, %v2359_v57 }
0x2fcc   :  { %v2368_v41 = vsel %vm2365_vm2, %v2367_v42, %v2363_v35 }
0x2fcd   :  { %v2371_v10 = vmul.f32 %v2368_v41, %v2316_v30 }
0x302a   :  { %v2374_v25 = vpop.permute.xlu0 %2373 }
0x302b   :  { %v2376_v17 = vmul.f32 %v2374_v25, %v2368_v41 }
0x302d   :  { %2378 = vrot.lane.b32.xlu2 %v2376_v17, %s3181_s27 }
0x3087   :  { %v2379_v6 = vpop.permute.xlu2 %2378 }
0x3088   :  { %v2381_v37 = vadd.f32 %v2379_v6, %v2371_v10 }
0x308a   :  { %3040 = vtanh.f32 %v2381_v37 }
0x3090   :  { %v3041_v39 = vpop.eup %3040 }
0x3091   :  { %2384 = vrot.lane.b32.xlu1 %v3041_v39, %s3181_s27 }
0x3103   :  { %v2385_v61 = vpop.permute.xlu1 %2384 }
0x3104   :  { %v2387_v63 = vmul.f32 %v2385_v61, %v2368_v41 }
0x3106   :  { %2389 = vrot.lane.b32.xlu0 %v2387_v63, %s3182_s22 }
0x3178   :  { %v2390_v0 = vpop.permute.xlu0 %2389 }
0x3179   :  { %2392 = vst.msk [vmem:[#allocation4 + $0x20] sm:$0xff] %vm270_vm6, %v2390_v0  ;;  %2809 = vmatmul.msk.f32.vlgmr.msra.gmra.mxu0 %vm270_vm6, %v2390_v0  ;;  %v2592_v0 = vld [vmem:[#allocation4 + $0x8] sm:$0xff] }
0x3180   :  { %v2601_v27 = vld [vmem:[#allocation4 + $0x20] sm:$0xff] }
0x3181   :  { %v2602_v31 = vsel %vm805_vm9, %v2600_v8, %v2601_v27  ;;  %v2606_v20 = vsel %vm805_vm9, %v2601_v27, %v2600_v8 }
0x3182   :  { %2603 = vst.msk [vmem:[#allocation5 + $0x18] sm:$0xff] %vm270_vm6, %v2602_v31 }
0x3183   :  { %2607 = vst.msk [vmem:[#allocation5 + $0x20] sm:$0xff] %vm270_vm6, %v2606_v20 }
0x31f6   :  { %v2413_v15 = vpop.f32.mrf.mxu0 }
0x31f7   :  { %v2414_v49 = vadd.f32 %v2413_v15, %v2060_v3 }
0x31f9   :  { %3042 = vtanh.f32 %v2414_v49  ;;  %v2810_v58 = vmul.f32 -1.442695, %v2414_v49 }
0x31fb   :  { %3044 = vpow2.f32 %v2810_v58 }
0x31ff   :  { %v3043_v56 = vpop.eup %3042 }
0x3200   :  { %2438 = vrot.lane.b32.xlu2 %v3043_v56, %s3181_s27 }
0x3201   :  { %v3045_v62 = vpop.eup %3044 }
0x3202   :  { %v2419_v7 = vadd.f32 1.0, %v3045_v62 }
0x3204   :  { %3046 = vrcp.f32 %v2419_v7  ;;  %v2431_v2 = vand.u32 2147483648, %v2419_v7  ;;  %vm2425_vm4 = vweird.f32 %v2419_v7  ;;  %v2429_v11 = vand.u32 2147483647, %v2419_v7 }
0x3206   :  { %v2432_v23 = vor.u32 1.1754944e-38, %v2431_v2  ;;  %vm2430_vm7 = vcmp.eq.f32.partialorder %v2429_v11, 8.507059e+37 }
0x320a   :  { %v3047_v13 = vpop.eup %3046 }
0x320b   :  { %v2421_v59 = vmul.f32 %v3047_v13, %v2419_v7  ;;  %vm2426_vm3 = vweird.f32 %v3047_v13 }
0x320c   :  { %vm2427_vm5 = vmor %vm2425_vm4, %vm2426_vm3 }
0x320d   :  { %v2422_v18 = vsub.f32 1.0, %v2421_v59 }
0x320f   :  { %v2423_v26 = vmul.f32 %v3047_v13, %v2422_v18 }
0x3211   :  { %v2424_v9 = vadd.f32 %v3047_v13, %v2423_v26 }
0x3213   :  { %v2428_v21 = vsel %vm2427_vm5, %v3047_v13, %v2424_v9 }
0x3214   :  { %v2433_v44 = vsel %vm2430_vm7, %v2432_v23, %v2428_v21 }
0x3215   :  { %v2436_v45 = vmul.f32 %v2433_v44, %v2381_v37 }
0x325a   :  { %v2439_v3 = vpop.permute.xlu2 %2438 }
0x325b   :  { %v2441_v47 = vmul.f32 %v2439_v3, %v2433_v44 }
0x325d   :  { %2443 = vrot.lane.b32.xlu1 %v2441_v47, %s3181_s27 }
0x32cf   :  { %v2444_v4 = vpop.permute.xlu1 %2443 }
0x32d0   :  { %v2446_v46 = vadd.f32 %v2444_v4, %v2436_v45 }
0x32d2   :  { %3048 = vtanh.f32 %v2446_v46 }
0x32d8   :  { %v3049_v22 = vpop.eup %3048 }
0x32d9   :  { %2449 = vrot.lane.b32.xlu0 %v3049_v22, %s3181_s27 }
0x334b   :  { %v2450_v30 = vpop.permute.xlu0 %2449 }
0x334c   :  { %v2452_v43 = vmul.f32 %v2450_v30, %v2433_v44 }
0x334e   :  { %2454 = vrot.lane.b32.xlu2 %v2452_v43, %s3182_s22 }
0x33a8   :  { %v2455_v5 = vpop.permute.xlu2 %2454 }
0x33a9   :  { %2457 = vst.msk [vmem:[#allocation4 + $0x28] sm:$0xff] %vm270_vm6, %v2455_v5  ;;  %2811 = vmatmul.msk.f32.vlgmr.msra.gmra.mxu2 %vm270_vm6, %v2455_v5 }
0x33b0   :  { %v2597_v48 = vld [vmem:[#allocation4 + $0x28] sm:$0xff] }
0x33b1   :  { %v2598_v36 = vsel %vm805_vm9, %v2596_v53, %v2597_v48  ;;  %v2610_v14 = vsel %vm805_vm9, %v2597_v48, %v2596_v53 }
0x33b2   :  { %2599 = vst.msk [vmem:[#allocation5 + $0x10] sm:$0xff] %vm270_vm6, %v2598_v36 }
0x33b3   :  { %2611 = vst.msk [vmem:[#allocation5 + $0x28] sm:$0xff] %vm270_vm6, %v2610_v14  ;;  %v2658_v14 = vld [vmem:[#allocation12 + $0x18] sm:$0xff] }
0x33b4   :  { %2678 = vmatpush.msrb.mxu0 %v2658_v14 }
0x342c   :  { %v2478_v33 = vpop.f32.mrf.mxu2 }
0x342d   :  { %v2479_v16 = vadd.f32 %v2478_v33, %v2064_v19  ;;  %v2657_v33 = vld [vmem:[#allocation12 + $0x10] sm:$0xff] }
0x342e   :  { %2679 = vmatpush.msrb.mxu0 %v2657_v33 }
0x342f   :  { %3050 = vtanh.f32 %v2479_v16  ;;  %v2812_v54 = vmul.f32 -1.442695, %v2479_v16  ;;  %v2656_v16 = vld [vmem:[#allocation12 + $0x8] sm:$0xff] }
0x3430   :  { %2680 = vmatpush.msrb.mxu0 %v2656_v16 }
0x3431   :  { %3052 = vpow2.f32 %v2812_v54 }
0x3435   :  { %v3051_v32 = vpop.eup %3050 }
0x3436   :  { %2503 = vrot.lane.b32.xlu1 %v3051_v32, %s3181_s27  ;;  %v2655_v32 = vld [vmem:[#allocation12] sm:$0xff] }
0x3437   :  { %v3053_v38 = vpop.eup %3052  ;;  %2681 = vmatpush.msrb.mxu0 %v2655_v32 }
0x3438   :  { %v2484_v40 = vadd.f32 1.0, %v3053_v38  ;;  %v2690_v38 = vld [vmem:[%s4284_s18 + $0x18] sm:$0xff] }
0x3439   :  { %2710 = vmatpush.msrb.mxu2 %v2690_v38 }
0x343a   :  { %3054 = vrcp.f32 %v2484_v40  ;;  %v2496_v35 = vand.u32 2147483648, %v2484_v40  ;;  %vm2490_vm10 = vweird.f32 %v2484_v40  ;;  %v2494_v42 = vand.u32 2147483647, %v2484_v40 }
0x343c   :  { %v2497_v52 = vor.u32 1.1754944e-38, %v2496_v35  ;;  %vm2495_vm12 = vcmp.eq.f32.partialorder %v2494_v42, 8.507059e+37 }
0x3440   :  { %v3055_v50 = vpop.eup %3054 }
0x3441   :  { %v2486_v55 = vmul.f32 %v3055_v50, %v2484_v40  ;;  %vm2491_vm8 = vweird.f32 %v3055_v50  ;;  %v2689_v40 = vld [vmem:[%s4284_s18 + $0x10] sm:$0xff] }
0x3442   :  { %vm2492_vm11 = vmor %vm2490_vm10, %vm2491_vm8  ;;  %2711 = vmatpush.msrb.mxu2 %v2689_v40 }
0x3443   :  { %v2487_v57 = vsub.f32 1.0, %v2486_v55 }
0x3445   :  { %v2488_v60 = vmul.f32 %v3055_v50, %v2487_v57 }
0x3447   :  { %v2489_v1 = vadd.f32 %v3055_v50, %v2488_v60 }
0x3449   :  { %v2493_v12 = vsel %vm2492_vm11, %v3055_v50, %v2489_v1 }
0x344a   :  { %v2498_v25 = vsel %vm2495_vm12, %v2497_v52, %v2493_v12 }
0x344b   :  { %v2501_v17 = vmul.f32 %v2498_v25, %v2446_v46  ;;  %v2588_v46 = vld [vmem:[#allocation4] sm:$0xff] }
0x34a8   :  { %v2504_v19 = vpop.permute.xlu1 %2503 }
0x34a9   :  { %v2506_v41 = vmul.f32 %v2504_v19, %v2498_v25 }
0x34ab   :  { %2508 = vrot.lane.b32.xlu0 %v2506_v41, %s3181_s27 }
0x351d   :  { %v2509_v10 = vpop.permute.xlu0 %2508 }
0x351e   :  { %v2511_v6 = vadd.f32 %v2509_v10, %v2501_v17  ;;  %v2838_v17 = vld [vmem:[%s4280_s14] ss:$0 sm:$0xff] }
0x3520   :  { %3056 = vtanh.f32 %v2511_v6 }
0x3526   :  { %v3057_v37 = vpop.eup %3056 }
0x3527   :  { %2514 = vrot.lane.b32.xlu2 %v3057_v37, %s3181_s27  ;;  %v2839_v37 = vld [vmem:[%s4281_s15] ss:$0 sm:$0xff] }
0x3581   :  { %v2515_v39 = vpop.permute.xlu2 %2514 }
0x3582   :  { %v2517_v61 = vmul.f32 %v2515_v39, %v2498_v25 }
0x3584   :  { %2519 = vrot.lane.b32.xlu1 %v2517_v61, %s3182_s22 }
0x35f6   :  { %v2520_v63 = vpop.permute.xlu1 %2519 }
0x35f7   :  { %2522 = vst.msk [vmem:[#allocation4 + $0x30] sm:$0xff] %vm270_vm6, %v2520_v63  ;;  %2813 = vmatmul.msk.f32.vlgmr.msra.gmra.mxu3 %vm270_vm6, %v2520_v63  ;;  %v2688_v63 = vld [vmem:[%s4284_s18 + $0x8] sm:$0xff] }
0x35f8   :  { %2712 = vmatpush.msrb.mxu2 %v2688_v63 }
0x35fe   :  { %v2593_v8 = vld [vmem:[#allocation4 + $0x30] sm:$0xff] }
0x35ff   :  { %v2594_v27 = vsel %vm805_vm9, %v2592_v0, %v2593_v8  ;;  %v2614_v31 = vsel %vm805_vm9, %v2593_v8, %v2592_v0  ;;  %v2687_v0 = vld [vmem:[%s4284_s18] sm:$0xff] }
0x3600   :  { %2595 = vst.msk [vmem:[#allocation5 + $0x8] sm:$0xff] %vm270_vm6, %v2594_v27  ;;  %2713 = vmatpush.msrb.mxu2 %v2687_v0  ;;  %v2840_v8 = vld [vmem:[%s4283_s17] ss:$0 sm:$0xff] }
0x3601   :  { %2615 = vst.msk [vmem:[#allocation5 + $0x30] sm:$0xff] %vm270_vm6, %v2614_v31 }
0x367a   :  { %v2543_v20 = vpop.f32.mrf.mxu3 }
0x367b   :  { %v2544_v15 = vadd.f32 %v2543_v20, %v2068_v51 }
0x367d   :  { %3058 = vtanh.f32 %v2544_v15  ;;  %v2814_v56 = vmul.f32 -1.442695, %v2544_v15  ;;  %v2841_v15 = vld [vmem:[#allocation6] ss:$0 sm:$0xff] }
0x367f   :  { %3060 = vpow2.f32 %v2814_v56 }
0x3683   :  { %v3059_v49 = vpop.eup %3058 }
0x3684   :  { %2568 = vrot.lane.b32.xlu0 %v3059_v49, %s3181_s27 }
0x3685   :  { %v3061_v58 = vpop.eup %3060 }
0x3686   :  { %v2549_v62 = vadd.f32 1.0, %v3061_v58 }
0x3688   :  { %3062 = vrcp.f32 %v2549_v62  ;;  %v2561_v28 = vand.u32 2147483648, %v2549_v62  ;;  %vm2555_vm14 = vweird.f32 %v2549_v62  ;;  %v2559_v9 = vand.u32 2147483647, %v2549_v62 }
0x368a   :  { %v2562_v29 = vor.u32 1.1754944e-38, %v2561_v28  ;;  %vm2560_vm15 = vcmp.eq.f32.partialorder %v2559_v9, 8.507059e+37 }
0x368e   :  { %v3063_v7 = vpop.eup %3062 }
0x368f   :  { %v2551_v13 = vmul.f32 %v3063_v7, %v2549_v62  ;;  %vm2556_vm13 = vweird.f32 %v3063_v7 }
0x3690   :  { %vm2557_vm1 = vmor %vm2555_vm14, %vm2556_vm13 }
0x3691   :  { %v2552_v59 = vsub.f32 1.0, %v2551_v13 }
0x3693   :  { %v2553_v18 = vmul.f32 %v3063_v7, %v2552_v59 }
0x3695   :  { %v2554_v26 = vadd.f32 %v3063_v7, %v2553_v18 }
0x3697   :  { %v2558_v34 = vsel %vm2557_vm1, %v3063_v7, %v2554_v26 }
0x3698   :  { %v2563_v2 = vsel %vm2560_vm15, %v2562_v29, %v2558_v34 }
0x3699   :  { %v2566_v21 = vmul.f32 %v2563_v2, %v2511_v6 }
0x36f6   :  { %v2569_v51 = vpop.permute.xlu0 %2568 }
0x36f7   :  { %v2571_v11 = vmul.f32 %v2569_v51, %v2563_v2 }
0x36f9   :  { %2573 = vrot.lane.b32.xlu2 %v2571_v11, %s3181_s27 }
0x3753   :  { %v2574_v23 = vpop.permute.xlu2 %2573 }
0x3754   :  { %v2576_v3 = vadd.f32 %v2574_v23, %v2566_v21 }
0x3756   :  { %3064 = vtanh.f32 %v2576_v3 }
0x375c   :  { %v3065_v44 = vpop.eup %3064 }
0x375d   :  { %2579 = vrot.lane.b32.xlu1 %v3065_v44, %s3181_s27 }
0x37cf   :  { %v2580_v47 = vpop.permute.xlu1 %2579 }
0x37d0   :  { %v2582_v45 = vmul.f32 %v2580_v47, %v2563_v2 }
0x37d2   :  { %2584 = vrot.lane.b32.xlu0 %v2582_v45, %s3182_s22 }
0x3844   :  { %v2585_v4 = vpop.permute.xlu0 %2584 }
0x3845   :  { %2587 = vst.msk [vmem:[#allocation4 + $0x38] sm:$0xff] %vm270_vm6, %v2585_v4 }
0x384c   :  { %v2589_v22 = vld [vmem:[#allocation4 + $0x38] sm:$0xff] }
0x384d   :  { %v2590_v30 = vsel %vm805_vm9, %v2588_v46, %v2589_v22  ;;  %v2618_v43 = vsel %vm805_vm9, %v2589_v22, %v2588_v46 }
0x384e   :  { %2591 = vst.msk [vmem:[#allocation5] sm:$0xff] %vm270_vm6, %v2590_v30 }
0x384f   :  { %2619 = vst.msk [vmem:[#allocation5 + $0x38] sm:$0xff] %vm270_vm6, %v2618_v43 }
0x3856   :  { %v2620_v5 = vld [vmem:[#allocation5 + $0x38] sm:$0xff] }
0x3857   :  { %v2621_v53 = vsel %vm270_vm6, %v2620_v5, 0.0  ;;  %v2624_v48 = vmul.f32 %v2620_v5, %v2620_v5 }
0x3858   :  { %2622 = vadd.xlane.f32.xlu2 %v2621_v53 }
0x3859   :  { %v2625_v36 = vsel %vm270_vm6, %v2624_v48, 0.0 }
0x385a   :  { %2626 = vadd.xlane.f32.xlu1 %v2625_v36 }
0x38cb   :  { %v2623_v24 = vpop.xlane.xlu2 %2622 }
0x38cc   :  { %v2628_v54 = vmul.f32 0.03125, %v2623_v24 }
0x38cd   :  { %v2627_v50 = vpop.xlane.xlu1 %2626 }
0x38ce   :  { %v2630_v55 = vmul.f32 %v2628_v54, %v2628_v54  ;;  %v2629_v57 = vmul.f32 0.03125, %v2627_v50  ;;  %v2632_v41 = vsub.f32 %v2620_v5, %v2628_v54 }
0x38d0   :  { %v2631_v60 = vsub.f32 %v2629_v57, %v2630_v55 }
0x38d2   :  { %v2633_v1 = vadd.f32 1e-05, %v2631_v60 }
0x38d4   :  { %3066 = vrsqrt.f32 %v2633_v1  ;;  %vm2640_vm0 = vweird.f32 %v2633_v1 }
0x38da   :  { %v3067_v35 = vpop.eup %3066 }
0x38db   :  { %v2635_v42 = vmul.f32 %v3067_v35, %v2633_v1  ;;  %vm2641_vm9 = vweird.f32 %v3067_v35 }
0x38dc   :  { %vm2642_vm2 = vmor %vm2640_vm0, %vm2641_vm9 }
0x38dd   :  { %v2636_v12 = vmul.f32 %v3067_v35, %v2635_v42 }
0x38df   :  { %v2637_v52 = vmul.f32 0.5, %v2636_v12 }
0x38e1   :  { %v2638_v19 = vsub.f32 1.5, %v2637_v52 }
0x38e3   :  { %v2639_v25 = vmul.f32 %v3067_v35, %v2638_v19 }
0x38e5   :  { %v2643_v10 = vsel %vm2642_vm2, %v3067_v35, %v2639_v25 }
0x38e6   :  { %v2644_v6 = vmul.f32 %v2643_v10, %v2632_v41 }
0x38e8   :  { %v2649_v39 = vmul.f32 %v2838_v17, %v2644_v6 }
0x38ea   :  { %v2654_v61 = vadd.f32 %v2839_v37, %v2649_v39 }
0x38ec   :  { %2815 = vmatmul.msk.f32.vlgmr.msrb.gmra.mxu0 %vm270_vm6, %v2654_v61 }
0x3969   :  { %v2683_v27 = vpop.f32.mrf.mxu0 }
0x396a   :  { %v2684_v31 = vadd.f32 %v2840_v8, %v2683_v27 }
0x396c   :  { %v2686_v20 = vmax.f32 %v2684_v31, 0.0 }
0x396e   :  { %2816 = vmatmul.msk.f32.vlgmr.msrb.gmra.mxu2 %vm270_vm6, %v2686_v20  ;;  %vm2737_vm6 = vcmask 7168  }
0x39f1   :  { %v2715_v49 = vpop.f32.mrf.mxu2 }
0x39f2   :  { %v2716_v56 = vadd.f32 %v2841_v15, %v2715_v49 }
0x39f4   :  { %v2817_v58 = vmul.f32 -1.442695, %v2716_v56 }
0x39f6   :  { %3068 = vpow2.f32 %v2817_v58 }
0x39fc   :  { %v3069_v62 = vpop.eup %3068 }
0x39fd   :  { %v2721_v7 = vadd.f32 1.0, %v3069_v62 }
0x39ff   :  { %3070 = vrcp.f32 %v2721_v7  ;;  %v2733_v26 = vand.u32 2147483648, %v2721_v7  ;;  %v2731_v9 = vand.u32 2147483647, %v2721_v7  ;;  %vm2727_vm4 = vweird.f32 %v2721_v7 }
0x3a01   :  { %v2734_v29 = vor.u32 1.1754944e-38, %v2733_v26  ;;  %vm2732_vm7 = vcmp.eq.f32.partialorder %v2731_v9, 8.507059e+37 }
0x3a05   :  { %v3071_v13 = vpop.eup %3070 }
0x3a06   :  { %v2723_v59 = vmul.f32 %v3071_v13, %v2721_v7  ;;  %vm2728_vm3 = vweird.f32 %v3071_v13 }
0x3a07   :  { %vm2729_vm5 = vmor %vm2727_vm4, %vm2728_vm3 }
0x3a08   :  { %v2724_v18 = vsub.f32 1.0, %v2723_v59 }
0x3a0a   :  { %v2725_v28 = vmul.f32 %v3071_v13, %v2724_v18 }
0x3a0c   :  { %v2726_v34 = vadd.f32 %v3071_v13, %v2725_v28 }
0x3a0e   :  { %v2730_v51 = vsel %vm2729_vm5, %v3071_v13, %v2726_v34 }
0x3a0f   :  { %v2735_v2 = vsel %vm2732_vm7, %v2734_v29, %v2730_v51 }
0x3a10   :  { %2738 = vst.msk [vmem:[%s4286_s20] sm:$0xff] %vm2737_vm6, %v2735_v2 }
0x3a11   :  { %2743 = vsyncpa [#allocation8], 1 }
0x3a12   :  { %2744 = vsyncpa [#allocation10], 1 }
0x3a13   :  { %2745 = vsyncpa [#allocation13], 1 }

</bundles_post_ra>
